<compile_context>
chip_gen: v5e
topology: v5e:2x2
jax: 0.10.0
libtpu: 0.0.40
codegen_flags: <defaults>
</compile_context>

<pallas_src>
from functools import partial

import jax
import jax.numpy as jnp
from jax import lax
from jax.experimental import pallas as pl
from jax.experimental.pallas import tpu as pltpu


def _combined_loss_kernel(pred_ref, tgt_ref, out_ref, *,
                          beta, boundary_weight, h, w):
    tb, hp, wp = pred_ref.shape
    r = tb * hp                              # images stacked along the sublane axis
    padded = (hp != h) or (wp != w)

    x = pred_ref[...].astype(jnp.float32).reshape(r, wp)   # logits
    t = tgt_ref[...].astype(jnp.float32).reshape(r, wp)    # {0,1} targets (0 in pads)

    # Small broadcastable masks (computed once, reused by both lap() calls).
    rloc = lax.broadcasted_iota(jnp.int32, (tb, hp, 1), 1).reshape(r, 1)  # row in image
    cloc = lax.broadcasted_iota(jnp.int32, (1, wp), 1)                    # column
    not_top, not_bot = rloc != 0, rloc != h - 1
    not_lft, not_rgt = cloc != 0, cloc != w - 1
    valid = jnp.logical_and(rloc < h, cloc < w) if padded else None

    # Shared transcendentals: one exp(-|x|) feeds sigmoid AND BCE-with-logits.
    e = jnp.exp(-jnp.abs(x))
    inv1pe = pl.reciprocal(1.0 + e, approx=True)            # EUP slot
    p = jnp.where(x >= 0.0, inv1pe, e * inv1pe)             # sigmoid(x)
    if padded:
        p = jnp.where(valid, p, 0.0)                        # pads contribute nothing
    # log(1+e) with e in (0,1]: abs error <= 1 ulp of the term (log1p not needed).
    bce = jnp.maximum(x, 0.0) - x * t + jnp.log(1.0 + e)

    # Dice / Tversky: only 3 cross-lane reductions per block; union/FP/FN derived.
    def sum_img(z):                                          # (r,wp) -> (tb,1,1)
        z3 = z.reshape(tb, hp, wp)
        return jnp.sum(jnp.sum(z3, axis=2, keepdims=True), axis=1, keepdims=True)

    smooth = 1.0
    inter = sum_img(p * t)                                   # TP
    sp, st = sum_img(p), sum_img(t)
    dice = (2.0 * inter + smooth) / (sp + st + smooth)
    tversky = (inter + smooth) / (beta * sp + (1.0 - beta) * st + smooth)
    # Per-row -(dice_i + tversky_i); summed over the H*W valid pixels of image i this
    # reproduces -(dice_i + tversky_i) * H * W exactly.
    dt_rows = jnp.broadcast_to(dice + tversky, (tb, hp, 1)).reshape(r, 1)

    # Zero-padded 3x3 Laplacian via XLU rolls + boundary masks (in-place accumulate).
    def lap(z):
        acc = -4.0 * z
        acc = acc + jnp.where(not_top, pltpu.roll(z, shift=1, axis=0), 0.0)      # z[i-1,j]
        acc = acc + jnp.where(not_bot, pltpu.roll(z, shift=r - 1, axis=0), 0.0)  # z[i+1,j]
        acc = acc + jnp.where(not_lft, pltpu.roll(z, shift=1, axis=1), 0.0)      # z[i,j-1]
        acc = acc + jnp.where(not_rgt, pltpu.roll(z, shift=wp - 1, axis=1), 0.0) # z[i,j+1]
        return acc

    pb = lap(p)
    tl = lap(t)
    bnd = jnp.maximum(pb, 0.0) - pb * tl + jnp.log(1.0 + jnp.exp(-jnp.abs(pb)))

    # Per-element slab; sum over all blocks / (n_img*H*W) + 2 == total loss.
    slab = bce + boundary_weight * bnd - dt_rows
    if padded:
        slab = jnp.where(valid, slab, 0.0)

    # Reduce (r, wp) -> (8, wp): pure VPU adds of sublane tiles; lane-dense store.
    out_ref[...] = jnp.sum(slab.reshape(r // 8, 8, wp), axis=0)


def _vmem_budget_bytes():
    try:
        cap = int(pltpu.get_tpu_info().vmem_capacity_bytes)
    except Exception:
        cap = 64 * 1024 * 1024          # conservative fallback (v7x-sized VMEM)
    return max(16 * 1024 * 1024, min(cap // 2, 64 * 1024 * 1024))


def _pick_block_images(n_img, hp, wp, in_bytes_per_elem, budget):
    """Largest divisor of n_img whose per-step working set (double-buffered inputs
    plus ~12 live f32 slab temporaries) stays inside ~3/4 of the VMEM budget."""
    per_img = hp * wp * (2 * in_bytes_per_elem + 12 * 4)
    max_tb = int(max(1, min(n_img, (budget * 3 // 4) // max(per_img, 1))))
    for cand in range(max_tb, 0, -1):
        if n_img % cand == 0:
            return cand
    return 1


def combined_loss(pred, target, beta=0.7, boundary_weight=2.0):
    """Pallas TPU implementation of CombinedLoss.forward. pred/target: (B, 1, H, W)."""
    B, C, H, W = pred.shape
    assert C == 1, "single-channel 3x3 Laplacian conv, as in the PyTorch module"
    n_img = B * C
    Hp = -(-H // 8) * 8          # sublane multiple
    Wp = -(-W // 128) * 128      # lane multiple (lane-dense layout)

    p = pred.reshape(n_img, H, W)
    # {0,1} targets are exact in bf16 -> halves the target HBM stream (v5e/v6e win).
    t = target.reshape(n_img, H, W).astype(jnp.bfloat16)
    if (Hp, Wp) != (H, W):
        p = jnp.pad(p, ((0, 0), (0, Hp - H), (0, Wp - W)))
        t = jnp.pad(t, ((0, 0), (0, Hp - H), (0, Wp - W)))

    budget = _vmem_budget_bytes()
    tb = _pick_block_images(n_img, Hp, Wp,
                            p.dtype.itemsize + t.dtype.itemsize, budget)
    grid = n_img // tb

    kernel = partial(_combined_loss_kernel, beta=float(beta),
                     boundary_weight=float(boundary_weight), h=H, w=W)

    partials = pl.pallas_call(
        kernel,
        out_shape=jax.ShapeDtypeStruct((grid * 8, Wp), jnp.float32),
        grid_spec=pltpu.PrefetchScalarGridSpec(
            num_scalar_prefetch=0,
            grid=(grid,),
            in_specs=[pl.BlockSpec((tb, Hp, Wp), lambda i: (i, 0, 0)),
                      pl.BlockSpec((tb, Hp, Wp), lambda i: (i, 0, 0))],
            out_specs=pl.BlockSpec((8, Wp), lambda i: (i, 0))),
        compiler_params=pltpu.CompilerParams(
            dimension_semantics=("parallel",),   # independent blocks -> both v7x TCs
            vmem_limit_bytes=budget),
    )(p, t)

    # loss = bce_mean + (1 - dice_mean) + (1 - tversky_mean) + bw * bnd_mean
    return 2.0 + jnp.sum(partials) / float(n_img * H * W)


# ------------------------ pure-JAX reference for sanity ------------------------
def _bce_with_logits_ref(x, t):
    return jnp.maximum(x, 0.0) - x * t + jnp.log(1.0 + jnp.exp(-jnp.abs(x)))


def _combined_loss_ref(pred, target, beta=0.7, boundary_weight=2.0):
    x = pred.astype(jnp.float32)
    t = target.astype(jnp.float32)

    bce = jnp.mean(_bce_with_logits_ref(x, t))

    p = jax.nn.sigmoid(x)
    smooth = 1.0
    inter = jnp.sum(p * t, axis=(2, 3))
    union = jnp.sum(p + t, axis=(2, 3))
    dice = jnp.mean((2.0 * inter + smooth) / (union + smooth))
    fp = jnp.sum(p * (1.0 - t), axis=(2, 3))
    fn = jnp.sum((1.0 - p) * t, axis=(2, 3))
    tversky = jnp.mean((inter + smooth) /
                       (inter + beta * fp + (1.0 - beta) * fn + smooth))

    k = jnp.array([[0., 1., 0.], [1., -4., 1.], [0., 1., 0.]],
                  jnp.float32).reshape(1, 1, 3, 3)
    conv = lambda z: lax.conv_general_dilated(
        z, k, (1, 1), ((1, 1), (1, 1)),
        dimension_numbers=("NCHW", "OIHW", "NCHW"))
    bnd = jnp.mean(_bce_with_logits_ref(conv(p), conv(t)))

    return bce + (1.0 - dice) + (1.0 - tversky) + boundary_weight * bnd


if __name__ == "__main__":
    key = jax.random.PRNGKey(0)
    k1, k2, k3, k4 = jax.random.split(key, 4)

    # Aligned case: lane-dense W, multi-image block.
    B, C, H, W = 16, 1, 16, 128
    pred = jax.random.normal(k1, (B, C, H, W), dtype=jnp.float32)
    target = (jax.random.uniform(k2, (B, C, H, W)) > 0.5).astype(jnp.float32)
    loss = combined_loss(pred, target)
    jax.block_until_ready(loss)
    ref = _combined_loss_ref(pred, target)
    assert jnp.allclose(loss, ref, rtol=1e-3, atol=1e-3), (loss, ref)

    # Unaligned case: exercises the in-kernel (8,128) padding / validity masks.
    B2, H2, W2 = 4, 13, 100
    pred2 = jax.random.normal(k3, (B2, 1, H2, W2), dtype=jnp.float32)
    target2 = (jax.random.uniform(k4, (B2, 1, H2, W2)) > 0.5).astype(jnp.float32)
    loss2 = combined_loss(pred2, target2)
    jax.block_until_ready(loss2)
    ref2 = _combined_loss_ref(pred2, target2)
    assert jnp.allclose(loss2, ref2, rtol=1e-3, atol=1e-3), (loss2, ref2)

    print("KERNEL_OK")
</pallas_src>

<mosaic_0001>
module attributes {stable_mosaic.version = 11 : i64} {
  func.func @_combined_loss_kernel(%arg0: i32, %arg1: memref<16x16x128xf32, #tpu.memory_space<vmem>>, %arg2: memref<16x16x128xbf16, #tpu.memory_space<vmem>>, %arg3: memref<8x128xf32, #tpu.memory_space<vmem>>) attributes {dimension_semantics = [#tpu.dimension_semantics<parallel>], iteration_bounds = array<i64: 1>, scalar_prefetch = 0 : i64, scratch_operands = 0 : i64, tpu.core_type = #tpu.core_type<tc>, window_params = [{transform_indices = @transform_0, window_bounds = array<i64: 16, 16, 128>}, {transform_indices = @transform_1, window_bounds = array<i64: 16, 16, 128>}, {transform_indices = @transform_2, window_bounds = array<i64: 8, 128>}]} {
    %c0 = arith.constant 0 : index
    %c0_0 = arith.constant 0 : index
    %c0_1 = arith.constant 0 : index
    %0 = vector.load %arg1[%c0, %c0_0, %c0_1] : memref<16x16x128xf32, #tpu.memory_space<vmem>>, vector<16x16x128xf32>
    %1 = vector.shape_cast %0 : vector<16x16x128xf32> to vector<256x128xf32>
    %c0_2 = arith.constant 0 : index
    %c0_3 = arith.constant 0 : index
    %c0_4 = arith.constant 0 : index
    %2 = vector.load %arg2[%c0_2, %c0_3, %c0_4] : memref<16x16x128xbf16, #tpu.memory_space<vmem>>, vector<16x16x128xbf16>
    %3 = arith.extf %2 : vector<16x16x128xbf16> to vector<16x16x128xf32>
    %4 = vector.shape_cast %3 : vector<16x16x128xf32> to vector<256x128xf32>
    %5 = tpu.iota {dimensions = array<i32: 1>} : vector<16x16x1xi32>
    %6 = vector.shape_cast %5 : vector<16x16x1xi32> to vector<256x1xi32>
    %7 = tpu.iota {dimensions = array<i32: 1>} : vector<1x128xi32>
    %c0_i32 = arith.constant 0 : i32
    %8 = vector.broadcast %c0_i32 : i32 to vector<256x1xi32>
    %9 = arith.cmpi ne, %6, %8 : vector<256x1xi32>
    %c15_i32 = arith.constant 15 : i32
    %10 = vector.broadcast %c15_i32 : i32 to vector<256x1xi32>
    %11 = arith.cmpi ne, %6, %10 : vector<256x1xi32>
    %c0_i32_5 = arith.constant 0 : i32
    %12 = vector.broadcast %c0_i32_5 : i32 to vector<1x128xi32>
    %13 = arith.cmpi ne, %7, %12 : vector<1x128xi32>
    %c127_i32 = arith.constant 127 : i32
    %14 = vector.broadcast %c127_i32 : i32 to vector<1x128xi32>
    %15 = arith.cmpi ne, %7, %14 : vector<1x128xi32>
    %16 = math.absf %1 : vector<256x128xf32>
    %cst = arith.constant 0.000000e+00 : f32
    %17 = vector.broadcast %cst : f32 to vector<256x128xf32>
    %18 = arith.subf %17, %16 : vector<256x128xf32>
    %19 = math.exp %18 : vector<256x128xf32>
    %cst_6 = arith.constant 1.000000e+00 : f32
    %20 = vector.broadcast %cst_6 : f32 to vector<256x128xf32>
    %21 = arith.addf %20, %19 : vector<256x128xf32>
    %22 = tpu.reciprocal %21 {approx = true} : vector<256x128xf32> -> vector<256x128xf32>
    %cst_7 = arith.constant 0.000000e+00 : f32
    %23 = vector.broadcast %cst_7 : f32 to vector<256x128xf32>
    %24 = arith.cmpf oge, %1, %23 : vector<256x128xf32>
    %25 = arith.mulf %19, %22 : vector<256x128xf32>
    %26 = arith.select %24, %22, %25 : vector<256x128xi1>, vector<256x128xf32>
    %cst_8 = arith.constant 0.000000e+00 : f32
    %27 = vector.broadcast %cst_8 : f32 to vector<256x128xf32>
    %28 = arith.maximumf %1, %27 : vector<256x128xf32>
    %29 = arith.mulf %1, %4 : vector<256x128xf32>
    %30 = arith.subf %28, %29 : vector<256x128xf32>
    %cst_9 = arith.constant 1.000000e+00 : f32
    %31 = vector.broadcast %cst_9 : f32 to vector<256x128xf32>
    %32 = arith.addf %31, %19 : vector<256x128xf32>
    %33 = math.log %32 : vector<256x128xf32>
    %34 = arith.addf %30, %33 : vector<256x128xf32>
    %35 = arith.mulf %26, %4 : vector<256x128xf32>
    %36 = vector.shape_cast %35 : vector<256x128xf32> to vector<16x16x128xf32>
    %cst_10 = arith.constant dense<0.000000e+00> : vector<16x16xf32>
    %37 = vector.multi_reduction <add>, %36, %cst_10 [2] : vector<16x16x128xf32> to vector<16x16xf32>
    %38 = vector.shape_cast %37 : vector<16x16xf32> to vector<16x16x1xf32>
    %cst_11 = arith.constant dense<0.000000e+00> : vector<16x1xf32>
    %39 = vector.multi_reduction <add>, %38, %cst_11 [1] : vector<16x16x1xf32> to vector<16x1xf32>
    %40 = vector.shape_cast %39 : vector<16x1xf32> to vector<16x1x1xf32>
    %41 = vector.shape_cast %26 : vector<256x128xf32> to vector<16x16x128xf32>
    %cst_12 = arith.constant dense<0.000000e+00> : vector<16x16xf32>
    %42 = vector.multi_reduction <add>, %41, %cst_12 [2] : vector<16x16x128xf32> to vector<16x16xf32>
    %43 = vector.shape_cast %42 : vector<16x16xf32> to vector<16x16x1xf32>
    %cst_13 = arith.constant dense<0.000000e+00> : vector<16x1xf32>
    %44 = vector.multi_reduction <add>, %43, %cst_13 [1] : vector<16x16x1xf32> to vector<16x1xf32>
    %45 = vector.shape_cast %44 : vector<16x1xf32> to vector<16x1x1xf32>
    %46 = vector.shape_cast %4 : vector<256x128xf32> to vector<16x16x128xf32>
    %cst_14 = arith.constant dense<0.000000e+00> : vector<16x16xf32>
    %47 = vector.multi_reduction <add>, %46, %cst_14 [2] : vector<16x16x128xf32> to vector<16x16xf32>
    %48 = vector.shape_cast %47 : vector<16x16xf32> to vector<16x16x1xf32>
    %cst_15 = arith.constant dense<0.000000e+00> : vector<16x1xf32>
    %49 = vector.multi_reduction <add>, %48, %cst_15 [1] : vector<16x16x1xf32> to vector<16x1xf32>
    %50 = vector.shape_cast %49 : vector<16x1xf32> to vector<16x1x1xf32>
    %cst_16 = arith.constant 2.000000e+00 : f32
    %51 = vector.broadcast %cst_16 : f32 to vector<16x1x1xf32>
    %52 = arith.mulf %51, %40 : vector<16x1x1xf32>
    %cst_17 = arith.constant 1.000000e+00 : f32
    %53 = vector.broadcast %cst_17 : f32 to vector<16x1x1xf32>
    %54 = arith.addf %52, %53 : vector<16x1x1xf32>
    %55 = arith.addf %45, %50 : vector<16x1x1xf32>
    %cst_18 = arith.constant 1.000000e+00 : f32
    %56 = vector.broadcast %cst_18 : f32 to vector<16x1x1xf32>
    %57 = arith.addf %55, %56 : vector<16x1x1xf32>
    %58 = arith.divf %54, %57 : vector<16x1x1xf32>
    %cst_19 = arith.constant 1.000000e+00 : f32
    %59 = vector.broadcast %cst_19 : f32 to vector<16x1x1xf32>
    %60 = arith.addf %40, %59 : vector<16x1x1xf32>
    %cst_20 = arith.constant 0.699999988 : f32
    %61 = vector.broadcast %cst_20 : f32 to vector<16x1x1xf32>
    %62 = arith.mulf %61, %45 : vector<16x1x1xf32>
    %cst_21 = arith.constant 3.000000e-01 : f32
    %63 = vector.broadcast %cst_21 : f32 to vector<16x1x1xf32>
    %64 = arith.mulf %63, %50 : vector<16x1x1xf32>
    %65 = arith.addf %62, %64 : vector<16x1x1xf32>
    %cst_22 = arith.constant 1.000000e+00 : f32
    %66 = vector.broadcast %cst_22 : f32 to vector<16x1x1xf32>
    %67 = arith.addf %65, %66 : vector<16x1x1xf32>
    %68 = arith.divf %60, %67 : vector<16x1x1xf32>
    %69 = arith.addf %58, %68 : vector<16x1x1xf32>
    %70 = vector.shape_cast %69 : vector<16x1x1xf32> to vector<16x1x1xf32>
    %71 = vector.broadcast %70 : vector<16x1x1xf32> to vector<16x16x1xf32>
    %72 = vector.shape_cast %71 : vector<16x16x1xf32> to vector<256x1xf32>
    %cst_23 = arith.constant -4.000000e+00 : f32
    %73 = vector.broadcast %cst_23 : f32 to vector<256x128xf32>
    %74 = arith.mulf %73, %26 : vector<256x128xf32>
    %c1_i32 = arith.constant 1 : i32
    %75 = tpu.dynamic_rotate %26 by %c1_i32 dim 0 : vector<256x128xf32>, i32 -> vector<256x128xf32>
    %cst_24 = arith.constant 0.000000e+00 : f32
    %76 = vector.shape_cast %9 : vector<256x1xi1> to vector<256x1xi1>
    %77 = vector.broadcast %76 : vector<256x1xi1> to vector<256x128xi1>
    %78 = vector.broadcast %cst_24 : f32 to vector<256x128xf32>
    %79 = arith.select %77, %75, %78 : vector<256x128xi1>, vector<256x128xf32>
    %80 = arith.addf %74, %79 : vector<256x128xf32>
    %c255_i32 = arith.constant 255 : i32
    %81 = tpu.dynamic_rotate %26 by %c255_i32 dim 0 : vector<256x128xf32>, i32 -> vector<256x128xf32>
    %cst_25 = arith.constant 0.000000e+00 : f32
    %82 = vector.shape_cast %11 : vector<256x1xi1> to vector<256x1xi1>
    %83 = vector.broadcast %82 : vector<256x1xi1> to vector<256x128xi1>
    %84 = vector.broadcast %cst_25 : f32 to vector<256x128xf32>
    %85 = arith.select %83, %81, %84 : vector<256x128xi1>, vector<256x128xf32>
    %86 = arith.addf %80, %85 : vector<256x128xf32>
    %c1_i32_26 = arith.constant 1 : i32
    %87 = tpu.dynamic_rotate %26 by %c1_i32_26 dim 1 : vector<256x128xf32>, i32 -> vector<256x128xf32>
    %cst_27 = arith.constant 0.000000e+00 : f32
    %88 = vector.shape_cast %13 : vector<1x128xi1> to vector<1x128xi1>
    %89 = vector.broadcast %88 : vector<1x128xi1> to vector<256x128xi1>
    %90 = vector.broadcast %cst_27 : f32 to vector<256x128xf32>
    %91 = arith.select %89, %87, %90 : vector<256x128xi1>, vector<256x128xf32>
    %92 = arith.addf %86, %91 : vector<256x128xf32>
    %c127_i32_28 = arith.constant 127 : i32
    %93 = tpu.dynamic_rotate %26 by %c127_i32_28 dim 1 : vector<256x128xf32>, i32 -> vector<256x128xf32>
    %cst_29 = arith.constant 0.000000e+00 : f32
    %94 = vector.shape_cast %15 : vector<1x128xi1> to vector<1x128xi1>
    %95 = vector.broadcast %94 : vector<1x128xi1> to vector<256x128xi1>
    %96 = vector.broadcast %cst_29 : f32 to vector<256x128xf32>
    %97 = arith.select %95, %93, %96 : vector<256x128xi1>, vector<256x128xf32>
    %98 = arith.addf %92, %97 : vector<256x128xf32>
    %cst_30 = arith.constant -4.000000e+00 : f32
    %99 = vector.broadcast %cst_30 : f32 to vector<256x128xf32>
    %100 = arith.mulf %99, %4 : vector<256x128xf32>
    %c1_i32_31 = arith.constant 1 : i32
    %101 = tpu.dynamic_rotate %4 by %c1_i32_31 dim 0 : vector<256x128xf32>, i32 -> vector<256x128xf32>
    %cst_32 = arith.constant 0.000000e+00 : f32
    %102 = vector.shape_cast %9 : vector<256x1xi1> to vector<256x1xi1>
    %103 = vector.broadcast %102 : vector<256x1xi1> to vector<256x128xi1>
    %104 = vector.broadcast %cst_32 : f32 to vector<256x128xf32>
    %105 = arith.select %103, %101, %104 : vector<256x128xi1>, vector<256x128xf32>
    %106 = arith.addf %100, %105 : vector<256x128xf32>
    %c255_i32_33 = arith.constant 255 : i32
    %107 = tpu.dynamic_rotate %4 by %c255_i32_33 dim 0 : vector<256x128xf32>, i32 -> vector<256x128xf32>
    %cst_34 = arith.constant 0.000000e+00 : f32
    %108 = vector.shape_cast %11 : vector<256x1xi1> to vector<256x1xi1>
    %109 = vector.broadcast %108 : vector<256x1xi1> to vector<256x128xi1>
    %110 = vector.broadcast %cst_34 : f32 to vector<256x128xf32>
    %111 = arith.select %109, %107, %110 : vector<256x128xi1>, vector<256x128xf32>
    %112 = arith.addf %106, %111 : vector<256x128xf32>
    %c1_i32_35 = arith.constant 1 : i32
    %113 = tpu.dynamic_rotate %4 by %c1_i32_35 dim 1 : vector<256x128xf32>, i32 -> vector<256x128xf32>
    %cst_36 = arith.constant 0.000000e+00 : f32
    %114 = vector.shape_cast %13 : vector<1x128xi1> to vector<1x128xi1>
    %115 = vector.broadcast %114 : vector<1x128xi1> to vector<256x128xi1>
    %116 = vector.broadcast %cst_36 : f32 to vector<256x128xf32>
    %117 = arith.select %115, %113, %116 : vector<256x128xi1>, vector<256x128xf32>
    %118 = arith.addf %112, %117 : vector<256x128xf32>
    %c127_i32_37 = arith.constant 127 : i32
    %119 = tpu.dynamic_rotate %4 by %c127_i32_37 dim 1 : vector<256x128xf32>, i32 -> vector<256x128xf32>
    %cst_38 = arith.constant 0.000000e+00 : f32
    %120 = vector.shape_cast %15 : vector<1x128xi1> to vector<1x128xi1>
    %121 = vector.broadcast %120 : vector<1x128xi1> to vector<256x128xi1>
    %122 = vector.broadcast %cst_38 : f32 to vector<256x128xf32>
    %123 = arith.select %121, %119, %122 : vector<256x128xi1>, vector<256x128xf32>
    %124 = arith.addf %118, %123 : vector<256x128xf32>
    %cst_39 = arith.constant 0.000000e+00 : f32
    %125 = vector.broadcast %cst_39 : f32 to vector<256x128xf32>
    %126 = arith.maximumf %98, %125 : vector<256x128xf32>
    %127 = arith.mulf %98, %124 : vector<256x128xf32>
    %128 = arith.subf %126, %127 : vector<256x128xf32>
    %129 = math.absf %98 : vector<256x128xf32>
    %cst_40 = arith.constant 0.000000e+00 : f32
    %130 = vector.broadcast %cst_40 : f32 to vector<256x128xf32>
    %131 = arith.subf %130, %129 : vector<256x128xf32>
    %132 = math.exp %131 : vector<256x128xf32>
    %cst_41 = arith.constant 1.000000e+00 : f32
    %133 = vector.broadcast %cst_41 : f32 to vector<256x128xf32>
    %134 = arith.addf %133, %132 : vector<256x128xf32>
    %135 = math.log %134 : vector<256x128xf32>
    %136 = arith.addf %128, %135 : vector<256x128xf32>
    %cst_42 = arith.constant 2.000000e+00 : f32
    %137 = vector.broadcast %cst_42 : f32 to vector<256x128xf32>
    %138 = arith.mulf %137, %136 : vector<256x128xf32>
    %139 = arith.addf %34, %138 : vector<256x128xf32>
    %140 = vector.broadcast %72 : vector<256x1xf32> to vector<256x128xf32>
    %141 = arith.subf %139, %140 : vector<256x128xf32>
    %142 = vector.shape_cast %141 : vector<256x128xf32> to vector<32x8x128xf32>
    %cst_43 = arith.constant dense<0.000000e+00> : vector<8x128xf32>
    %143 = vector.multi_reduction <add>, %142, %cst_43 [0] : vector<32x8x128xf32> to vector<8x128xf32>
    %c0_44 = arith.constant 0 : index
    %c0_45 = arith.constant 0 : index
    %144 = vector.load %arg3[%c0_44, %c0_45] : memref<8x128xf32, #tpu.memory_space<vmem>>, vector<8x128xf32>
    tpu.vector_store %arg3[%c0_44, %c0_45], %143 {strides = array<i32>} : memref<8x128xf32, #tpu.memory_space<vmem>>, vector<8x128xf32>,
    return
  }
  func.func @transform_0(%arg0: i32) -> (i32, i32, i32) {
    %c0_i32 = arith.constant 0 : i32
    %c0_i32_0 = arith.constant 0 : i32
    %c0_i32_1 = arith.constant 0 : i32
    return %arg0, %c0_i32, %c0_i32_0 : i32, i32, i32
  }
  func.func @transform_1(%arg0: i32) -> (i32, i32, i32) {
    %c0_i32 = arith.constant 0 : i32
    %c0_i32_0 = arith.constant 0 : i32
    %c0_i32_1 = arith.constant 0 : i32
    return %arg0, %c0_i32, %c0_i32_0 : i32, i32, i32
  }
  func.func @transform_2(%arg0: i32) -> (i32, i32) {
    %c0_i32 = arith.constant 0 : i32
    %c0_i32_0 = arith.constant 0 : i32
    return %arg0, %c0_i32 : i32, i32
  }
}

</mosaic_0001>

<bundles_post_ra>
// kernel: tpu_custom_call.1
= control target key start
LH: loop header
LB: loop body
LE: loop exit
PB: predicated region body
PF: predicated region fallthrough
CT: control target
= control target key end

     0   :  { %7 = vsyncpa [#allocation3], 0  ;;  %s8230_s0 = inlined_call_operand.hbm [shape: f32[16,16,128], index: 0, kind: input, shape index: {}]   ;;  %s8231_s1 = inlined_call_operand.hbm [shape: bf16[16,16,128], index: 1, kind: input, shape index: {}]   ;;  %s8232_s2 = inlined_call_operand.hbm [shape: f32[8,128], index: 2, kind: output, shape index: {}]  }
   0x1   :  { %8 = vsyncpa [#allocation6], 0 }
   0x2   :  { %9 = vsyncpa [#allocation4], 0  ;;  %s14_s11 = sshll.u32 %s8230_s0, 4  ;;  %s4173_s12 = smov [#allocation2]   ;;  %s15_s11 = int_to_ptr.hbm [resolvable:$true] %s14_s11 }
   0x3   :  { %s16_s13 = sshll.u32 %s4173_s12, 4  ;;  %s27_s16 = sshll.u32 %s8231_s1, 4  ;;  %s17_s13 = int_to_ptr.vmem [resolvable:$true] %s16_s13  ;;  %s28_s16 = int_to_ptr.hbm [resolvable:$true] %s27_s16 }
   0x4   :  { %s4174_s17 = smov 128   ;;  %s4175_s18 = smov 8  }
   0x5   :  { %22 = dma.hbm_to_vmem [thread:$0]  %s15_s11, 4096, %s17_s13, [#allocation3], %s4174_s17, %s4174_s17, %s4175_s18  }
   0x6   :  { %s4176_s19 = smov [#allocation5]   ;;  %s4177_s21 = smov 64  }
   0x7   :  { %s29_s20 = sshll.u32 %s4176_s19, 4  ;;  %s4178_s22 = smov 4   ;;  %s30_s20 = int_to_ptr.vmem [resolvable:$true] %s29_s20 }
   0x8   :  { %35 = dma.hbm_to_vmem [thread:$0]  %s28_s16, 2048, %s30_s20, [#allocation6], %s4177_s21, %s4177_s21, %s4178_s22  }
   0x9   :  { %4167 = dma.done.wait [#allocation3], 4096  }
   0xa   :  { %4168 = vsyncadd [#allocation3], 4294963200 }
   0xb   :  { %4169 = dma.done.wait [#allocation6], 2048  }
   0xc   :  { %4170 = vsyncadd [#allocation6], 4294965248  ;;  %v4203_v0 = vld [vmem:[#allocation2 + $0x20] sm:$0xff]  ;;  %v4205_v1 = vld [vmem:[#allocation2 + $0x10] sm:$0xff]  ;;  %s4179_s0 = smov 1   ;;  %s4180_s1 = smov 127  }
   0xd   :  { %v155_v2 = vand.u32 2147483647, %v4203_v0  ;;  %v153_v3 = vand.u32 2147483647, %v4205_v1  ;;  %v4209_v4 = vld [vmem:[#allocation2] sm:$0xff]  ;;  %v4211_v5 = vld [vmem:[#allocation2 + $0x28] sm:$0xff] }
   0xe   :  { %v151_v8 = vand.u32 2147483647, %v4209_v4  ;;  %v4214_v9 = vld [vmem:[#allocation2 + $0x18] sm:$0xff]  ;;  %v4216_v10 = vld [vmem:[#allocation2 + $0x8] sm:$0xff]  ;;  %v156_v11 = vand.u32 2147483647, %v4211_v5 }
   0xf   :  { %v187_v6 = vsub.f32 0.0, %v155_v2  ;;  %v185_v7 = vsub.f32 0.0, %v153_v3  ;;  %v154_v12 = vand.u32 2147483647, %v4214_v9  ;;  %v152_v18 = vand.u32 2147483647, %v4216_v10 }
  0x10   :  { %v183_v15 = vsub.f32 0.0, %v151_v8  ;;  %v188_v16 = vsub.f32 0.0, %v156_v11  ;;  %v4221_v19 = vld [vmem:[#allocation2 + $0x40] sm:$0xff]  ;;  %v4223_v21 = vld [vmem:[#allocation2 + $0x38] sm:$0xff]  ;;  %v3496_v25 = vld [vmem:[#allocation5 + $0x10] sm:$0xff]   ;;  %vm347_vm0 = vcmp.ge.f32.partialorder %v4203_v0, 0.0 }
  0x11   :  { %v223_v13 = vmul.f32 1.442695, %v187_v6  ;;  %v219_v14 = vmul.f32 1.442695, %v185_v7  ;;  %v186_v17 = vsub.f32 0.0, %v154_v12  ;;  %v184_v24 = vsub.f32 0.0, %v152_v18 }
  0x12   :  { %v215_v20 = vmul.f32 1.442695, %v183_v15  ;;  %v225_v22 = vmul.f32 1.442695, %v188_v16  ;;  %v159_v26 = vand.u32 2147483647, %v4221_v19  ;;  %v4234_v36 = vunpack.c.l.bf16 %v3496_v25 }
  0x13   :  { %3679 = vpow2.f32 %v223_v13  ;;  %v221_v23 = vmul.f32 1.442695, %v186_v17  ;;  %v4226_v27 = vld [vmem:[#allocation2 + $0x30] sm:$0xff]  ;;  %v3495_v28 = vld [vmem:[#allocation5 + $0x8] sm:$0xff]   ;;  %v217_v29 = vmul.f32 1.442695, %v184_v24  ;;  %v4244_v43 = vunpack.c.h.bf16 %v3496_v25 }
  0x14   :  { %3681 = vpow2.f32 %v219_v14  ;;  %v158_v30 = vand.u32 2147483647, %v4223_v21  ;;  %v4229_v31 = vld [vmem:[#allocation2 + $0x58] sm:$0xff]  ;;  %v191_v32 = vsub.f32 0.0, %v159_v26  ;;  %v4231_v33 = vld [vmem:[#allocation2 + $0x50] sm:$0xff]  ;;  %8625 = vst [vmem:[#allocation11_spill] sm:$0xff] %v4234_v36  ;;  %v4236_v37 = vunpack.c.l.bf16 %v3495_v28 }
  0x15   :  { %3683 = vpow2.f32 %v215_v20  ;;  %v157_v34 = vand.u32 2147483647, %v4226_v27  ;;  %v4238_v38 = vld [vmem:[#allocation5] sm:$0xff]   ;;  %v162_v40 = vand.u32 2147483647, %v4229_v31  ;;  %8628 = vst [vmem:[#allocation14_spill] sm:$0xff] %v4244_v43  ;;  %v4252_v49 = vunpack.c.h.bf16 %v3495_v28 }
  0x16   :  { %3685 = vpow2.f32 %v225_v22  ;;  %8626 = vst [vmem:[#allocation12_spill] sm:$0xff] %v4236_v37  ;;  %v231_v39 = vmul.f32 1.442695, %v191_v32  ;;  %v190_v44 = vsub.f32 0.0, %v158_v30  ;;  %v161_v45 = vand.u32 2147483647, %v4231_v33 }
  0x17   :  { %3687 = vpow2.f32 %v221_v23  ;;  %v4247_v46 = vld [vmem:[#allocation2 + $0x48] sm:$0xff]  ;;  %vm345_vm1 = vcmp.ge.f32.partialorder %v4205_v1, 0.0  ;;  %8630 = vst [vmem:[#allocation16_spill] sm:$0xff] %v4252_v49  ;;  %v189_v50 = vsub.f32 0.0, %v157_v34  ;;  %v4256_v52 = vunpack.c.l.bf16 %v4238_v38  ;;  %v4265_v58 = vld [vmem:[#allocation2 + $0x70] sm:$0xff]  ;;  %v4284_v13 = vld [vmem:[#allocation2 + $0x60] sm:$0xff] }
  0x18   :  { %3689 = vpow2.f32 %v217_v29  ;;  %vm343_vm2 = vcmp.ge.f32.partialorder %v4209_v4, 0.0  ;;  %v194_v56 = vsub.f32 0.0, %v162_v40  ;;  %v160_v57 = vand.u32 2147483647, %v4247_v46  ;;  %v4267_v59 = vld [vmem:[#allocation2 + $0x68] sm:$0xff]  ;;  %s4181_s23 = smov [#allocation7]  }
  0x19   :  { %v3680_v35 = vpop.eup %3679  ;;  %3691 = vpow2.f32 %v231_v39  ;;  %8631 = vst [vmem:[#allocation17_spill] sm:$0xff] %v4256_v52  ;;  %v229_v62 = vmul.f32 1.442695, %v190_v44  ;;  %v193_v63 = vsub.f32 0.0, %v161_v45  ;;  %v227_v3 = vmul.f32 1.442695, %v189_v50 }
  0x1a   :  { %v3682_v41 = vpop.eup %3681  ;;  %v4241_v42 = vadd.f32 1.0, %v3680_v35  ;;  %v192_v6 = vsub.f32 0.0, %v160_v57  ;;  %vm348_vm3 = vcmp.ge.f32.partialorder %v4211_v5, 0.0  ;;  %v165_v7 = vand.u32 2147483647, %v4265_v58  ;;  %v4301_v44 = vld [vmem:[#allocation2 + $0x88] sm:$0xff] }
  0x1b   :  { %v3684_v47 = vpop.eup %3683  ;;  %v4249_v48 = vadd.f32 1.0, %v3682_v41  ;;  %v164_v8 = vand.u32 2147483647, %v4267_v59  ;;  %vm346_vm4 = vcmp.ge.f32.partialorder %v4214_v9, 0.0  ;;  %vm344_vm5 = vcmp.ge.f32.partialorder %v4216_v10, 0.0  ;;  %s3418_s24 = sshll.u32 %s4181_s23, 4  ;;  %s3419_s24 = int_to_ptr.vmem [resolvable:$true] %s3418_s24 }
  0x1c   :  { %8627 = vst [vmem:[#allocation13_spill] sm:$0xff] %v4241_v42  ;;  %v3686_v51 = vpop.eup %3685  ;;  %3693 = vrcp.f32 %v4241_v42  ;;  %v4258_v53 = vadd.f32 1.0, %v3684_v47  ;;  %v237_v12 = vmul.f32 1.442695, %v194_v56  ;;  %v235_v16 = vmul.f32 1.442695, %v193_v63 }
  0x1d   :  { %8629 = vst [vmem:[#allocation15_spill] sm:$0xff] %v4249_v48  ;;  %v3688_v54 = vpop.eup %3687  ;;  %3695 = vrcp.f32 %v4249_v48  ;;  %v4262_v55 = vadd.f32 1.0, %v3686_v51  ;;  %v197_v17 = vsub.f32 0.0, %v165_v7  ;;  %v233_v22 = vmul.f32 1.442695, %v192_v6  ;;  %v3497_v63 = vld [vmem:[#allocation5 + $0x18] sm:$0xff]  }
  0x1e   :  { %8632 = vst [vmem:[#allocation18_spill] sm:$0xff] %v4258_v53  ;;  %v3690_v60 = vpop.eup %3689  ;;  %3697 = vrcp.f32 %v4258_v53  ;;  %v4270_v61 = vadd.f32 1.0, %v3688_v54  ;;  %v196_v23 = vsub.f32 0.0, %v164_v8  ;;  %v163_v28 = vand.u32 2147483647, %v4284_v13  ;;  %v4472_v53 = vld [vmem:[#allocation2 + $0xa8] sm:$0xff] }
  0x1f   :  { %8633 = vst [vmem:[#allocation19_spill] sm:$0xff] %v4262_v55  ;;  %3699 = vrcp.f32 %v4262_v55  ;;  %v4273_v2 = vadd.f32 1.0, %v3690_v60  ;;  %v4279_v11 = vpop.eup %3691  ;;  %v243_v26 = vmul.f32 1.442695, %v197_v17  ;;  %v168_v7 = vand.u32 2147483647, %v4301_v44 }
  0x20   :  { %8634 = vst [vmem:[#allocation20_spill] sm:$0xff] %v4270_v61  ;;  %3701 = vrcp.f32 %v4270_v61  ;;  %v4287_v15 = vadd.f32 1.0, %v4279_v11  ;;  %v241_v34 = vmul.f32 1.442695, %v196_v23  ;;  %v195_v6 = vsub.f32 0.0, %v163_v28  ;;  %v4497_v42 = vld [vmem:[#allocation2 + $0xc8] sm:$0xff] }
  0x21   :  { %8635 = vst [vmem:[#allocation21_spill] sm:$0xff] %v4273_v2  ;;  %3703 = vrcp.f32 %v4273_v2  ;;  %vm351_vm6 = vcmp.ge.f32.partialorder %v4221_v19, 0.0  ;;  %vm350_vm7 = vcmp.ge.f32.partialorder %v4223_v21, 0.0  ;;  %vm349_vm8 = vcmp.ge.f32.partialorder %v4226_v27, 0.0  ;;  %s3420_s27 = sshll.u32 %s8232_s2, 4  ;;  %s3421_s27 = int_to_ptr.hbm [resolvable:$true] %s3420_s27 }
  0x22   :  { %v3694_v14 = vpop.eup %3693  ;;  %8636 = vst [vmem:[#allocation22_spill] sm:$0xff] %v4287_v15  ;;  %3705 = vpow2.f32 %v229_v62  ;;  %v4314_v62 = vld [vmem:[#allocation5 + $0x20] sm:$0xff]   ;;  %v239_v28 = vmul.f32 1.442695, %v195_v6  ;;  %vm354_vm9 = vcmp.ge.f32.partialorder %v4229_v31, 0.0  ;;  %vm353_vm10 = vcmp.ge.f32.partialorder %v4231_v33, 0.0 }
  0x23   :  { %v3696_v18 = vpop.eup %3695  ;;  %v379_v20 = vmul.f32 %v3694_v14, %v3680_v35  ;;  %3707 = vpow2.f32 %v227_v3  ;;  %vm352_vm11 = vcmp.ge.f32.partialorder %v4247_v46, 0.0  ;;  %vm357_vm12 = vcmp.ge.f32.partialorder %v4265_v58, 0.0  ;;  %v4447_v46 = vld [vmem:[#allocation2 + $0xb8] sm:$0xff] }
  0x24   :  { %v3698_v24 = vpop.eup %3697  ;;  %v377_v25 = vmul.f32 %v3696_v18, %v3682_v41  ;;  %3709 = vrcp.f32 %v4287_v15  ;;  %vm356_vm13 = vcmp.ge.f32.partialorder %v4267_v59, 0.0  ;;  %vm355_vm14 = vcmp.ge.f32.partialorder %v4284_v13, 0.0 }
  0x25   :  { %v3700_v29 = vpop.eup %3699  ;;  %v4293_v30 = vsel %vm347_vm0, %v3694_v14, %v379_v20  ;;  %v375_v32 = vmul.f32 %v3698_v24, %v3684_v47  ;;  %3711 = vpow2.f32 %v237_v12  ;;  %v4334_v14 = vunpack.c.l.bf16 %v4314_v62 }
  0x26   :  { %v3702_v39 = vpop.eup %3701  ;;  %v635_v35 = vmul.f32 %v4234_v36, %v4293_v30  ;;  %v4299_v40 = vsel %vm345_vm1, %v3696_v18, %v377_v25  ;;  %v380_v41 = vmul.f32 %v3700_v29, %v3686_v51  ;;  %3713 = vpow2.f32 %v235_v16  ;;  %v4353_v25 = vld [vmem:[#allocation2 + $0x80] sm:$0xff] }
  0x27   :  { %v3704_v45 = vpop.eup %3703  ;;  %v633_v0 = vmul.f32 %v4236_v37, %v4299_v40  ;;  %v4307_v47 = vsel %vm343_vm2, %v3698_v24, %v375_v32  ;;  %v378_v50 = vmul.f32 %v3702_v39, %v3688_v54  ;;  %3715 = vpow2.f32 %v233_v22  ;;  %8640 = vst [vmem:[#allocation26_spill] sm:$0xff] %v4334_v14  ;;  %v4360_v32 = vld [vmem:[#allocation2 + $0x78] sm:$0xff] }
  0x28   :  { %v3706_v56 = vpop.eup %3705  ;;  %671 = vadd.xlane.f32.xlu2 %v635_v35  ;;  %v631_v1 = vmul.f32 %v4256_v52, %v4307_v47  ;;  %v4312_v51 = vunpack.c.h.bf16 %v4238_v38  ;;  %v376_v57 = vmul.f32 %v3704_v45, %v3690_v60  ;;  %3717 = vpow2.f32 %v243_v26 }
  0x29   :  { %v3708_v3 = vpop.eup %3707  ;;  %667 = vadd.xlane.f32.xlu1 %v633_v0  ;;  %v4318_v4 = vsel %vm348_vm3, %v3700_v29, %v380_v41  ;;  %v4320_v54 = vadd.f32 1.0, %v3706_v56  ;;  %v4325_v38 = vsel %vm346_vm4, %v3702_v39, %v378_v50  ;;  %3719 = vpow2.f32 %v241_v34 }
  0x2a   :  { %8637 = vst [vmem:[#allocation23_spill] sm:$0xff] %v4312_v51  ;;  %v3710_v8 = vpop.eup %3709  ;;  %663 = vadd.xlane.f32.xlu0 %v631_v1  ;;  %v4329_v60 = vsel %vm344_vm5, %v3704_v45, %v376_v57  ;;  %v4331_v12 = vadd.f32 1.0, %v3708_v3  ;;  %v4337_v16 = vunpack.c.h.bf16 %v3497_v63  ;;  %v636_v17 = vmul.f32 %v4244_v43, %v4318_v4 }
  0x2b   :  { %8638 = vst [vmem:[#allocation24_spill] sm:$0xff] %v4320_v54  ;;  %v3712_v5 = vpop.eup %3711  ;;  %3721 = vrcp.f32 %v4320_v54  ;;  %v383_v10 = vmul.f32 %v3710_v8, %v4279_v11  ;;  %v634_v22 = vmul.f32 %v4252_v49, %v4325_v38  ;;  %v632_v23 = vmul.f32 %v4312_v51, %v4329_v60  ;;  %v4404_v54 = vld [vmem:[#allocation5 + $0x38] sm:$0xff]  }
  0x2c   :  { %8639 = vst [vmem:[#allocation25_spill] sm:$0xff] %v4331_v12  ;;  %v3714_v9 = vpop.eup %3713  ;;  %3723 = vrcp.f32 %v4331_v12  ;;  %v4344_v18 = vadd.f32 1.0, %v3712_v5  ;;  %v200_v29 = vsub.f32 0.0, %v168_v7  ;;  %v4362_v34 = vunpack.c.l.bf16 %v3497_v63  ;;  %v4383_v63 = vld [vmem:[#allocation2 + $0xa0] sm:$0xff]  ;;  %v3500_v12 = vld [vmem:[#allocation5 + $0x30] sm:$0xff]  }
  0x2d   :  { %8641 = vst [vmem:[#allocation27_spill] sm:$0xff] %v4337_v16  ;;  %v3716_v20 = vpop.eup %3715  ;;  %v4351_v24 = vadd.f32 1.0, %v3714_v9  ;;  %v4373_v41 = vsel %vm351_vm6, %v3710_v8, %v383_v10  ;;  %v167_v0 = vand.u32 2147483647, %v4353_v25  ;;  %v166_v57 = vand.u32 2147483647, %v4360_v32 }
  0x2e   :  { %8642 = vst [vmem:[#allocation28_spill] sm:$0xff] %v4344_v18  ;;  %v4355_v26 = vpop.eup %3717  ;;  %3725 = vrcp.f32 %v4344_v18  ;;  %v4358_v11 = vadd.f32 1.0, %v3716_v20  ;;  %v249_v45 = vmul.f32 1.442695, %v200_v29  ;;  %v639_v8 = vmul.f32 %v4334_v14, %v4373_v41 }
  0x2f   :  { %8643 = vst [vmem:[#allocation29_spill] sm:$0xff] %v4351_v24  ;;  %3727 = vrcp.f32 %v4351_v24  ;;  %v4367_v39 = vadd.f32 1.0, %v4355_v26  ;;  %v4369_v35 = vpop.eup %3719  ;;  %v199_v7 = vsub.f32 0.0, %v167_v0  ;;  %v198_v10 = vsub.f32 0.0, %v166_v57  ;;  %v3502_v24 = vld [vmem:[#allocation5 + $0x40] sm:$0xff]  }
  0x30   :  { %8644 = vst [vmem:[#allocation30_spill] sm:$0xff] %v4358_v11  ;;  %673 = vadd.xlane.f32.xlu2 %v636_v17  ;;  %3729 = vrcp.f32 %v4358_v11  ;;  %v4380_v1 = vadd.f32 1.0, %v4369_v35  ;;  %v4457_v48 = vunpack.c.l.bf16 %v3500_v12  ;;  %vm360_vm15 = vcmp.ge.f32.partialorder %v4301_v44, 0.0 }
  0x31   :  { %8645 = vst [vmem:[#allocation31_spill] sm:$0xff] %v4362_v34  ;;  %v3722_v50 = vpop.eup %3721  ;;  %669 = vadd.xlane.f32.xlu1 %v634_v22  ;;  %3731 = vrcp.f32 %v4367_v39  ;;  %v245_v57 = vmul.f32 1.442695, %v198_v10  ;;  %vm359_vm0 = vcmp.ge.f32.partialorder %v4353_v25, 0.0  ;;  %vm358_vm1 = vcmp.ge.f32.partialorder %v4360_v32, 0.0 }
  0x32   :  { %8646 = vst [vmem:[#allocation32_spill] sm:$0xff] %v4367_v39  ;;  %v3724_v19 = vpop.eup %3723  ;;  %665 = vadd.xlane.f32.xlu0 %v632_v23  ;;  %v382_v6 = vmul.f32 %v3722_v50, %v3706_v56  ;;  %3733 = vpow2.f32 %v239_v28  ;;  %v3499_v39 = vld [vmem:[#allocation5 + $0x28] sm:$0xff]   ;;  %v247_v23 = vmul.f32 1.442695, %v199_v7  ;;  %v171_v56 = vand.u32 2147483647, %v4383_v63 }
  0x33   :  { %8647 = vst [vmem:[#allocation33_spill] sm:$0xff] %v4373_v41  ;;  %v381_v17 = vmul.f32 %v3724_v19, %v3708_v3  ;;  %3735 = vrcp.f32 %v4380_v1  ;;  %v4402_v7 = vunpack.c.h.bf16 %v3499_v39  ;;  %vm363_vm2 = vcmp.ge.f32.partialorder %v4383_v63, 0.0 }
  0x34   :  { %8648 = vst [vmem:[#allocation34_spill] sm:$0xff] %v4380_v1  ;;  %v3726_v22 = vpop.eup %3725  ;;  %v4391_v29 = vsel %vm350_vm7, %v3722_v50, %v382_v6  ;;  %3737 = vpow2.f32 %v249_v45  ;;  %v203_v45 = vsub.f32 0.0, %v171_v56  ;;  %v4428_v56 = vunpack.c.l.bf16 %v4404_v54 }
  0x35   :  { %8649 = vst [vmem:[#allocation35_spill] sm:$0xff] %v4391_v29  ;;  %v3728_v11 = vpop.eup %3727  ;;  %v638_v28 = vmul.f32 %v4337_v16, %v4391_v29  ;;  %v4398_v3 = vsel %vm349_vm8, %v3724_v19, %v381_v17  ;;  %v386_v0 = vmul.f32 %v3726_v22, %v3712_v5  ;;  %3739 = vpow2.f32 %v247_v23  ;;  %v4412_v17 = vld [vmem:[#allocation2 + $0x98] sm:$0xff] }
  0x36   :  { %8650 = vst [vmem:[#allocation36_spill] sm:$0xff] %v4398_v3  ;;  %v3730_v1 = vpop.eup %3729  ;;  %v637_v21 = vmul.f32 %v4362_v34, %v4398_v3  ;;  %v385_v50 = vmul.f32 %v3728_v11, %v3714_v9  ;;  %3741 = vpow2.f32 %v245_v57  ;;  %v4406_v19 = vunpack.c.l.bf16 %v3499_v39 }
  0x37   :  { %v3732_v6 = vpop.eup %3731  ;;  %8651 = vst [vmem:[#allocation37_spill] sm:$0xff] %v4402_v7  ;;  %v384_v15 = vmul.f32 %v3730_v1, %v3716_v20  ;;  %v4409_v5 = vunpack.c.h.bf16 %v4314_v62  ;;  %v255_v9 = vmul.f32 1.442695, %v203_v45  ;;  %v4416_v20 = vsel %vm354_vm9, %v3726_v22, %v386_v0  ;;  %v4425_v62 = vld [vmem:[#allocation2 + $0x90] sm:$0xff] }
  0x38   :  { %v3734_v27 = vpop.eup %3733  ;;  %679 = vadd.xlane.f32.xlu2 %v639_v8  ;;  %8652 = vst [vmem:[#allocation38_spill] sm:$0xff] %v4406_v19  ;;  %v4420_v23 = vsel %vm353_vm10, %v3728_v11, %v385_v50  ;;  %v170_v11 = vand.u32 2147483647, %v4412_v17  ;;  %v642_v0 = vmul.f32 %v4402_v7, %v4416_v20  ;;  %v169_v50 = vand.u32 2147483647, %v4425_v62 }
  0x39   :  { %8653 = vst [vmem:[#allocation39_spill] sm:$0xff] %v4409_v5  ;;  %v3736_v10 = vpop.eup %3735  ;;  %677 = vadd.xlane.f32.xlu1 %v638_v28  ;;  %v4423_v39 = vadd.f32 1.0, %v3734_v27  ;;  %v4430_v28 = vunpack.c.h.bf16 %v3500_v12  ;;  %3743 = vpow2.f32 %v255_v9  ;;  %v4435_v31 = vsel %vm352_vm11, %v3730_v1, %v384_v15 }
  0x3a   :  { %8654 = vst [vmem:[#allocation40_spill] sm:$0xff] %v4416_v20  ;;  %v3738_v8 = vpop.eup %3737  ;;  %675 = vadd.xlane.f32.xlu0 %v637_v21  ;;  %v641_v57 = vmul.f32 %v4406_v19, %v4420_v23  ;;  %v389_v21 = vmul.f32 %v3732_v6, %v4355_v26  ;;  %v388_v1 = vmul.f32 %v3736_v10, %v4369_v35  ;;  %v202_v9 = vsub.f32 0.0, %v170_v11 }
  0x3b   :  { %8655 = vst [vmem:[#allocation41_spill] sm:$0xff] %v4420_v23  ;;  %3745 = vrcp.f32 %v4423_v39  ;;  %v4438_v33 = vadd.f32 1.0, %v3738_v8  ;;  %v3740_v22 = vpop.eup %3739  ;;  %v640_v61 = vmul.f32 %v4409_v5, %v4435_v31  ;;  %v201_v18 = vsub.f32 0.0, %v169_v50 }
  0x3c   :  { %8656 = vst [vmem:[#allocation42_spill] sm:$0xff] %v4423_v39  ;;  %v3742_v15 = vpop.eup %3741  ;;  %v4451_v45 = vadd.f32 1.0, %v3740_v22  ;;  %v4453_v39 = vld [vmem:[#allocation2 + $0xb0] sm:$0xff]  ;;  %v253_v35 = vmul.f32 1.442695, %v202_v9  ;;  %v4468_v11 = vsel %vm357_vm12, %v3732_v6, %v389_v21  ;;  %v4476_v9 = vsel %vm356_vm13, %v3736_v10, %v388_v1 }
  0x3d   :  { %8657 = vst [vmem:[#allocation43_spill] sm:$0xff] %v4428_v56  ;;  %3747 = vrcp.f32 %v4438_v33  ;;  %v4459_v26 = vadd.f32 1.0, %v3742_v15  ;;  %v251_v12 = vmul.f32 1.442695, %v201_v18  ;;  %v173_v50 = vand.u32 2147483647, %v4453_v39 }
  0x3e   :  { %8658 = vst [vmem:[#allocation44_spill] sm:$0xff] %v4430_v28  ;;  %3749 = vrcp.f32 %v4451_v45  ;;  %v4483_v21 = vld [vmem:[#allocation2 + $0xd0] sm:$0xff]  ;;  %v172_v10 = vand.u32 2147483647, %v4472_v53  ;;  %v4501_v7 = vunpack.c.l.bf16 %v3502_v24  ;;  %vm362_vm3 = vcmp.ge.f32.partialorder %v4412_v17, 0.0 }
  0x3f   :  { %8659 = vst [vmem:[#allocation45_spill] sm:$0xff] %v4435_v31  ;;  %v4464_v2 = vpop.eup %3743  ;;  %3751 = vrcp.f32 %v4459_v26  ;;  %v205_v18 = vsub.f32 0.0, %v173_v50  ;;  %v177_v50 = vand.u32 2147483647, %v4483_v21  ;;  %vm361_vm4 = vcmp.ge.f32.partialorder %v4425_v62, 0.0 }
  0x40   :  { %8660 = vst [vmem:[#allocation46_spill] sm:$0xff] %v4438_v33  ;;  %v174_v33 = vand.u32 2147483647, %v4447_v46  ;;  %685 = vadd.xlane.f32.xlu2 %v642_v0  ;;  %3753 = vpow2.f32 %v253_v35  ;;  %v4481_v0 = vunpack.c.h.bf16 %v3502_v24  ;;  %vm366_vm5 = vcmp.ge.f32.partialorder %v4447_v46, 0.0 }
  0x41   :  { %8661 = vst [vmem:[#allocation47_spill] sm:$0xff] %v4451_v45  ;;  %v3746_v55 = vpop.eup %3745  ;;  %683 = vadd.xlane.f32.xlu1 %v641_v57  ;;  %v4479_v45 = vadd.f32 1.0, %v4464_v2  ;;  %3755 = vpow2.f32 %v251_v12  ;;  %v645_v57 = vmul.f32 %v4428_v56, %v4468_v11  ;;  %v204_v12 = vsub.f32 0.0, %v172_v10 }
  0x42   :  { %8662 = vst [vmem:[#allocation48_spill] sm:$0xff] %v4457_v48  ;;  %v206_v58 = vsub.f32 0.0, %v174_v33  ;;  %681 = vadd.xlane.f32.xlu0 %v640_v61  ;;  %v387_v6 = vmul.f32 %v3746_v55, %v3734_v27  ;;  %v644_v33 = vmul.f32 %v4430_v28, %v4476_v9  ;;  %v259_v27 = vmul.f32 1.442695, %v205_v18 }
  0x43   :  { %8663 = vst [vmem:[#allocation49_spill] sm:$0xff] %v4459_v26  ;;  %v3748_v26 = vpop.eup %3747  ;;  %3757 = vrcp.f32 %v4479_v45  ;;  %v257_v18 = vmul.f32 1.442695, %v204_v12  ;;  %vm365_vm6 = vcmp.ge.f32.partialorder %v4453_v39, 0.0  ;;  %vm364_vm7 = vcmp.ge.f32.partialorder %v4472_v53, 0.0 }
  0x44   :  { %8664 = vst [vmem:[#allocation50_spill] sm:$0xff] %v4468_v11  ;;  %v261_v59 = vmul.f32 1.442695, %v206_v58  ;;  %v4493_v61 = vsel %vm355_vm14, %v3746_v55, %v387_v6  ;;  %v3750_v1 = vpop.eup %3749  ;;  %v392_v35 = vmul.f32 %v3748_v26, %v3738_v8  ;;  %v4503_v55 = vld [vmem:[#allocation5 + $0x50] sm:$0xff]   ;;  %vm369_vm8 = vcmp.ge.f32.partialorder %v4483_v21, 0.0 }
  0x45   :  { %8665 = vst [vmem:[#allocation51_spill] sm:$0xff] %v4476_v9  ;;  %v3752_v58 = vpop.eup %3751  ;;  %v643_v56 = vmul.f32 %v4457_v48, %v4493_v61  ;;  %v391_v13 = vmul.f32 %v3750_v1, %v3740_v22  ;;  %v3503_v48 = vld [vmem:[#allocation5 + $0x48] sm:$0xff]   ;;  %v176_v22 = vand.u32 2147483647, %v4497_v42  ;;  %vm368_vm9 = vcmp.ge.f32.partialorder %v4497_v42, 0.0 }
  0x46   :  { %8666 = vst [vmem:[#allocation52_spill] sm:$0xff] %v4479_v45  ;;  %3759 = vpow2.f32 %v261_v59  ;;  %v3754_v6 = vpop.eup %3753  ;;  %v390_v8 = vmul.f32 %v3752_v58, %v3742_v15  ;;  %v209_v59 = vsub.f32 0.0, %v177_v50  ;;  %v4507_v45 = vunpack.c.h.bf16 %v4404_v54  ;;  %v4522_v54 = vld [vmem:[#allocation2 + $0xc0] sm:$0xff] }
  0x47   :  { %8667 = vst [vmem:[#allocation53_spill] sm:$0xff] %v4481_v0  ;;  %3761 = vpow2.f32 %v259_v27  ;;  %v3756_v10 = vpop.eup %3755  ;;  %v4510_v24 = vadd.f32 1.0, %v3754_v6  ;;  %v4515_v27 = vsel %vm360_vm15, %v3748_v26, %v392_v35  ;;  %v4518_v15 = vunpack.c.l.bf16 %v4503_v55 }
  0x48   :  { %8668 = vst [vmem:[#allocation54_spill] sm:$0xff] %v4493_v61  ;;  %691 = vadd.xlane.f32.xlu2 %v645_v57  ;;  %v4520_v12 = vadd.f32 1.0, %v3756_v10  ;;  %3763 = vpow2.f32 %v257_v18  ;;  %v4526_v50 = vsel %vm359_vm0, %v3750_v1, %v391_v13  ;;  %v267_v44 = vmul.f32 1.442695, %v209_v59 }
  0x49   :  { %8669 = vst [vmem:[#allocation55_spill] sm:$0xff] %v4501_v7  ;;  %689 = vadd.xlane.f32.xlu1 %v644_v33  ;;  %v3758_v57 = vpop.eup %3757  ;;  %3765 = vrcp.f32 %v4510_v24  ;;  %v4532_v33 = vsel %vm358_vm1, %v3752_v58, %v390_v8  ;;  %v4534_v35 = vunpack.c.h.bf16 %v3503_v48  ;;  %v208_v18 = vsub.f32 0.0, %v176_v22 }
  0x4a   :  { %8670 = vst [vmem:[#allocation56_spill] sm:$0xff] %v4507_v45  ;;  %687 = vadd.xlane.f32.xlu0 %v643_v56  ;;  %3767 = vrcp.f32 %v4520_v12  ;;  %v4537_v56 = vld [vmem:[#allocation2 + $0xe8] sm:$0xff]  ;;  %v648_v1 = vmul.f32 %v4481_v0, %v4515_v27  ;;  %v175_v59 = vand.u32 2147483647, %v4522_v54  ;;  %v647_v32 = vmul.f32 %v4501_v7, %v4526_v50  ;;  %v4560_v7 = vld [vmem:[#allocation2 + $0xd8] sm:$0xff] }
  0x4b   :  { %8671 = vst [vmem:[#allocation57_spill] sm:$0xff] %v4510_v24  ;;  %3769 = vpow2.f32 %v267_v44  ;;  %v4544_v24 = vld [vmem:[#allocation2 + $0xe0] sm:$0xff]  ;;  %v395_v58 = vmul.f32 %v3758_v57, %v4464_v2  ;;  %v265_v22 = vmul.f32 1.442695, %v208_v18  ;;  %v180_v44 = vand.u32 2147483647, %v4537_v56 }
  0x4c   :  { %8672 = vst [vmem:[#allocation58_spill] sm:$0xff] %v4515_v27  ;;  %v3760_v26 = vpop.eup %3759  ;;  %v207_v0 = vsub.f32 0.0, %v175_v59  ;;  %v4556_v14 = vunpack.c.l.bf16 %v3503_v48  ;;  %v179_v2 = vand.u32 2147483647, %v4544_v24  ;;  %vm367_vm10 = vcmp.ge.f32.partialorder %v4522_v54, 0.0 }
  0x4d   :  { %8673 = vst [vmem:[#allocation59_spill] sm:$0xff] %v4518_v15  ;;  %v3762_v25 = vpop.eup %3761  ;;  %v4541_v13 = vadd.f32 1.0, %v3760_v26  ;;  %v212_v59 = vsub.f32 0.0, %v180_v44  ;;  %v4566_v19 = vsel %vm363_vm2, %v3758_v57, %v395_v58  ;;  %v3505_v44 = vld [vmem:[#allocation5 + $0x58] sm:$0xff]   ;;  %vm372_vm11 = vcmp.ge.f32.partialorder %v4537_v56, 0.0 }
  0x4e   :  { %8674 = vst [vmem:[#allocation60_spill] sm:$0xff] %v4520_v12  ;;  %v4549_v8 = vadd.f32 1.0, %v3762_v25  ;;  %v646_v12 = vmul.f32 %v4507_v45, %v4532_v33  ;;  %v3764_v28 = vpop.eup %3763  ;;  %v651_v62 = vmul.f32 %v4518_v15, %v4566_v19  ;;  %vm371_vm12 = vcmp.ge.f32.partialorder %v4544_v24, 0.0 }
  0x4f   :  { %8675 = vst [vmem:[#allocation61_spill] sm:$0xff] %v4526_v50  ;;  %3771 = vrcp.f32 %v4541_v13  ;;  %v3766_v18 = vpop.eup %3765  ;;  %v4562_v5 = vadd.f32 1.0, %v3764_v28  ;;  %vm370_vm13 = vcmp.ge.f32.partialorder %v4560_v7, 0.0 }
  0x50   :  { %8676 = vst [vmem:[#allocation62_spill] sm:$0xff] %v4532_v33  ;;  %3773 = vrcp.f32 %v4549_v8  ;;  %697 = vadd.xlane.f32.xlu2 %v648_v1  ;;  %v3768_v45 = vpop.eup %3767  ;;  %v394_v48 = vmul.f32 %v3766_v18, %v3754_v6  ;;  %v273_v1 = vmul.f32 1.442695, %v212_v59 }
  0x51   :  { %8677 = vst [vmem:[#allocation63_spill] sm:$0xff] %v4534_v35  ;;  %3775 = vpow2.f32 %v265_v22  ;;  %695 = vadd.xlane.f32.xlu1 %v647_v32  ;;  %v3770_v43 = vpop.eup %3769  ;;  %v393_v34 = vmul.f32 %v3768_v45, %v3756_v10  ;;  %v178_v22 = vand.u32 2147483647, %v4560_v7 }
  0x52   :  { %8678 = vst [vmem:[#allocation64_spill] sm:$0xff] %v4541_v13  ;;  %v263_v13 = vmul.f32 1.442695, %v207_v0  ;;  %693 = vadd.xlane.f32.xlu0 %v646_v12  ;;  %3777 = vrcp.f32 %v4562_v5  ;;  %v4573_v0 = vsel %vm362_vm3, %v3766_v18, %v394_v48  ;;  %v4575_v32 = vadd.f32 1.0, %v3770_v43  ;;  %v4581_v12 = vld [vmem:[#allocation2 + $0xf8] sm:$0xff]  ;;  %v4593_v48 = vld [vmem:[#allocation2 + $0xf0] sm:$0xff] }
  0x53   :  { %8679 = vst [vmem:[#allocation65_spill] sm:$0xff] %v4549_v8  ;;  %v211_v8 = vsub.f32 0.0, %v179_v2  ;;  %v4579_v57 = vsel %vm361_vm4, %v3768_v45, %v393_v34  ;;  %v210_v10 = vsub.f32 0.0, %v178_v22  ;;  %v650_v17 = vmul.f32 %v4534_v35, %v4573_v0 }
  0x54   :  { %8680 = vst [vmem:[#allocation66_spill] sm:$0xff] %v4556_v14  ;;  %3779 = vpow2.f32 %v263_v13  ;;  %v182_v59 = vand.u32 2147483647, %v4581_v12  ;;  %v4597_v22 = vunpack.c.l.bf16 %v3505_v44  ;;  %vm374_vm14 = vcmp.ge.f32.partialorder %v4581_v12, 0.0 }
  0x55   :  { %8681 = vst [vmem:[#allocation67_spill] sm:$0xff] %v4562_v5  ;;  %v271_v63 = vmul.f32 1.442695, %v211_v8  ;;  %v3772_v6 = vpop.eup %3771  ;;  %3781 = vpow2.f32 %v273_v1  ;;  %v649_v8 = vmul.f32 %v4556_v14, %v4579_v57  ;;  %v269_v45 = vmul.f32 1.442695, %v210_v10 }
  0x56   :  { %8682 = vst [vmem:[#allocation68_spill] sm:$0xff] %v4566_v19  ;;  %v3774_v58 = vpop.eup %3773  ;;  %v398_v2 = vmul.f32 %v3772_v6, %v3760_v26  ;;  %3783 = vrcp.f32 %v4575_v32  ;;  %v4595_v26 = vunpack.c.h.bf16 %v3505_v44  ;;  %v4610_v44 = vunpack.c.h.bf16 %v4503_v55 }
  0x57   :  { %8683 = vst [vmem:[#allocation69_spill] sm:$0xff] %v4573_v0  ;;  %v3776_v13 = vpop.eup %3775  ;;  %v397_v34 = vmul.f32 %v3774_v58, %v3762_v25  ;;  %3785 = vpow2.f32 %v271_v63  ;;  %vm373_vm15 = vcmp.ge.f32.partialorder %v4593_v48, 0.0 }
  0x58   :  { %8684 = vst [vmem:[#allocation70_spill] sm:$0xff] %v4575_v32  ;;  %v4590_v18 = vadd.f32 1.0, %v3776_v13  ;;  %v3778_v1 = vpop.eup %3777  ;;  %703 = vadd.xlane.f32.xlu2 %v651_v62  ;;  %3787 = vpow2.f32 %v269_v45  ;;  %v4602_v63 = vsel %vm366_vm5, %v3772_v6, %v398_v2  ;;  %v214_v32 = vsub.f32 0.0, %v182_v59 }
  0x59   :  { %8685 = vst [vmem:[#allocation71_spill] sm:$0xff] %v4579_v57  ;;  %701 = vadd.xlane.f32.xlu1 %v650_v17  ;;  %v396_v10 = vmul.f32 %v3778_v1, %v3764_v28  ;;  %v4607_v62 = vsel %vm365_vm6, %v3774_v58, %v397_v34  ;;  %v181_v17 = vand.u32 2147483647, %v4593_v48  ;;  %v3507_v58 = vld [vmem:[#allocation5 + $0x68] sm:$0xff]  }
  0x5a   :  { %8686 = vst [vmem:[#allocation72_spill] sm:$0xff] %v4590_v18  ;;  %v3780_v25 = vpop.eup %3779  ;;  %3789 = vrcp.f32 %v4590_v18  ;;  %699 = vadd.xlane.f32.xlu0 %v649_v8  ;;  %v277_v2 = vmul.f32 1.442695, %v214_v32  ;;  %v654_v8 = vmul.f32 %v4595_v26, %v4602_v63  ;;  %v653_v55 = vmul.f32 %v4597_v22, %v4607_v62 }
  0x5b   :  { %8687 = vst [vmem:[#allocation73_spill] sm:$0xff] %v4595_v26  ;;  %v3782_v5 = vpop.eup %3781  ;;  %v4612_v53 = vadd.f32 1.0, %v3780_v25  ;;  %v4615_v6 = vsel %vm364_vm7, %v3778_v1, %v396_v10  ;;  %v213_v39 = vsub.f32 0.0, %v181_v17  ;;  %v3506_v10 = vld [vmem:[#allocation5 + $0x60] sm:$0xff]   ;;  %v4671_v24 = vunpack.c.h.bf16 %v3507_v58 }
  0x5c   :  { %8688 = vst [vmem:[#allocation74_spill] sm:$0xff] %v4597_v22  ;;  %v3784_v46 = vpop.eup %3783  ;;  %v4617_v28 = vadd.f32 1.0, %v3782_v5  ;;  %v652_v32 = vmul.f32 %v4610_v44, %v4615_v6  ;;  %v4638_v15 = vunpack.c.h.bf16 %v3506_v10  ;;  %v4643_v42 = vunpack.c.l.bf16 %v3506_v10 }
  0x5d   :  { %8689 = vst [vmem:[#allocation75_spill] sm:$0xff] %v4602_v63  ;;  %v3786_v45 = vpop.eup %3785  ;;  %3791 = vrcp.f32 %v4612_v53  ;;  %v401_v34 = vmul.f32 %v3784_v46, %v3770_v43  ;;  %v275_v18 = vmul.f32 1.442695, %v213_v39  ;;  %v4634_v43 = vunpack.c.l.bf16 %v3507_v58 }
  0x5e   :  { %8690 = vst [vmem:[#allocation76_spill] sm:$0xff] %v4607_v62  ;;  %3793 = vrcp.f32 %v4617_v28  ;;  %v4625_v59 = vadd.f32 1.0, %v3786_v45  ;;  %v3788_v1 = vpop.eup %3787 }
  0x5f   :  { %8691 = vst [vmem:[#allocation77_spill] sm:$0xff] %v4610_v44  ;;  %3795 = vpow2.f32 %v277_v2  ;;  %v4632_v17 = vadd.f32 1.0, %v3788_v1  ;;  %v4636_v26 = vsel %vm369_vm8, %v3784_v46, %v401_v34  ;;  %v3508_v34 = vld [vmem:[#allocation5 + $0x70] sm:$0xff]  }
  0x60   :  { %8692 = vst [vmem:[#allocation78_spill] sm:$0xff] %v4612_v53  ;;  %v3790_v53 = vpop.eup %3789  ;;  %3797 = vrcp.f32 %v4625_v59  ;;  %709 = vadd.xlane.f32.xlu2 %v654_v8 }
  0x61   :  { %8693 = vst [vmem:[#allocation79_spill] sm:$0xff] %v4615_v6  ;;  %3799 = vpow2.f32 %v275_v18  ;;  %707 = vadd.xlane.f32.xlu1 %v653_v55 }
  0x62   :  { %8694 = vst [vmem:[#allocation80_spill] sm:$0xff] %v4617_v28  ;;  %v400_v28 = vmul.f32 %v3790_v53, %v3776_v13  ;;  %3801 = vrcp.f32 %v4632_v17  ;;  %705 = vadd.xlane.f32.xlu0 %v652_v32  ;;  %v657_v13 = vmul.f32 %v4634_v43, %v4636_v26 }
  0x63   :  { %8695 = vst [vmem:[#allocation81_spill] sm:$0xff] %v4625_v59  ;;  %v3792_v21 = vpop.eup %3791 }
  0x64   :  { %8696 = vst [vmem:[#allocation82_spill] sm:$0xff] %v4632_v17  ;;  %v4641_v2 = vsel %vm368_vm9, %v3790_v53, %v400_v28  ;;  %v3794_v8 = vpop.eup %3793  ;;  %v399_v39 = vmul.f32 %v3792_v21, %v3780_v25 }
  0x65   :  { %8697 = vst [vmem:[#allocation83_spill] sm:$0xff] %v4634_v43  ;;  %v3796_v59 = vpop.eup %3795  ;;  %v656_v46 = vmul.f32 %v4638_v15, %v4641_v2  ;;  %v404_v32 = vmul.f32 %v3794_v8, %v3782_v5  ;;  %v4666_v43 = vunpack.c.l.bf16 %v3508_v34 }
  0x66   :  { %8698 = vst [vmem:[#allocation84_spill] sm:$0xff] %v4636_v26  ;;  %v3798_v18 = vpop.eup %3797  ;;  %v4650_v55 = vsel %vm367_vm10, %v3792_v21, %v399_v39  ;;  %v4652_v53 = vadd.f32 1.0, %v3796_v59  ;;  %v4661_v21 = vunpack.c.h.bf16 %v3508_v34 }
  0x67   :  { %8699 = vst [vmem:[#allocation85_spill] sm:$0xff] %v4638_v15  ;;  %v3800_v28 = vpop.eup %3799  ;;  %v655_v54 = vmul.f32 %v4643_v42, %v4650_v55  ;;  %v403_v25 = vmul.f32 %v3798_v18, %v3786_v45  ;;  %v4664_v39 = vsel %vm372_vm11, %v3794_v8, %v404_v32  ;;  %v3509_v8 = vld [vmem:[#allocation5 + $0x78] sm:$0xff]  }
  0x68   :  { %8700 = vst [vmem:[#allocation86_spill] sm:$0xff] %v4641_v2  ;;  %v3802_v10 = vpop.eup %3801  ;;  %3803 = vrcp.f32 %v4652_v53  ;;  %v4659_v17 = vadd.f32 1.0, %v3800_v28  ;;  %715 = vadd.xlane.f32.xlu2 %v657_v13  ;;  %v660_v13 = vmul.f32 %v4661_v21, %v4664_v39 }
  0x69   :  { %8701 = vst [vmem:[#allocation87_spill] sm:$0xff] %v4643_v42  ;;  %v402_v5 = vmul.f32 %v3802_v10, %v3788_v1  ;;  %713 = vadd.xlane.f32.xlu1 %v656_v46  ;;  %v4669_v56 = vsel %vm371_vm12, %v3798_v18, %v403_v25  ;;  %v4683_v18 = vunpack.c.h.bf16 %v3509_v8 }
  0x6a   :  { %8702 = vst [vmem:[#allocation88_spill] sm:$0xff] %v4650_v55  ;;  %3805 = vrcp.f32 %v4659_v17  ;;  %711 = vadd.xlane.f32.xlu0 %v655_v54  ;;  %v659_v7 = vmul.f32 %v4666_v43, %v4669_v56  ;;  %v4687_v54 = vunpack.c.l.bf16 %v3509_v8 }
  0x6b   :  { %8703 = vst [vmem:[#allocation89_spill] sm:$0xff] %v4652_v53  ;;  %v4673_v45 = vsel %vm370_vm13, %v3802_v10, %v402_v5 }
  0x6c   :  { %8704 = vst [vmem:[#allocation90_spill] sm:$0xff] %v4659_v17  ;;  %v658_v1 = vmul.f32 %v4671_v24, %v4673_v45 }
  0x6d   :  { %8705 = vst [vmem:[#allocation91_spill] sm:$0xff] %v4661_v21 }
  0x6e   :  { %8706 = vst [vmem:[#allocation92_spill] sm:$0xff] %v4664_v39  ;;  %v3804_v53 = vpop.eup %3803 }
  0x6f   :  { %8707 = vst [vmem:[#allocation93_spill] sm:$0xff] %v4666_v43  ;;  %v406_v46 = vmul.f32 %v3804_v53, %v3796_v59 }
  0x70   :  { %8708 = vst [vmem:[#allocation94_spill] sm:$0xff] %v4669_v56  ;;  %v3806_v34 = vpop.eup %3805  ;;  %721 = vadd.xlane.f32.xlu2 %v660_v13 }
  0x71   :  { %8709 = vst [vmem:[#allocation95_spill] sm:$0xff] %v4671_v24  ;;  %v405_v58 = vmul.f32 %v3806_v34, %v3800_v28  ;;  %719 = vadd.xlane.f32.xlu1 %v659_v7  ;;  %v4685_v32 = vsel %vm374_vm14, %v3804_v53, %v406_v46 }
  0x72   :  { %8710 = vst [vmem:[#allocation96_spill] sm:$0xff] %v4673_v45  ;;  %717 = vadd.xlane.f32.xlu0 %v658_v1  ;;  %v662_v59 = vmul.f32 %v4683_v18, %v4685_v32 }
  0x73   :  { %8711 = vst [vmem:[#allocation97_spill] sm:$0xff] %v4683_v18  ;;  %v4689_v25 = vsel %vm373_vm15, %v3806_v34, %v405_v58 }
  0x74   :  { %8712 = vst [vmem:[#allocation98_spill] sm:$0xff] %v4685_v32  ;;  %v661_v12 = vmul.f32 %v4687_v54, %v4689_v25 }
  0x75   :  { %8713 = vst [vmem:[#allocation99_spill] sm:$0xff] %v4687_v54 }
  0x76   :  { %8714 = vst [vmem:[#allocation100_spill] sm:$0xff] %v4689_v25 }
  0x78   :  { %839 = vadd.xlane.f32.xlu2 %v4307_v47 }
  0x79   :  { %725 = vadd.xlane.f32.xlu1 %v662_v59 }
  0x7a   :  { %723 = vadd.xlane.f32.xlu0 %v661_v12 }
  0x80   :  { %845 = vadd.xlane.f32.xlu2 %v4325_v38 }
  0x81   :  { %843 = vadd.xlane.f32.xlu1 %v4299_v40 }
  0x82   :  { %841 = vadd.xlane.f32.xlu0 %v4329_v60 }
  0x88   :  { %851 = vadd.xlane.f32.xlu2 %v4398_v3 }
  0x89   :  { %849 = vadd.xlane.f32.xlu1 %v4318_v4 }
  0x8a   :  { %847 = vadd.xlane.f32.xlu0 %v4293_v30 }
  0x90   :  { %857 = vadd.xlane.f32.xlu2 %v4435_v31 }
  0x91   :  { %855 = vadd.xlane.f32.xlu1 %v4373_v41 }
  0x92   :  { %853 = vadd.xlane.f32.xlu0 %v4391_v29 }
  0x98   :  { %863 = vadd.xlane.f32.xlu2 %v4493_v61 }
  0x99   :  { %861 = vadd.xlane.f32.xlu1 %v4416_v20  ;;  %v8725_v20 = vld [vmem:[#allocation43_spill] sm:$0xff] }
  0x9a   :  { %859 = vadd.xlane.f32.xlu0 %v4420_v23 }
  0x9b   :  { %v4708_v48 = vpop.xlane.xlu2 %671 }
  0x9c   :  { %v4710_v53 = vpop.xlane.xlu1 %667 }
  0x9d   :  { %v4712_v28 = vpop.xlane.xlu0 %663 }
  0xa0   :  { %869 = vadd.xlane.f32.xlu2 %v4532_v33 }
  0xa1   :  { %867 = vadd.xlane.f32.xlu1 %v4468_v11  ;;  %v8722_v11 = vld [vmem:[#allocation37_spill] sm:$0xff] }
  0xa2   :  { %865 = vadd.xlane.f32.xlu0 %v4476_v9 }
  0xa3   :  { %v4717_v10 = vpop.xlane.xlu2 %673 }
  0xa4   :  { %v4719_v5 = vpop.xlane.xlu1 %669 }
  0xa5   :  { %v4721_v13 = vpop.xlane.xlu0 %665 }
  0xa8   :  { %875 = vadd.xlane.f32.xlu2 %v4579_v57 }
  0xa9   :  { %873 = vadd.xlane.f32.xlu1 %v4515_v27  ;;  %v8719_v27 = vld [vmem:[#allocation26_spill] sm:$0xff] }
  0xaa   :  { %871 = vadd.xlane.f32.xlu0 %v4526_v50 }
  0xab   :  { %v4726_v7 = vpop.xlane.xlu2 %679 }
  0xac   :  { %v4728_v1 = vpop.xlane.xlu1 %677 }
  0xad   :  { %v4730_v8 = vpop.xlane.xlu0 %675 }
  0xb0   :  { %881 = vadd.xlane.f32.xlu2 %v4615_v6 }
  0xb1   :  { %879 = vadd.xlane.f32.xlu1 %v4566_v19 }
  0xb2   :  { %877 = vadd.xlane.f32.xlu0 %v4573_v0 }
  0xb3   :  { %v4735_v46 = vpop.xlane.xlu2 %685 }
  0xb4   :  { %v4737_v34 = vpop.xlane.xlu1 %683 }
  0xb5   :  { %v4739_v58 = vpop.xlane.xlu0 %681 }
  0xb8   :  { %887 = vadd.xlane.f32.xlu2 %v4650_v55 }
  0xb9   :  { %885 = vadd.xlane.f32.xlu1 %v4602_v63 }
  0xba   :  { %883 = vadd.xlane.f32.xlu0 %v4607_v62 }
  0xbb   :  { %v4744_v59 = vpop.xlane.xlu2 %691 }
  0xbc   :  { %v4746_v12 = vpop.xlane.xlu1 %689 }
  0xbd   :  { %v4748_v17 = vpop.xlane.xlu0 %687 }
  0xc0   :  { %893 = vadd.xlane.f32.xlu2 %v4673_v45 }
  0xc1   :  { %891 = vadd.xlane.f32.xlu1 %v4636_v26 }
  0xc2   :  { %889 = vadd.xlane.f32.xlu0 %v4641_v2 }
  0xc3   :  { %v4753_v6 = vpop.xlane.xlu2 %697 }
  0xc4   :  { %v4755_v19 = vpop.xlane.xlu1 %695 }
  0xc5   :  { %v4757_v55 = vpop.xlane.xlu0 %693 }
  0xc8   :  { %899 = vadd.xlane.f32.xlu2 %v4689_v25 }
  0xc9   :  { %897 = vadd.xlane.f32.xlu1 %v4664_v39 }
  0xca   :  { %895 = vadd.xlane.f32.xlu0 %v4669_v56 }
  0xcb   :  { %v4762_v63 = vpop.xlane.xlu2 %703 }
  0xcc   :  { %v4764_v62 = vpop.xlane.xlu1 %701 }
  0xcd   :  { %v4766_v45 = vpop.xlane.xlu0 %699 }
  0xd0   :  { %1017 = vadd.xlane.f32.xlu2 %v4312_v51 }
  0xd1   :  { %1015 = vadd.xlane.f32.xlu1 %v4256_v52  ;;  %v8715_v52 = vld [vmem:[#allocation31_spill] sm:$0xff] }
  0xd2   :  { %901 = vadd.xlane.f32.xlu0 %v4685_v32  ;;  %v8716_v32 = vld [vmem:[#allocation14_spill] sm:$0xff] }
  0xd3   :  { %v4771_v26 = vpop.xlane.xlu2 %709 }
  0xd4   :  { %v4773_v2 = vpop.xlane.xlu1 %707 }
  0xd5   :  { %v4775_v25 = vpop.xlane.xlu0 %705 }
  0xd8   :  { %1023 = vadd.xlane.f32.xlu2 %v4234_v36 }
  0xd9   :  { %1021 = vadd.xlane.f32.xlu1 %v4252_v49  ;;  %v8717_v49 = vld [vmem:[#allocation38_spill] sm:$0xff] }
  0xda   :  { %1019 = vadd.xlane.f32.xlu0 %v4236_v37  ;;  %v8718_v37 = vld [vmem:[#allocation39_spill] sm:$0xff] }
  0xdb   :  { %v4780_v39 = vpop.xlane.xlu2 %715 }
  0xdc   :  { %v4782_v56 = vpop.xlane.xlu1 %713 }
  0xdd   :  { %v4784_v51 = vpop.xlane.xlu0 %711 }
  0xe0   :  { %1029 = vadd.xlane.f32.xlu2 %v4337_v16 }
  0xe1   :  { %1027 = vadd.xlane.f32.xlu1 %v8715_v52  ;;  %v8720_v52 = vld [vmem:[#allocation44_spill] sm:$0xff] }
  0xe2   :  { %1025 = vadd.xlane.f32.xlu0 %v8716_v32  ;;  %v8721_v32 = vld [vmem:[#allocation48_spill] sm:$0xff] }
  0xe3   :  { %v4789_v0 = vpop.xlane.xlu2 %721 }
  0xe4   :  { %v4791_v57 = vpop.xlane.xlu1 %719 }
  0xe5   :  { %v4793_v36 = vpop.xlane.xlu0 %717 }
  0xe8   :  { %1035 = vadd.xlane.f32.xlu2 %v8717_v49 }
  0xe9   :  { %1033 = vadd.xlane.f32.xlu1 %v8718_v37  ;;  %v8723_v37 = vld [vmem:[#allocation55_spill] sm:$0xff] }
  0xea   :  { %1031 = vadd.xlane.f32.xlu0 %v8719_v27  ;;  %v8724_v27 = vld [vmem:[#allocation56_spill] sm:$0xff] }
  0xeb   :  { %v4798_v50 = vpop.xlane.xlu2 %839 }
  0xec   :  { %v4800_v33 = vpop.xlane.xlu1 %725 }
  0xed   :  { %v4802_v16 = vpop.xlane.xlu0 %723 }
  0xf0   :  { %1041 = vadd.xlane.f32.xlu2 %v8720_v52 }
  0xf1   :  { %1039 = vadd.xlane.f32.xlu1 %v8721_v32  ;;  %v8726_v32 = vld [vmem:[#allocation53_spill] sm:$0xff] }
  0xf2   :  { %1037 = vadd.xlane.f32.xlu0 %v8722_v11 }
  0xf3   :  { %v4807_v9 = vpop.xlane.xlu2 %845 }
  0xf4   :  { %v4809_v61 = vpop.xlane.xlu1 %843 }
  0xf5   :  { %v4811_v49 = vpop.xlane.xlu0 %841 }
  0xf8   :  { %1047 = vadd.xlane.f32.xlu2 %v8723_v37 }
  0xf9   :  { %1045 = vadd.xlane.f32.xlu1 %v8724_v27  ;;  %v8727_v27 = vld [vmem:[#allocation59_spill] sm:$0xff] }
  0xfa   :  { %1043 = vadd.xlane.f32.xlu0 %v8725_v20 }
  0xfb   :  { %v4816_v23 = vpop.xlane.xlu2 %851 }
  0xfc   :  { %v4818_v31 = vpop.xlane.xlu1 %849 }
  0xfd   :  { %v4820_v52 = vpop.xlane.xlu0 %847 }
 0x100   :  { %1053 = vadd.xlane.f32.xlu2 %v4534_v35 }
 0x101   :  { %1051 = vadd.xlane.f32.xlu1 %v4556_v14  ;;  %v8730_v14 = vld [vmem:[#allocation73_spill] sm:$0xff] }
 0x102   :  { %1049 = vadd.xlane.f32.xlu0 %v8726_v32  ;;  %v741_v32 = vadd.f32 %v4717_v10, %v4708_v48  ;;  %v8733_v10 = vld [vmem:[#allocation83_spill] sm:$0xff] }
 0x103   :  { %v4825_v11 = vpop.xlane.xlu2 %857 }
 0x104   :  { %v4827_v41 = vpop.xlane.xlu1 %855 }
 0x105   :  { %v4829_v37 = vpop.xlane.xlu0 %853 }
 0x108   :  { %1059 = vadd.xlane.f32.xlu2 %v4597_v22 }
 0x109   :  { %1057 = vadd.xlane.f32.xlu1 %v4610_v44 }
 0x10a   :  { %1055 = vadd.xlane.f32.xlu0 %v8727_v27 }
 0x10b   :  { %v4834_v20 = vpop.xlane.xlu2 %863 }
 0x10c   :  { %8728 = vst [vmem:[#allocation101_spill] sm:$0xff] %v4834_v20  ;;  %v4836_v29 = vpop.xlane.xlu1 %861  ;;  %v734_v20 = vadd.f32 %v4719_v5, %v4710_v53  ;;  %v762_v53 = vadd.f32 %v4735_v46, %v4737_v34 }
 0x10d   :  { %8729 = vst [vmem:[#allocation102_spill] sm:$0xff] %v4836_v29  ;;  %v4838_v35 = vpop.xlane.xlu0 %859  ;;  %v742_v29 = vrot.slane %v741_v32, 4 }
 0x10e   :  { %v735_v48 = vrot.slane %v734_v20, 4 }
 0x110   :  { %1065 = vadd.xlane.f32.xlu2 %v4638_v15  ;;  %v727_v15 = vadd.f32 %v4721_v13, %v4712_v28  ;;  %v755_v28 = vadd.f32 %v4739_v58, %v4726_v7  ;;  %v736_v13 = vadd.f32 %v735_v48, %v734_v20  ;;  %v783_v7 = vadd.f32 %v4753_v6, %v4755_v19 }
 0x111   :  { %1063 = vadd.xlane.f32.xlu1 %v4643_v42  ;;  %v748_v42 = vadd.f32 %v4728_v1, %v4730_v8 }
 0x112   :  { %1061 = vadd.xlane.f32.xlu0 %v8730_v14  ;;  %v737_v46 = vrot.slane %v736_v13, 2 }
 0x113   :  { %v870_v22 = vpop.xlane.xlu2 %869 }
 0x114   :  { %v868_v3 = vpop.xlane.xlu1 %867 }
 0x115   :  { %v4845_v44 = vadd.f32 %v870_v22, %v868_v3  ;;  %v4847_v27 = vpop.xlane.xlu0 %865  ;;  %v743_v3 = vadd.f32 %v742_v29, %v741_v32  ;;  %v728_v22 = vrot.slane %v727_v15, 4  ;;  %v769_v29 = vadd.f32 %v4746_v12, %v4748_v17 }
 0x116   :  { %8732 = vst [vmem:[#allocation104_spill] sm:$0xff] %v4847_v27  ;;  %v763_v32 = vrot.slane %v762_v53, 4  ;;  %v776_v12 = vadd.f32 %v4757_v55, %v4744_v59 }
 0x117   :  { %8731 = vst [vmem:[#allocation103_spill] sm:$0xff] %v4845_v44  ;;  %v749_v44 = vrot.slane %v748_v42, 4  ;;  %v744_v8 = vrot.slane %v743_v3, 2 }
 0x118   :  { %1071 = vadd.xlane.f32.xlu2 %v4666_v43  ;;  %v729_v43 = vadd.f32 %v728_v22, %v727_v15  ;;  %v764_v58 = vadd.f32 %v763_v32, %v762_v53 }
 0x119   :  { %1069 = vadd.xlane.f32.xlu1 %v4671_v24  ;;  %v750_v24 = vadd.f32 %v749_v44, %v748_v42  ;;  %v745_v20 = vadd.f32 %v744_v8, %v743_v3  ;;  %v770_v44 = vrot.slane %v769_v29, 4  ;;  %v790_v3 = vadd.f32 %v4764_v62, %v4766_v45 }
 0x11a   :  { %1067 = vadd.xlane.f32.xlu0 %v8733_v10  ;;  %v756_v10 = vrot.slane %v755_v28, 4 }
 0x11b   :  { %v876_v14 = vpop.xlane.xlu2 %875  ;;  %v751_v15 = vrot.slane %v750_v24, 2  ;;  %v746_v19 = vrot.slane %v745_v20, 1 }
 0x11c   :  { %v874_v27 = vpop.xlane.xlu1 %873  ;;  %v757_v17 = vadd.f32 %v756_v10, %v755_v28  ;;  %v777_v10 = vrot.slane %v776_v12, 4 }
 0x11d   :  { %v872_v5 = vpop.xlane.xlu0 %871  ;;  %v752_v8 = vadd.f32 %v751_v15, %v750_v24  ;;  %v747_v55 = vadd.f32 %v746_v19, %v745_v20 }
 0x11e   :  { %v4862_v1 = vadd.f32 %v874_v27, %v872_v5  ;;  %v730_v27 = vrot.slane %v729_v43, 2  ;;  %v738_v5 = vadd.f32 %v737_v46, %v736_v13  ;;  %v758_v53 = vrot.slane %v757_v17, 2 }
 0x11f   :  { %v804_v13 = vadd.f32 %v4771_v26, %v4773_v2  ;;  %v753_v46 = vrot.slane %v752_v8, 1 }
 0x120   :  { %8734 = vst [vmem:[#allocation105_spill] sm:$0xff] %v4862_v1  ;;  %1077 = vadd.xlane.f32.xlu2 %v4683_v18  ;;  %v784_v18 = vrot.slane %v783_v7, 4  ;;  %v731_v6 = vadd.f32 %v730_v27, %v729_v43  ;;  %v765_v1 = vrot.slane %v764_v58, 2  ;;  %v739_v28 = vrot.slane %v738_v5, 1 }
 0x121   :  { %1075 = vadd.xlane.f32.xlu1 %v4687_v54  ;;  %v797_v43 = vadd.f32 %v4775_v25, %v4762_v63  ;;  %v759_v45 = vadd.f32 %v758_v53, %v757_v17  ;;  %v805_v19 = vrot.slane %v804_v13, 4  ;;  %v754_v26 = vadd.f32 %v753_v46, %v752_v8 }
 0x122   :  { %1073 = vadd.xlane.f32.xlu0 %v4661_v21  ;;  %v771_v21 = vadd.f32 %v770_v44, %v769_v29  ;;  %v785_v32 = vadd.f32 %v784_v18, %v783_v7  ;;  %v732_v59 = vrot.slane %v731_v6, 1  ;;  %v766_v24 = vadd.f32 %v765_v1, %v764_v58 }
 0x123   :  { %v882_v34 = vpop.xlane.xlu2 %881  ;;  %v778_v29 = vadd.f32 %v777_v10, %v776_v12  ;;  %v740_v15 = vadd.f32 %v739_v28, %v738_v5  ;;  %v1193_v7 = vmul.f32 2.0, %v747_v55  ;;  %v760_v25 = vrot.slane %v759_v45, 1 }
 0x124   :  { %v880_v42 = vpop.xlane.xlu1 %879  ;;  %v786_v44 = vrot.slane %v785_v32, 2  ;;  %v733_v20 = vadd.f32 %v732_v59, %v731_v6  ;;  %v767_v63 = vrot.slane %v766_v24, 1  ;;  %v4887_v58 = vadd.f32 1.0, %v747_v55 }
 0x125   :  { %v4873_v48 = vadd.f32 %v882_v34, %v880_v42  ;;  %v878_v22 = vpop.xlane.xlu0 %877  ;;  %v791_v34 = vrot.slane %v790_v3, 4  ;;  %v772_v42 = vrot.slane %v771_v21, 2  ;;  %v779_v1 = vrot.slane %v778_v29, 2 }
 0x126   :  { %v4875_v54 = vadd.f32 %v878_v22, %v876_v14  ;;  %8737 = vst [vmem:[#allocation108_spill] sm:$0xff] %v4887_v58  ;;  %v1192_v17 = vmul.f32 2.0, %v740_v15  ;;  %v4889_v12 = vadd.f32 1.0, %v740_v15  ;;  %v787_v5 = vadd.f32 %v786_v44, %v785_v32 }
 0x127   :  { %8735 = vst [vmem:[#allocation106_spill] sm:$0xff] %v4873_v48  ;;  %v792_v22 = vadd.f32 %v791_v34, %v790_v3  ;;  %v773_v2 = vadd.f32 %v772_v42, %v771_v21  ;;  %v811_v48 = vadd.f32 %v4782_v56, %v4784_v51  ;;  %v4891_v53 = vadd.f32 1.0, %v1193_v7 }
 0x128   :  { %8736 = vst [vmem:[#allocation107_spill] sm:$0xff] %v4875_v54  ;;  %v798_v54 = vrot.slane %v797_v43, 4  ;;  %v1191_v6 = vmul.f32 2.0, %v733_v20  ;;  %v806_v10 = vadd.f32 %v805_v19, %v804_v13  ;;  %v1194_v21 = vmul.f32 2.0, %v754_v26 }
 0x129   :  { %8738 = vst [vmem:[#allocation109_spill] sm:$0xff] %v4889_v12  ;;  %v793_v3 = vrot.slane %v792_v22, 2  ;;  %v774_v28 = vrot.slane %v773_v2, 1  ;;  %v812_v34 = vrot.slane %v811_v48, 4  ;;  %v768_v56 = vadd.f32 %v767_v63, %v766_v24 }
 0x12a   :  { %8739 = vst [vmem:[#allocation110_spill] sm:$0xff] %v4891_v53  ;;  %v799_v59 = vadd.f32 %v798_v54, %v797_v43  ;;  %v761_v46 = vadd.f32 %v760_v25, %v759_v45  ;;  %v780_v42 = vadd.f32 %v779_v1, %v778_v29  ;;  %v825_v32 = vadd.f32 %v4789_v0, %v4791_v57 }
 0x12b   :  { %v888_v14 = vpop.xlane.xlu2 %887  ;;  %v818_v15 = vadd.f32 %v4793_v36, %v4780_v39  ;;  %v4903_v54 = vadd.f32 1.0, %v1192_v17  ;;  %v4905_v43 = vadd.f32 1.0, %v733_v20  ;;  %v794_v24 = vadd.f32 %v793_v3, %v792_v22 }
 0x12c   :  { %v886_v62 = vpop.xlane.xlu1 %885  ;;  %v807_v45 = vrot.slane %v806_v10, 2  ;;  %v4907_v29 = vadd.f32 1.0, %v1191_v6  ;;  %v775_v44 = vadd.f32 %v774_v28, %v773_v2  ;;  %v800_v7 = vrot.slane %v799_v59, 2 }
 0x12d   :  { %v884_v27 = vpop.xlane.xlu0 %883  ;;  %8740 = vst [vmem:[#allocation111_spill] sm:$0xff] %v4903_v54  ;;  %v813_v0 = vadd.f32 %v812_v34, %v811_v48  ;;  %v4911_v36 = vadd.f32 1.0, %v754_v26  ;;  %v1196_v57 = vmul.f32 2.0, %v768_v56  ;;  %v1195_v39 = vmul.f32 2.0, %v761_v46 }
 0x12e   :  { %v4883_v18 = vadd.f32 %v886_v62, %v884_v27  ;;  %v788_v27 = vrot.slane %v787_v5, 1  ;;  %8741 = vst [vmem:[#allocation112_spill] sm:$0xff] %v4905_v43  ;;  %v4913_v19 = vadd.f32 1.0, %v1194_v21  ;;  %v826_v20 = vrot.slane %v825_v32, 4  ;;  %v8783_v43 = vld [vmem:[#allocation62_spill] sm:$0xff] }
 0x12f   :  { %8742 = vst [vmem:[#allocation113_spill] sm:$0xff] %v4907_v29  ;;  %v819_v25 = vrot.slane %v818_v15, 4  ;;  %v4917_v22 = vadd.f32 1.0, %v768_v56  ;;  %v4919_v2 = vadd.f32 1.0, %v761_v46  ;;  %v795_v48 = vrot.slane %v794_v24, 1 }
 0x130   :  { %8743 = vst [vmem:[#allocation114_spill] sm:$0xff] %v4911_v36  ;;  %v789_v63 = vadd.f32 %v788_v27, %v787_v5  ;;  %v808_v1 = vadd.f32 %v807_v45, %v806_v10  ;;  %v1197_v26 = vmul.f32 2.0, %v775_v44  ;;  %v801_v6 = vadd.f32 %v800_v7, %v799_v59 }
 0x131   :  { %8744 = vst [vmem:[#allocation115_spill] sm:$0xff] %v4913_v19  ;;  %v814_v3 = vrot.slane %v813_v0, 2  ;;  %v4923_v5 = vadd.f32 1.0, %v1196_v57  ;;  %v4925_v28 = vadd.f32 1.0, %v1195_v39  ;;  %v820_v10 = vadd.f32 %v819_v25, %v818_v15 }
 0x132   :  { %8745 = vst [vmem:[#allocation116_spill] sm:$0xff] %v4917_v22  ;;  %v1199_v46 = vmul.f32 2.0, %v789_v63  ;;  %v4933_v59 = vadd.f32 1.0, %v775_v44  ;;  %v917_v45 = vadd.f32 %v4818_v31, %v4820_v52  ;;  %v802_v7 = vrot.slane %v801_v6, 1 }
 0x133   :  { %v894_v8 = vpop.xlane.xlu2 %893  ;;  %8746 = vst [vmem:[#allocation117_spill] sm:$0xff] %v4919_v2  ;;  %v931_v44 = vadd.f32 %v4825_v11, %v4827_v41  ;;  %v821_v31 = vrot.slane %v820_v10, 2  ;;  %v924_v41 = vadd.f32 %v4829_v37, %v4816_v23 }
 0x134   :  { %v892_v51 = vpop.xlane.xlu1 %891  ;;  %8747 = vst [vmem:[#allocation118_spill] sm:$0xff] %v4923_v5 }
 0x135   :  { %v4893_v55 = vadd.f32 %v894_v8, %v892_v51  ;;  %v890_v62 = vpop.xlane.xlu0 %889  ;;  %v910_v8 = vadd.f32 %v4807_v9, %v4809_v61  ;;  %8748 = vst [vmem:[#allocation119_spill] sm:$0xff] %v4925_v28  ;;  %v903_v51 = vadd.f32 %v4811_v49, %v4798_v50  ;;  %v796_v9 = vadd.f32 %v795_v48, %v794_v24 }
 0x136   :  { %v4899_v13 = vadd.f32 %v890_v62, %v888_v14  ;;  %2129 = vrot.lane.b32.xlu0 %v4307_v47, %s4179_s0  ;;  %v781_v14 = vrot.slane %v780_v42, 1  ;;  %v827_v62 = vadd.f32 %v826_v20, %v825_v32  ;;  %8749 = vst [vmem:[#allocation120_spill] sm:$0xff] %v4933_v59  ;;  %v809_v61 = vrot.slane %v808_v1, 1 }
 0x137   :  { %v815_v49 = vadd.f32 %v814_v3, %v813_v0  ;;  %v911_v50 = vrot.slane %v910_v8, 4  ;;  %v4941_v32 = vadd.f32 1.0, %v789_v63  ;;  %v904_v57 = vrot.slane %v903_v51, 4 }
 0x138   :  { %2133 = vrot.lane.b32.xlu2 %v4299_v40, %s4179_s0  ;;  %v782_v34 = vadd.f32 %v781_v14, %v780_v42  ;;  %v4937_v42 = vadd.f32 1.0, %v1197_v26  ;;  %v4945_v24 = vadd.f32 1.0, %v1199_v46  ;;  %v828_v52 = vrot.slane %v827_v62, 2 }
 0x139   :  { %8751 = vst [vmem:[#allocation122_spill] sm:$0xff] %v4941_v32  ;;  %v1200_v0 = vmul.f32 2.0, %v796_v9  ;;  %v810_v14 = vadd.f32 %v809_v61, %v808_v1  ;;  %v832_v63 = vadd.f32 %v4800_v33, %v4802_v16  ;;  %v918_v20 = vrot.slane %v917_v45, 4  ;;  %v8768_v32 = vld [vmem:[#allocation45_spill] sm:$0xff] }
 0x13a   :  { %2131 = vrot.lane.b32.xlu1 %v4329_v60, %s4179_s0  ;;  %8750 = vst [vmem:[#allocation121_spill] sm:$0xff] %v4937_v42  ;;  %v1198_v15 = vmul.f32 2.0, %v782_v34  ;;  %v4947_v39 = vadd.f32 1.0, %v782_v34  ;;  %v803_v48 = vadd.f32 %v802_v7, %v801_v6  ;;  %v816_v26 = vrot.slane %v815_v49, 1  ;;  %v8756_v6 = vld [vmem:[#allocation36_spill] sm:$0xff] }
 0x13b   :  { %v900_v17 = vpop.xlane.xlu2 %899  ;;  %8752 = vst [vmem:[#allocation123_spill] sm:$0xff] %v4945_v24  ;;  %v912_v3 = vadd.f32 %v911_v50, %v910_v8  ;;  %v932_v34 = vrot.slane %v931_v44, 4  ;;  %v829_v61 = vadd.f32 %v828_v52, %v827_v62  ;;  %v822_v16 = vadd.f32 %v821_v31, %v820_v10 }
 0x13c   :  { %v898_v21 = vpop.xlane.xlu1 %897  ;;  %8753 = vst [vmem:[#allocation124_spill] sm:$0xff] %v4947_v39  ;;  %v4957_v1 = vadd.f32 1.0, %v1198_v15  ;;  %v4963_v8 = vadd.f32 1.0, %v796_v9  ;;  %v1202_v37 = vmul.f32 2.0, %v810_v14  ;;  %v833_v23 = vrot.slane %v832_v63, 4  ;;  %v8759_v15 = vld [vmem:[#allocation35_spill] sm:$0xff] }
 0x13d   :  { %v896_v56 = vpop.xlane.xlu0 %895  ;;  %v4965_v7 = vadd.f32 1.0, %v1200_v0  ;;  %v1201_v50 = vmul.f32 2.0, %v803_v48  ;;  %v817_v62 = vadd.f32 %v816_v26, %v815_v49  ;;  %v4969_v52 = vadd.f32 1.0, %v810_v14 }
 0x13e   :  { %v4929_v27 = vadd.f32 %v898_v21, %v896_v56  ;;  %2135 = vrot.lane.b32.xlu0 %v4325_v38, %s4179_s0  ;;  %v905_v21 = vadd.f32 %v904_v57, %v903_v51  ;;  %v8754_v56 = vld [vmem:[#allocation102_spill] sm:$0xff]  ;;  %8757 = vst [vmem:[#allocation36_spill] sm:$0xff] %v4963_v8  ;;  %v919_v51 = vadd.f32 %v918_v20, %v917_v45  ;;  %v925_v57 = vrot.slane %v924_v41, 4  ;;  %v8762_v45 = vld [vmem:[#allocation33_spill] sm:$0xff]  ;;  %v8765_v8 = vld [vmem:[#allocation104_spill] sm:$0xff] }
 0x13f   :  { %v938_v46 = vadd.f32 %v8754_v56, %v4838_v35  ;;  %8755 = vst [vmem:[#allocation102_spill] sm:$0xff] %v4957_v1  ;;  %v913_v35 = vrot.slane %v912_v3, 2  ;;  %v4971_v31 = vadd.f32 1.0, %v803_v48  ;;  %v830_v9 = vrot.slane %v829_v61, 1  ;;  %v8764_v56 = vld [vmem:[#allocation101_spill] sm:$0xff] }
 0x140   :  { %2137 = vrot.lane.b32.xlu2 %v4293_v30, %s4179_s0  ;;  %8758 = vst [vmem:[#allocation125_spill] sm:$0xff] %v4965_v7  ;;  %v906_v10 = vrot.slane %v905_v21, 2  ;;  %v4975_v0 = vadd.f32 1.0, %v1202_v37  ;;  %v834_v20 = vadd.f32 %v833_v23, %v832_v63  ;;  %v945_v7 = vadd.f32 %v8765_v8, %v8764_v56 }
 0x141   :  { %8760 = vst [vmem:[#allocation35_spill] sm:$0xff] %v4969_v52  ;;  %v4979_v26 = vadd.f32 1.0, %v1201_v50  ;;  %v926_v14 = vadd.f32 %v925_v57, %v924_v41  ;;  %v831_v28 = vadd.f32 %v830_v9, %v829_v61  ;;  %v4984_v8 = vadd.f32 1.0, %v817_v62 }
 0x142   :  { %2139 = vrot.lane.b32.xlu1 %v4318_v4, %s4179_s0  ;;  %8761 = vst [vmem:[#allocation126_spill] sm:$0xff] %v4971_v31  ;;  %v1203_v31 = vmul.f32 2.0, %v817_v62  ;;  %v907_v1 = vadd.f32 %v906_v10, %v905_v21  ;;  %v835_v50 = vrot.slane %v834_v20, 2  ;;  %v946_v41 = vrot.slane %v945_v7, 4 }
 0x143   :  { %v1018_v25 = vpop.xlane.xlu2 %1017  ;;  %8763 = vst [vmem:[#allocation33_spill] sm:$0xff] %v4975_v0  ;;  %v8767_v0 = vld [vmem:[#allocation103_spill] sm:$0xff]  ;;  %v927_v57 = vrot.slane %v926_v14, 2  ;;  %v4990_v9 = vadd.f32 1.0, %v831_v28 }
 0x144   :  { %v1016_v11 = vpop.xlane.xlu1 %1015  ;;  %8766 = vst [vmem:[#allocation101_spill] sm:$0xff] %v4979_v26  ;;  %v953_v63 = vrot.slane %v8767_v0, 4  ;;  %v4988_v61 = vadd.f32 1.0, %v1203_v31 }
 0x145   :  { %v1079_v39 = vadd.f32 %v1018_v25, %v1016_v11  ;;  %v902_v59 = vpop.xlane.xlu0 %901  ;;  %v823_v25 = vrot.slane %v822_v16, 1  ;;  %v920_v11 = vrot.slane %v919_v51, 2  ;;  %8769 = vst [vmem:[#allocation104_spill] sm:$0xff] %v4984_v8 }
 0x146   :  { %v4959_v33 = vadd.f32 %v902_v59, %v900_v17  ;;  %2141 = vrot.lane.b32.xlu0 %v8756_v6, %s4179_s0  ;;  %v933_v17 = vadd.f32 %v932_v34, %v931_v44  ;;  %v939_v59 = vrot.slane %v938_v46, 4  ;;  %v914_v44 = vadd.f32 %v913_v35, %v912_v3  ;;  %8771 = vst [vmem:[#allocation103_spill] sm:$0xff] %v4988_v61 }
 0x147   :  { %v1080_v34 = vrot.slane %v1079_v39, 4  ;;  %v824_v37 = vadd.f32 %v823_v25, %v822_v16  ;;  %v921_v3 = vadd.f32 %v920_v11, %v919_v51  ;;  %v908_v16 = vrot.slane %v907_v1, 1  ;;  %8772 = vst [vmem:[#allocation127_spill] sm:$0xff] %v4990_v9  ;;  %v8773_v51 = vld [vmem:[#allocation40_spill] sm:$0xff] }
 0x148   :  { %2143 = vrot.lane.b32.xlu2 %v8759_v15, %s4179_s0  ;;  %v934_v52 = vrot.slane %v933_v17, 2  ;;  %v940_v42 = vadd.f32 %v939_v59, %v938_v46  ;;  %v915_v35 = vrot.slane %v914_v44, 1  ;;  %v8770_v46 = vld [vmem:[#allocation41_spill] sm:$0xff]  ;;  %v1205_v59 = vmul.f32 2.0, %v831_v28 }
 0x149   :  { %v1081_v56 = vadd.f32 %v1080_v34, %v1079_v39  ;;  %v1204_v62 = vmul.f32 2.0, %v824_v37  ;;  %v954_v25 = vadd.f32 %v953_v63, %v8767_v0  ;;  %v4995_v11 = vadd.f32 1.0, %v824_v37 }
 0x14a   :  { %2145 = vrot.lane.b32.xlu1 %v8762_v45, %s4179_s0  ;;  %v935_v10 = vadd.f32 %v934_v52, %v933_v17  ;;  %v4997_v39 = vadd.f32 %v835_v50, %v834_v20  ;;  %v922_v34 = vrot.slane %v921_v3, 1  ;;  %v4999_v8 = vadd.f32 %v915_v35, %v914_v44 }
 0x14b   :  { %v1024_v49 = vpop.xlane.xlu2 %1023  ;;  %8774 = vst [vmem:[#allocation128_spill] sm:$0xff] %v4995_v11  ;;  %v928_v17 = vadd.f32 %v927_v57, %v926_v14  ;;  %v1082_v52 = vrot.slane %v1081_v56, 2  ;;  %v5001_v9 = vadd.f32 %v908_v16, %v907_v1  ;;  %v5003_v36 = vadd.f32 1.0, %v1205_v59  ;;  %v8778_v1 = vld [vmem:[#allocation105_spill] sm:$0xff]  ;;  %v8779_v16 = vld [vmem:[#allocation51_spill] sm:$0xff] }
 0x14c   :  { %v1022_v48 = vpop.xlane.xlu1 %1021  ;;  %v936_v26 = vrot.slane %v935_v10, 1  ;;  %v5005_v37 = vadd.f32 1.0, %v1204_v62  ;;  %v955_v20 = vrot.slane %v954_v25, 2  ;;  %v5010_v14 = vadd.f32 %v922_v34, %v921_v3  ;;  %v8780_v62 = vld [vmem:[#allocation106_spill] sm:$0xff] }
 0x14d   :  { %v1020_v2 = vpop.xlane.xlu0 %1019  ;;  %8775 = vst [vmem:[#allocation129_spill] sm:$0xff] %v5003_v36  ;;  %v929_v35 = vrot.slane %v928_v17, 1  ;;  %v1083_v57 = vadd.f32 %v1082_v52, %v1081_v56  ;;  %v974_v34 = vrot.slane %v8780_v62, 4  ;;  %v8782_v36 = vld [vmem:[#allocation50_spill] sm:$0xff] }
 0x14e   :  { %v1086_v23 = vadd.f32 %v1022_v48, %v1020_v2  ;;  %2147 = vrot.lane.b32.xlu0 %v8768_v32, %s4179_s0  ;;  %v941_v2 = vrot.slane %v940_v42, 2  ;;  %v947_v48 = vadd.f32 %v946_v41, %v945_v7  ;;  %8776 = vst [vmem:[#allocation130_spill] sm:$0xff] %v5005_v37  ;;  %v8777_v7 = vld [vmem:[#allocation54_spill] sm:$0xff]  ;;  %v960_v41 = vrot.slane %v8778_v1, 4 }
 0x14f   :  { %v956_v59 = vadd.f32 %v955_v20, %v954_v25  ;;  %v5028_v56 = vmul.f32 0.7, %v5010_v14  ;;  %v5034_v37 = vadd.f32 %v929_v35, %v928_v17  ;;  %v995_v25 = vrot.slane %v4893_v55, 4 }
 0x150   :  { %v1087_v21 = vrot.slane %v1086_v23, 4  ;;  %2149 = vrot.lane.b32.xlu2 %v8770_v46, %s4179_s0  ;;  %v942_v0 = vadd.f32 %v941_v2, %v940_v42  ;;  %v5014_v42 = vmul.f32 0.7, %v4999_v8  ;;  %v961_v11 = vadd.f32 %v960_v41, %v8778_v1 }
 0x151   :  { %v1084_v20 = vrot.slane %v1083_v57, 1  ;;  %v957_v41 = vrot.slane %v956_v59, 1  ;;  %v975_v5 = vadd.f32 %v974_v34, %v8780_v62  ;;  %v8784_v62 = vld [vmem:[#allocation61_spill] sm:$0xff] }
 0x152   :  { %2151 = vrot.lane.b32.xlu1 %v8773_v51, %s4179_s0  ;;  %v1088_v61 = vadd.f32 %v1087_v21, %v1086_v23  ;;  %v948_v23 = vrot.slane %v947_v48, 2  ;;  %v943_v2 = vrot.slane %v942_v0, 1 }
 0x153   :  { %v1030_v31 = vpop.xlane.xlu2 %1029 }
 0x154   :  { %v1028_v28 = vpop.xlane.xlu1 %1027  ;;  %v1089_v21 = vrot.slane %v1088_v61, 2  ;;  %v949_v52 = vadd.f32 %v948_v23, %v947_v48  ;;  %v5040_v22 = vadd.f32 %v943_v2, %v942_v0  ;;  %v988_v48 = vrot.slane %v4899_v13, 4 }
 0x155   :  { %v1100_v63 = vadd.f32 %v1030_v31, %v1028_v28  ;;  %v1026_v24 = vpop.xlane.xlu0 %1025  ;;  %v8781_v31 = vld [vmem:[#allocation107_spill] sm:$0xff]  ;;  %v996_v0 = vadd.f32 %v995_v25, %v4893_v55  ;;  %v1085_v2 = vadd.f32 %v1084_v20, %v1083_v57  ;;  %v8785_v57 = vld [vmem:[#allocation58_spill] sm:$0xff] }
 0x156   :  { %v1093_v50 = vadd.f32 %v1026_v24, %v1024_v49  ;;  %2153 = vrot.lane.b32.xlu0 %v8777_v7, %s4179_s0  ;;  %v5019_v24 = vmul.f32 0.7, %v5001_v9  ;;  %v5021_v49 = vadd.f32 %v936_v26, %v935_v10  ;;  %v967_v28 = vrot.slane %v8781_v31, 4 }
 0x157   :  { %v1101_v3 = vrot.slane %v1100_v63, 4  ;;  %v981_v26 = vrot.slane %v4883_v18, 4  ;;  %v1090_v19 = vadd.f32 %v1089_v21, %v1088_v61  ;;  %v950_v61 = vrot.slane %v949_v52, 1 }
 0x158   :  { %2155 = vrot.lane.b32.xlu2 %v8779_v16, %s4179_s0  ;;  %v1094_v44 = vrot.slane %v1093_v50, 4  ;;  %v5038_v54 = vmul.f32 0.7, %v5021_v49  ;;  %v968_v17 = vadd.f32 %v967_v28, %v8781_v31  ;;  %v962_v21 = vrot.slane %v961_v11, 2 }
 0x159   :  { %v1102_v23 = vadd.f32 %v1101_v3, %v1100_v63  ;;  %v982_v29 = vadd.f32 %v981_v26, %v4883_v18  ;;  %v1002_v63 = vrot.slane %v4929_v27, 4  ;;  %v1091_v3 = vrot.slane %v1090_v19, 1 }
 0x15a   :  { %2157 = vrot.lane.b32.xlu1 %v8782_v36, %s4179_s0  ;;  %v1095_v35 = vadd.f32 %v1094_v44, %v1093_v50  ;;  %v5055_v50 = vmul.f32 0.7, %v5034_v37  ;;  %v5058_v44 = vmul.f32 0.7, %v5040_v22  ;;  %v989_v34 = vadd.f32 %v988_v48, %v4899_v13 }
 0x15b   :  { %v5032_v10 = vpop.xlane.xlu2 %1035  ;;  %v1103_v18 = vrot.slane %v1102_v23, 2  ;;  %v976_v31 = vrot.slane %v975_v5, 2  ;;  %v969_v55 = vrot.slane %v968_v17, 2  ;;  %v5065_v26 = vadd.f32 %v950_v61, %v949_v52 }
 0x15c   :  { %v1034_v12 = vpop.xlane.xlu1 %1033  ;;  %v1096_v28 = vrot.slane %v1095_v35, 2  ;;  %v963_v25 = vadd.f32 %v962_v21, %v961_v11  ;;  %v983_v20 = vrot.slane %v982_v29, 2  ;;  %v1223_v13 = vadd.f32 %v1085_v2, %v5001_v9 }
 0x15d   :  { %v1032_v1 = vpop.xlane.xlu0 %1031  ;;  %v1527_v36 = vmul.f32 0.3, %v1085_v2  ;;  %v1104_v16 = vadd.f32 %v1103_v18, %v1102_v23  ;;  %v977_v11 = vadd.f32 %v976_v31, %v975_v5  ;;  %v970_v61 = vadd.f32 %v969_v55, %v968_v17  ;;  %v8788_v5 = vld [vmem:[#allocation69_spill] sm:$0xff] }
 0x15e   :  { %2159 = vrot.lane.b32.xlu0 %v8783_v43, %s4179_s0  ;;  %v5048_v58 = vadd.f32 %v1034_v12, %v1032_v1  ;;  %v5061_v12 = vadd.f32 %v957_v41, %v956_v59  ;;  %v1009_v1 = vrot.slane %v4959_v33, 4  ;;  %v1003_v43 = vadd.f32 %v1002_v63, %v4929_v27 }
 0x15f   :  { %v1092_v59 = vadd.f32 %v1091_v3, %v1090_v19  ;;  %v990_v41 = vrot.slane %v989_v34, 2  ;;  %v1097_v21 = vadd.f32 %v1096_v28, %v1095_v35  ;;  %v5076_v27 = vmul.f32 0.7, %v5065_v26 }
 0x160   :  { %2161 = vrot.lane.b32.xlu2 %v8784_v62, %s4179_s0  ;;  %v997_v62 = vrot.slane %v996_v0, 2  ;;  %v5071_v52 = vmul.f32 0.7, %v5061_v12  ;;  %v964_v9 = vrot.slane %v963_v25, 1  ;;  %v984_v19 = vadd.f32 %v983_v20, %v982_v29 }
 0x161   :  { %v1010_v63 = vadd.f32 %v1009_v1, %v4959_v33  ;;  %v1004_v23 = vrot.slane %v1003_v43, 2  ;;  %v1224_v3 = vadd.f32 %v1092_v59, %v4999_v8  ;;  %v991_v17 = vadd.f32 %v990_v41, %v989_v34 }
 0x162   :  { %2163 = vrot.lane.b32.xlu1 %v8785_v57, %s4179_s0  ;;  %v8786_v57 = vld [vmem:[#allocation71_spill] sm:$0xff]  ;;  %v998_v2 = vadd.f32 %v997_v62, %v996_v0  ;;  %v1543_v35 = vadd.f32 %v1527_v36, %v5019_v24  ;;  %v1105_v18 = vrot.slane %v1104_v16, 1  ;;  %v978_v55 = vrot.slane %v977_v11, 1  ;;  %v8789_v0 = vld [vmem:[#allocation68_spill] sm:$0xff] }
 0x163   :  { %v1042_v53 = vpop.xlane.xlu2 %1041  ;;  %v971_v28 = vrot.slane %v970_v61, 1  ;;  %v1098_v29 = vrot.slane %v1097_v21, 1  ;;  %v1108_v33 = vrot.slane %v5048_v58, 4  ;;  %v985_v62 = vrot.slane %v984_v19, 1 }
 0x164   :  { %v1040_v48 = vpop.xlane.xlu1 %1039  ;;  %v1011_v20 = vrot.slane %v1010_v63, 2  ;;  %v1528_v8 = vmul.f32 0.3, %v1092_v59  ;;  %v5091_v34 = vadd.f32 %v964_v9, %v963_v25  ;;  %v1005_v36 = vadd.f32 %v1004_v23, %v1003_v43  ;;  %v8792_v43 = vld [vmem:[#allocation79_spill] sm:$0xff] }
 0x165   :  { %v1121_v7 = vadd.f32 %v1042_v53, %v1040_v48  ;;  %v1038_v51 = vpop.xlane.xlu0 %1037  ;;  %v5079_v53 = vadd.f32 1.0, %v1223_v13  ;;  %v992_v48 = vrot.slane %v991_v17, 1  ;;  %v5096_v41 = vadd.f32 1.0, %v1543_v35 }
 0x166   :  { %2165 = vrot.lane.b32.xlu0 %v8786_v57, %s4179_s0  ;;  %v1114_v31 = vadd.f32 %v1038_v51, %v5032_v10  ;;  %v5094_v51 = vadd.f32 1.0, %v1224_v3  ;;  %v999_v10 = vrot.slane %v998_v2, 1  ;;  %v5098_v57 = vadd.f32 %v978_v55, %v977_v11 }
 0x167   :  { %8787 = vst [vmem:[#allocation105_spill] sm:$0xff] %v5079_v53  ;;  %v1122_v1 = vrot.slane %v1121_v7, 4  ;;  %3807 = vrcp.f32 %v5079_v53  ;;  %v5100_v59 = vadd.f32 %v971_v28, %v970_v61  ;;  %v1099_v46 = vadd.f32 %v1098_v29, %v1097_v21  ;;  %v8793_v61 = vld [vmem:[#allocation76_spill] sm:$0xff]  ;;  %v8796_v28 = vld [vmem:[#allocation75_spill] sm:$0xff] }
 0x168   :  { %2167 = vrot.lane.b32.xlu2 %v8788_v5, %s4179_s0  ;;  %8790 = vst [vmem:[#allocation106_spill] sm:$0xff] %v5094_v51  ;;  %v1106_v5 = vadd.f32 %v1105_v18, %v1104_v16  ;;  %v1109_v25 = vadd.f32 %v1108_v33, %v5048_v58  ;;  %v5105_v9 = vadd.f32 %v985_v62, %v984_v19  ;;  %v1006_v35 = vrot.slane %v1005_v36, 1 }
 0x169   :  { %8791 = vst [vmem:[#allocation107_spill] sm:$0xff] %v5096_v41  ;;  %v1012_v23 = vadd.f32 %v1011_v20, %v1010_v63  ;;  %v1544_v3 = vadd.f32 %v1528_v8, %v5014_v42  ;;  %v1123_v32 = vadd.f32 %v1122_v1, %v1121_v7  ;;  %3809 = vrcp.f32 %v5094_v51 }
 0x16a   :  { %2169 = vrot.lane.b32.xlu1 %v8789_v0, %s4179_s0  ;;  %v1115_v16 = vrot.slane %v1114_v31, 4  ;;  %v5111_v21 = vadd.f32 %v999_v10, %v998_v2  ;;  %v5113_v58 = vadd.f32 %v992_v48, %v991_v17  ;;  %3811 = vrcp.f32 %v5096_v41 }
 0x16b   :  { %v5089_v13 = vpop.xlane.xlu2 %1047  ;;  %v1226_v19 = vadd.f32 %v1106_v5, %v5034_v37  ;;  %v1530_v42 = vmul.f32 0.3, %v1106_v5  ;;  %v1225_v7 = vadd.f32 %v1099_v46, %v5010_v14  ;;  %v1110_v18 = vrot.slane %v1109_v25, 2 }
 0x16c   :  { %v1046_v24 = vpop.xlane.xlu1 %1045  ;;  %8794 = vst [vmem:[#allocation131_spill] sm:$0xff] %v5111_v21  ;;  %v1124_v55 = vrot.slane %v1123_v32, 2  ;;  %v5123_v29 = vmul.f32 0.7, %v5091_v34  ;;  %v1013_v2 = vrot.slane %v1012_v23, 1  ;;  %v5125_v17 = vadd.f32 1.0, %v1544_v3 }
 0x16d   :  { %v1044_v0 = vpop.xlane.xlu0 %1043  ;;  %v5117_v63 = vpop.eup %3807  ;;  %v1116_v33 = vadd.f32 %v1115_v16, %v1114_v31  ;;  %v5131_v37 = vmul.f32 0.7, %v5100_v59  ;;  %v5134_v14 = vmul.f32 0.7, %v5105_v9  ;;  %v5136_v5 = vadd.f32 %v1006_v35, %v1005_v36 }
 0x16e   :  { %2171 = vrot.lane.b32.xlu0 %v8792_v43, %s4179_s0  ;;  %v1128_v11 = vadd.f32 %v1046_v24, %v1044_v0  ;;  %8795 = vst [vmem:[#allocation132_spill] sm:$0xff] %v5117_v63  ;;  %v5128_v0 = vmul.f32 0.7, %v5098_v57  ;;  %v5139_v20 = vmul.f32 0.7, %v5111_v21  ;;  %v1256_v8 = vmul.f32 %v5117_v63, %v5079_v53 }
 0x16f   :  { %8797 = vst [vmem:[#allocation133_spill] sm:$0xff] %v5125_v17  ;;  %v5143_v1 = vadd.f32 1.0, %v1226_v19  ;;  %v1125_v31 = vadd.f32 %v1124_v55, %v1123_v32  ;;  %v5145_v48 = vpop.eup %3809  ;;  %v5148_v3 = vmul.f32 0.7, %v5113_v58  ;;  %v1546_v36 = vadd.f32 %v1530_v42, %v5055_v50 }
 0x170   :  { %2173 = vrot.lane.b32.xlu2 %v8793_v61, %s4179_s0  ;;  %8798 = vst [vmem:[#allocation134_spill] sm:$0xff] %v5134_v14  ;;  %v5151_v35 = vadd.f32 1.0, %v1225_v7  ;;  %v1111_v16 = vadd.f32 %v1110_v18, %v1109_v25  ;;  %v5155_v61 = vpop.eup %3811  ;;  %v5157_v19 = vadd.f32 %v1013_v2, %v1012_v23  ;;  %3813 = vrcp.f32 %v5125_v17  ;;  %v8810_v7 = vld [vmem:[#allocation86_spill] sm:$0xff] }
 0x171   :  { %8799 = vst [vmem:[#allocation135_spill] sm:$0xff] %v5136_v5  ;;  %v1126_v32 = vrot.slane %v1125_v31, 1  ;;  %v1117_v55 = vrot.slane %v1116_v33, 2  ;;  %v8807_v43 = vrot.slane %v4997_v39, 1  ;;  %v5166_v50 = vmul.f32 0.7, %v5136_v5 }
 0x172   :  { %2175 = vrot.lane.b32.xlu1 %v8796_v28, %s4179_s0  ;;  %8800 = vst [vmem:[#allocation136_spill] sm:$0xff] %v5139_v20  ;;  %v8804_v28 = vld [vmem:[#allocation88_spill] sm:$0xff]  ;;  %v1529_v25 = vmul.f32 0.3, %v1099_v46  ;;  %v1129_v42 = vrot.slane %v1128_v11, 4  ;;  %v1257_v18 = vsub.f32 1.0, %v1256_v8  ;;  %v1271_v23 = vmul.f32 %v5145_v48, %v5094_v51 }
 0x173   :  { %8801 = vst [vmem:[#allocation137_spill] sm:$0xff] %v5143_v1  ;;  %v1054_v24 = vpop.xlane.xlu2 %1053  ;;  %v5163_v20 = vadd.f32 %v8807_v43, %v4997_v39  ;;  %3815 = vrcp.f32 %v5143_v1  ;;  %v1127_v2 = vadd.f32 %v1126_v32, %v1125_v31  ;;  %v5175_v39 = vadd.f32 1.0, %v1546_v36  ;;  %v8812_v46 = vld [vmem:[#allocation84_spill] sm:$0xff] }
 0x174   :  { %v1052_v62 = vpop.xlane.xlu1 %1051  ;;  %8802 = vst [vmem:[#allocation138_spill] sm:$0xff] %v5145_v48  ;;  %3817 = vrcp.f32 %v5151_v35  ;;  %v1112_v43 = vrot.slane %v1111_v16, 1  ;;  %v1266_v31 = vand.u32 2147483648, %v5079_v53  ;;  %v1586_v32 = vand.u32 2147483648, %v5096_v41  ;;  %v8821_v53 = vld [vmem:[#allocation94_spill] sm:$0xff] }
 0x175   :  { %v1050_v10 = vpop.xlane.xlu0 %1049  ;;  %8803 = vst [vmem:[#allocation139_spill] sm:$0xff] %v5151_v35  ;;  %v5184_v8 = vadd.f32 %v1127_v2, %v5065_v26  ;;  %v1545_v36 = vadd.f32 %v1529_v25, %v5028_v56  ;;  %v1130_v5 = vadd.f32 %v1129_v42, %v1128_v11  ;;  %v1258_v14 = vmul.f32 %v5117_v63, %v1257_v18  ;;  %v8815_v56 = vld [vmem:[#allocation96_spill] sm:$0xff] }
 0x176   :  { %2177 = vrot.lane.b32.xlu0 %v8804_v28, %s4179_s0  ;;  %8805 = vst [vmem:[#allocation140_spill] sm:$0xff] %v5155_v61  ;;  %v1576_v28 = vmul.f32 %v5155_v61, %v5096_v41  ;;  %v5189_v21 = vpop.eup %3813  ;;  %3819 = vrcp.f32 %v5175_v39  ;;  %v1142_v18 = vadd.f32 %v1054_v24, %v1052_v62 }
 0x177   :  { %8806 = vst [vmem:[#allocation141_spill] sm:$0xff] %v5157_v19  ;;  %v1131_v42 = vrot.slane %v1130_v5, 2 }
 0x178   :  { %8808 = vst [vmem:[#allocation142_spill] sm:$0xff] %v5163_v20  ;;  %2179 = vrot.lane.b32.xlu2 %v8810_v7, %s4179_s0  ;;  %v5181_v20 = vmul.f32 0.7, %v5157_v19  ;;  %v1533_v7 = vmul.f32 0.3, %v1127_v2  ;;  %v1272_v19 = vsub.f32 1.0, %v1271_v23  ;;  %v5203_v23 = vadd.f32 %v1050_v10, %v5089_v13 }
 0x179   :  { %8809 = vst [vmem:[#allocation143_spill] sm:$0xff] %v5166_v50  ;;  %v1118_v50 = vadd.f32 %v1117_v55, %v1116_v33  ;;  %v1577_v26 = vsub.f32 1.0, %v1576_v28  ;;  %v1113_v33 = vadd.f32 %v1112_v43, %v1111_v16  ;;  %v5200_v11 = vpop.eup %3815  ;;  %v5209_v16 = vor.u32 1.1754944e-38, %v1266_v31 }
 0x17a   :  { %8811 = vst [vmem:[#allocation144_spill] sm:$0xff] %v5175_v39  ;;  %2181 = vrot.lane.b32.xlu1 %v8812_v46, %s4179_s0  ;;  %v5196_v55 = vadd.f32 %v1533_v7, %v5076_v27  ;;  %v5207_v46 = vpop.eup %3817  ;;  %v5211_v27 = vor.u32 1.1754944e-38, %v1586_v32  ;;  %v1591_v7 = vmul.f32 %v5189_v21, %v5125_v17  ;;  %v5215_v43 = vadd.f32 1.0, %v1545_v36 }
 0x17b   :  { %8813 = vst [vmem:[#allocation145_spill] sm:$0xff] %v5181_v20  ;;  %v1281_v20 = vand.u32 2147483648, %v5094_v51  ;;  %v1119_v25 = vrot.slane %v1118_v50, 1  ;;  %v5205_v28 = vpop.xlane.xlu2 %1059  ;;  %v1273_v62 = vmul.f32 %v5145_v48, %v1272_v19  ;;  %v1601_v10 = vand.u32 2147483648, %v5125_v17 }
 0x17c   :  { %8814 = vst [vmem:[#allocation146_spill] sm:$0xff] %v5189_v21  ;;  %v1058_v2 = vpop.xlane.xlu1 %1057  ;;  %v5225_v31 = vadd.f32 %v5117_v63, %v1258_v14  ;;  %v1301_v32 = vmul.f32 %v5200_v11, %v5143_v1  ;;  %v1227_v36 = vadd.f32 %v1113_v33, %v5021_v49  ;;  %v5233_v19 = vmul.f32 %v5155_v61, %v1577_v26  ;;  %v5237_v17 = vpop.eup %3819 }
 0x17d   :  { %v1056_v41 = vpop.xlane.xlu0 %1055  ;;  %8816 = vst [vmem:[#allocation147_spill] sm:$0xff] %v5200_v11  ;;  %v5221_v24 = vor.u32 1.1754944e-38, %v1281_v20  ;;  %v1286_v20 = vmul.f32 %v5207_v46, %v5151_v35  ;;  %v1531_v13 = vmul.f32 0.3, %v1113_v33  ;;  %v1592_v14 = vsub.f32 1.0, %v1591_v7 }
 0x17e   :  { %2183 = vrot.lane.b32.xlu0 %v8815_v56, %s4179_s0  ;;  %8817 = vst [vmem:[#allocation148_spill] sm:$0xff] %v5207_v46  ;;  %v1311_v51 = vand.u32 2147483648, %v5143_v1  ;;  %3821 = vrcp.f32 %v5215_v43  ;;  %v5243_v49 = vadd.f32 %v5145_v48, %v1273_v62  ;;  %v1302_v33 = vsub.f32 1.0, %v1301_v32  ;;  %v8834_v1 = vld [vmem:[#allocation98_spill] sm:$0xff] }
 0x17f   :  { %8818 = vst [vmem:[#allocation149_spill] sm:$0xff] %v5209_v16  ;;  %v8824_v16 = vld [vmem:[#allocation92_spill] sm:$0xff]  ;;  %v1143_v7 = vrot.slane %v1142_v18, 4  ;;  %v1621_v61 = vmul.f32 %v5237_v17, %v5175_v39  ;;  %v1287_v63 = vsub.f32 1.0, %v1286_v20  ;;  %v1547_v62 = vadd.f32 %v1531_v13, %v5038_v54 }
 0x180   :  { %8819 = vst [vmem:[#allocation150_spill] sm:$0xff] %v5211_v27  ;;  %2185 = vrot.lane.b32.xlu2 %v8821_v53, %s4179_s0  ;;  %v1132_v27 = vadd.f32 %v1131_v42, %v1130_v5  ;;  %v5245_v5 = vor.u32 1.1754944e-38, %v1601_v10  ;;  %v5259_v26 = vor.u32 1.1754944e-38, %v1311_v51  ;;  %v1616_v20 = vand.u32 2147483648, %v5215_v43 }
 0x181   :  { %8820 = vst [vmem:[#allocation151_spill] sm:$0xff] %v5215_v43  ;;  %v1303_v51 = vmul.f32 %v5200_v11, %v1302_v33 }
 0x182   :  { %8822 = vst [vmem:[#allocation94_spill] sm:$0xff] %v5221_v24  ;;  %2187 = vrot.lane.b32.xlu1 %v8824_v16, %s4179_s0  ;;  %v1120_v24 = vadd.f32 %v1119_v25, %v1118_v50  ;;  %v5249_v50 = vadd.f32 1.0, %v1227_v36  ;;  %v1133_v25 = vrot.slane %v1132_v27, 1  ;;  %v1296_v36 = vand.u32 2147483648, %v5151_v35 }
 0x183   :  { %8823 = vst [vmem:[#allocation152_spill] sm:$0xff] %v5225_v31  ;;  %v1631_v31 = vand.u32 2147483648, %v5175_v39  ;;  %v1144_v39 = vadd.f32 %v1143_v7, %v1142_v18 }
 0x184   :  { %8825 = vst [vmem:[#allocation92_spill] sm:$0xff] %v5233_v19  ;;  %v8830_v19 = vld [vmem:[#allocation100_spill] sm:$0xff]  ;;  %v1532_v10 = vmul.f32 0.3, %v1120_v24  ;;  %v1064_v42 = vpop.xlane.xlu1 %1063  ;;  %v1228_v54 = vadd.f32 %v1120_v24, %v5040_v22  ;;  %v1134_v13 = vadd.f32 %v1133_v25, %v1132_v27  ;;  %3823 = vrcp.f32 %v5249_v50 }
 0x185   :  { %8826 = vst [vmem:[#allocation153_spill] sm:$0xff] %v5237_v17  ;;  %v5261_v32 = vor.u32 1.1754944e-38, %v1631_v31  ;;  %v1136_v31 = vrot.slane %v5203_v23, 4  ;;  %v5278_v22 = vadd.f32 1.0, %v1547_v62  ;;  %v5282_v27 = vadd.f32 1.0, %v5184_v8 }
 0x186   :  { %8827 = vst [vmem:[#allocation154_spill] sm:$0xff] %v5243_v49  ;;  %2189 = vrot.lane.b32.xlu0 %v8830_v19, %s4179_s0  ;;  %v5264_v49 = vpop.xlane.xlu0 %1061  ;;  %v1548_v18 = vadd.f32 %v1532_v10, %v5058_v44  ;;  %v1230_v24 = vadd.f32 %v1134_v13, %v5061_v12  ;;  %v1534_v33 = vmul.f32 0.3, %v1134_v13  ;;  %v1145_v25 = vrot.slane %v1144_v39, 2 }
 0x187   :  { %8828 = vst [vmem:[#allocation155_spill] sm:$0xff] %v5245_v5  ;;  %v5257_v5 = vmul.f32 %v5189_v21, %v1592_v14  ;;  %v1066_v14 = vpop.xlane.xlu2 %1065  ;;  %v1288_v21 = vmul.f32 %v5207_v46, %v1287_v63  ;;  %v5285_v7 = vor.u32 1.1754944e-38, %v1296_v36  ;;  %v5293_v63 = vadd.f32 1.0, %v5196_v55 }
 0x188   :  { %8829 = vst [vmem:[#allocation156_spill] sm:$0xff] %v5249_v50  ;;  %2191 = vrot.lane.b32.xlu2 %v8834_v1, %s4179_s0  ;;  %v1550_v44 = vadd.f32 %v1534_v33, %v5071_v52  ;;  %v1146_v8 = vadd.f32 %v1145_v25, %v1144_v39  ;;  %v5298_v12 = vor.u32 1.1754944e-38, %v1616_v20  ;;  %3825 = vrcp.f32 %v5278_v22 }
 0x189   :  { %8831 = vst [vmem:[#allocation100_spill] sm:$0xff] %v5257_v5  ;;  %v5270_v5 = vpop.eup %3821  ;;  %v5301_v10 = vadd.f32 1.0, %v1548_v18  ;;  %v5312_v52 = vadd.f32 %v5207_v46, %v1288_v21  ;;  %3827 = vrcp.f32 %v5282_v27  ;;  %v5318_v20 = vadd.f32 1.0, %v1230_v24 }
 0x18a   :  { %8832 = vst [vmem:[#allocation157_spill] sm:$0xff] %v5259_v26  ;;  %2259 = vrot.lane.b32.xlu1 %v4307_v47, %s4180_s1  ;;  %v1622_v26 = vsub.f32 1.0, %v1621_v61  ;;  %v1137_v61 = vadd.f32 %v1136_v31, %v5203_v23  ;;  %v5306_v23 = vadd.f32 %v5200_v11, %v1303_v51  ;;  %v1147_v13 = vrot.slane %v1146_v8, 1 }
 0x18b   :  { %8833 = vst [vmem:[#allocation158_spill] sm:$0xff] %v5261_v32  ;;  %v1149_v32 = vadd.f32 %v1058_v2, %v1056_v41  ;;  %v1606_v41 = vmul.f32 %v5270_v5, %v5215_v43  ;;  %v5289_v2 = vadd.f32 1.0, %v1228_v54  ;;  %v5303_v54 = vpop.eup %3823  ;;  %v1326_v25 = vand.u32 2147483648, %v5249_v50 }
 0x18c   :  { %8835 = vst [vmem:[#allocation98_spill] sm:$0xff] %v5270_v5  ;;  %v1138_v36 = vrot.slane %v1137_v61, 2  ;;  %v5309_v55 = vmul.f32 %v5237_v17, %v1622_v26  ;;  %v1070_v18 = vpop.xlane.xlu1 %1069  ;;  %v1316_v33 = vmul.f32 %v5303_v54, %v5249_v50  ;;  %v1646_v24 = vand.u32 2147483648, %v5278_v22 }
 0x18d   :  { %8836 = vst [vmem:[#allocation159_spill] sm:$0xff] %v5278_v22  ;;  %v1150_v62 = vrot.slane %v1149_v32, 4  ;;  %v1607_v39 = vsub.f32 1.0, %v1606_v41  ;;  %3829 = vrcp.f32 %v5289_v2  ;;  %v1148_v51 = vadd.f32 %v1147_v13, %v1146_v8 }
 0x18e   :  { %8837 = vst [vmem:[#allocation160_spill] sm:$0xff] %v5282_v27  ;;  %2261 = vrot.lane.b32.xlu0 %v4329_v60, %s4180_s1  ;;  %3831 = vrcp.f32 %v5293_v63  ;;  %v1139_v26 = vadd.f32 %v1138_v36, %v1137_v61  ;;  %v1068_v21 = vpop.xlane.xlu0 %1067  ;;  %v1356_v36 = vand.u32 2147483648, %v5282_v27 }
 0x18f   :  { %8838 = vst [vmem:[#allocation161_spill] sm:$0xff] %v5285_v7  ;;  %v1151_v31 = vadd.f32 %v1150_v62, %v1149_v32  ;;  %3833 = vrcp.f32 %v5301_v10  ;;  %v5329_v41 = vpop.xlane.xlu2 %1071  ;;  %v1163_v32 = vadd.f32 %v1066_v14, %v1064_v42  ;;  %v5331_v62 = vpop.eup %3825  ;;  %v5337_v50 = vadd.f32 %v1070_v18, %v1068_v21 }
 0x190   :  { %8839 = vst [vmem:[#allocation162_spill] sm:$0xff] %v5289_v2  ;;  %2263 = vrot.lane.b32.xlu2 %v4299_v40, %s4180_s1  ;;  %3835 = vrcp.f32 %v5318_v20  ;;  %v5339_v17 = vpop.eup %3827  ;;  %v1232_v11 = vadd.f32 %v1148_v51, %v5100_v59  ;;  %v1536_v48 = vmul.f32 0.3, %v1148_v51  ;;  %v5347_v14 = vmul.f32 %v5270_v5, %v1607_v39 }
 0x191   :  { %8840 = vst [vmem:[#allocation163_spill] sm:$0xff] %v5293_v63  ;;  %v1152_v61 = vrot.slane %v1151_v31, 2  ;;  %v5360_v39 = vor.u32 1.1754944e-38, %v1326_v25  ;;  %v1636_v21 = vmul.f32 %v5331_v62, %v5278_v22  ;;  %v1341_v7 = vand.u32 2147483648, %v5289_v2 }
 0x192   :  { %8841 = vst [vmem:[#allocation164_spill] sm:$0xff] %v5298_v12  ;;  %2265 = vrot.lane.b32.xlu1 %v4325_v38, %s4180_s1  ;;  %v1317_v12 = vsub.f32 1.0, %v1316_v33  ;;  %v1552_v59 = vadd.f32 %v1536_v48, %v5131_v37  ;;  %v5369_v37 = vor.u32 1.1754944e-38, %v1356_v36  ;;  %v5380_v22 = vadd.f32 1.0, %v1232_v11 }
 0x193   :  { %8842 = vst [vmem:[#allocation165_spill] sm:$0xff] %v5301_v10  ;;  %v1153_v13 = vadd.f32 %v1152_v61, %v1151_v31  ;;  %v5344_v42 = vpop.eup %3829  ;;  %v5366_v61 = vor.u32 1.1754944e-38, %v1646_v24 }
 0x194   :  { %8843 = vst [vmem:[#allocation166_spill] sm:$0xff] %v5303_v54  ;;  %v5352_v18 = vpop.eup %3831  ;;  %v1331_v48 = vmul.f32 %v5344_v42, %v5289_v2  ;;  %v8918_v2 = vld [vmem:[#allocation136_spill] sm:$0xff] }
 0x195   :  { %8844 = vst [vmem:[#allocation167_spill] sm:$0xff] %v5306_v23  ;;  %v1156_v23 = vadd.f32 %v5264_v49, %v5205_v28  ;;  %v1676_v28 = vand.u32 2147483648, %v5293_v63  ;;  %v5350_v49 = vadd.f32 1.0, %v1550_v44  ;;  %v5358_v31 = vpop.eup %3833  ;;  %v1346_v44 = vmul.f32 %v5339_v17, %v5282_v27 }
 0x196   :  { %8845 = vst [vmem:[#allocation168_spill] sm:$0xff] %v5309_v55  ;;  %v1140_v55 = vrot.slane %v1139_v26, 1  ;;  %2267 = vrot.lane.b32.xlu0 %v4293_v30, %s4180_s1  ;;  %v1154_v33 = vrot.slane %v1153_v13, 1  ;;  %v5375_v25 = vpop.eup %3835  ;;  %v1332_v11 = vsub.f32 1.0, %v1331_v48  ;;  %v5411_v48 = vor.u32 1.1754944e-38, %v1341_v7 }
 0x197   :  { %8846 = vst [vmem:[#allocation169_spill] sm:$0xff] %v5312_v52  ;;  %v1157_v24 = vrot.slane %v1156_v23, 4  ;;  %3837 = vrcp.f32 %v5350_v49  ;;  %v1347_v27 = vsub.f32 1.0, %v1346_v44  ;;  %v5386_v52 = vpop.xlane.xlu2 %1077 }
 0x198   :  { %8847 = vst [vmem:[#allocation170_spill] sm:$0xff] %v5318_v20  ;;  %v1141_v8 = vadd.f32 %v1140_v55, %v1139_v26  ;;  %v1164_v26 = vrot.slane %v1163_v32, 4  ;;  %2269 = vrot.lane.b32.xlu2 %v4318_v4, %s4180_s1  ;;  %3839 = vrcp.f32 %v5380_v22 }
 0x199   :  { %8848 = vst [vmem:[#allocation171_spill] sm:$0xff] %v5331_v62 }
 0x19a   :  { %8849 = vst [vmem:[#allocation172_spill] sm:$0xff] %v5339_v17  ;;  %v1231_v55 = vadd.f32 %v1141_v8, %v5091_v34  ;;  %v1535_v51 = vmul.f32 0.3, %v1141_v8  ;;  %2271 = vrot.lane.b32.xlu1 %v8756_v6, %s4180_s1  ;;  %v1318_v8 = vmul.f32 %v5303_v54, %v1317_v12  ;;  %v1155_v34 = vadd.f32 %v1154_v33, %v1153_v13 }
 0x19b   :  { %8850 = vst [vmem:[#allocation173_spill] sm:$0xff] %v5344_v42  ;;  %v1666_v12 = vmul.f32 %v5352_v18, %v5293_v63  ;;  %v1158_v13 = vadd.f32 %v1157_v24, %v1156_v23  ;;  %v1348_v33 = vmul.f32 %v5339_v17, %v1347_v27 }
 0x19c   :  { %8851 = vst [vmem:[#allocation174_spill] sm:$0xff] %v5347_v14  ;;  %v1551_v36 = vadd.f32 %v1535_v51, %v5123_v29  ;;  %v5397_v29 = vadd.f32 %v5303_v54, %v1318_v8  ;;  %v5402_v51 = vadd.f32 1.0, %v1552_v59  ;;  %v1661_v8 = vand.u32 2147483648, %v5301_v10  ;;  %v1076_v54 = vpop.xlane.xlu1 %1075 }
 0x19d   :  { %8852 = vst [vmem:[#allocation175_spill] sm:$0xff] %v5350_v49  ;;  %v5414_v14 = vpop.eup %3837  ;;  %v1667_v23 = vsub.f32 1.0, %v1666_v12  ;;  %v1333_v59 = vmul.f32 %v5344_v42, %v1332_v11  ;;  %v1159_v7 = vrot.slane %v1158_v13, 2 }
 0x19e   :  { %8853 = vst [vmem:[#allocation176_spill] sm:$0xff] %v5352_v18  ;;  %2273 = vrot.lane.b32.xlu0 %v8759_v15, %s4180_s1  ;;  %v5425_v12 = vadd.f32 1.0, %v1551_v36  ;;  %v5427_v11 = vpop.eup %3839 }
 0x19f   :  { %8854 = vst [vmem:[#allocation177_spill] sm:$0xff] %v5358_v31 }
 0x1a0   :  { %8855 = vst [vmem:[#allocation178_spill] sm:$0xff] %v5360_v39  ;;  %v5378_v39 = vor.u32 1.1754944e-38, %v1676_v28  ;;  %v1361_v28 = vmul.f32 %v5375_v25, %v5318_v20  ;;  %2275 = vrot.lane.b32.xlu2 %v8762_v45, %s4180_s1 }
 0x1a1   :  { %8856 = vst [vmem:[#allocation179_spill] sm:$0xff] %v5366_v61  ;;  %v1637_v61 = vsub.f32 1.0, %v1636_v21  ;;  %v1537_v21 = vmul.f32 0.3, %v1155_v34 }
 0x1a2   :  { %8857 = vst [vmem:[#allocation180_spill] sm:$0xff] %v5369_v37  ;;  %v1165_v37 = vadd.f32 %v1164_v26, %v1163_v32  ;;  %v1651_v32 = vmul.f32 %v5358_v31, %v5301_v10  ;;  %v1233_v26 = vadd.f32 %v1155_v34, %v5098_v57  ;;  %v1362_v57 = vsub.f32 1.0, %v1361_v28  ;;  %v8867_v34 = vld [vmem:[#allocation45_spill] sm:$0xff] }
 0x1a3   :  { %8858 = vst [vmem:[#allocation181_spill] sm:$0xff] %v5375_v25  ;;  %2277 = vrot.lane.b32.xlu1 %v8867_v34, %s4180_s1  ;;  %v5430_v28 = vadd.f32 %v5339_v17, %v1348_v33  ;;  %v1401_v33 = vand.u32 2147483648, %v5380_v22 }
 0x1a4   :  { %8859 = vst [vmem:[#allocation182_spill] sm:$0xff] %v5378_v39  ;;  %v5392_v39 = vadd.f32 1.0, %v1231_v55  ;;  %v1166_v44 = vrot.slane %v1165_v37, 2  ;;  %v5408_v55 = vmul.f32 %v5331_v62, %v1637_v61  ;;  %v5420_v24 = vadd.f32 1.0, %v1233_v26 }
 0x1a5   :  { %8860 = vst [vmem:[#allocation183_spill] sm:$0xff] %v5380_v22  ;;  %v1553_v61 = vadd.f32 %v1537_v21, %v5128_v0  ;;  %v1652_v63 = vsub.f32 1.0, %v1651_v32  ;;  %v1681_v26 = vmul.f32 %v5414_v14, %v5350_v49  ;;  %v1691_v0 = vand.u32 2147483648, %v5350_v49  ;;  %v5449_v49 = vpop.permute.xlu2 %2133  ;;  %v8879_v21 = vld [vmem:[#allocation40_spill] sm:$0xff] }
 0x1a6   :  { %8861 = vst [vmem:[#allocation184_spill] sm:$0xff] %v5392_v39  ;;  %3841 = vrcp.f32 %v5392_v39  ;;  %v1167_v27 = vadd.f32 %v1166_v44, %v1165_v37  ;;  %v5438_v37 = vmul.f32 %v5352_v18, %v1667_v23  ;;  %v5441_v32 = vadd.f32 %v5344_v42, %v1333_v59  ;;  %v8875_v44 = vld [vmem:[#allocation41_spill] sm:$0xff] }
 0x1a7   :  { %8862 = vst [vmem:[#allocation185_spill] sm:$0xff] %v5397_v29  ;;  %3843 = vrcp.f32 %v5402_v51  ;;  %v5432_v29 = vor.u32 1.1754944e-38, %v1661_v8  ;;  %v1363_v36 = vmul.f32 %v5375_v25, %v1362_v57  ;;  %2279 = vrot.lane.b32.xlu0 %v8875_v44, %s4180_s1  ;;  %v5454_v59 = vmul.f32 %v5358_v31, %v1652_v63 }
 0x1a8   :  { %8863 = vst [vmem:[#allocation186_spill] sm:$0xff] %v5402_v51  ;;  %3845 = vrcp.f32 %v5420_v24  ;;  %v1168_v8 = vrot.slane %v1167_v27, 1  ;;  %v1391_v57 = vmul.f32 %v5427_v11, %v5380_v22  ;;  %2281 = vrot.lane.b32.xlu2 %v8879_v21, %s4180_s1  ;;  %v5463_v18 = vor.u32 1.1754944e-38, %v1691_v0 }
 0x1a9   :  { %8864 = vst [vmem:[#allocation187_spill] sm:$0xff] %v5408_v55  ;;  %v1371_v55 = vand.u32 2147483648, %v5318_v20  ;;  %3847 = vrcp.f32 %v5425_v12  ;;  %v1682_v20 = vsub.f32 1.0, %v1681_v26  ;;  %v5471_v63 = vadd.f32 %v5375_v25, %v1363_v36 }
 0x1aa   :  { %8865 = vst [vmem:[#allocation188_spill] sm:$0xff] %v5411_v48  ;;  %v1171_v62 = vrot.slane %v5337_v50, 4  ;;  %v5476_v26 = vor.u32 1.1754944e-38, %v1401_v33  ;;  %v1721_v0 = vand.u32 2147483648, %v5402_v51 }
 0x1ab   :  { %8866 = vst [vmem:[#allocation189_spill] sm:$0xff] %v5414_v14 }
 0x1ac   :  { %8868 = vst [vmem:[#allocation45_spill] sm:$0xff] %v5420_v24  ;;  %v5451_v23 = vpop.eup %3841  ;;  %v1172_v33 = vadd.f32 %v1171_v62, %v5337_v50  ;;  %v1706_v50 = vand.u32 2147483648, %v5425_v12 }
 0x1ad   :  { %8869 = vst [vmem:[#allocation190_spill] sm:$0xff] %v5425_v12  ;;  %v5468_v17 = vpop.eup %3843 }
 0x1ae   :  { %8870 = vst [vmem:[#allocation191_spill] sm:$0xff] %v5427_v11  ;;  %v5483_v22 = vpop.eup %3845 }
 0x1af   :  { %8871 = vst [vmem:[#allocation192_spill] sm:$0xff] %v5430_v28  ;;  %v1160_v28 = vadd.f32 %v1159_v7, %v1158_v13  ;;  %v5466_v7 = vadd.f32 1.0, %v1553_v61  ;;  %v1376_v61 = vmul.f32 %v5451_v23, %v5392_v39  ;;  %v1386_v13 = vand.u32 2147483648, %v5392_v39  ;;  %v5490_v25 = vpop.eup %3847  ;;  %v8897_v39 = vld [vmem:[#allocation62_spill] sm:$0xff] }
 0x1b0   :  { %8872 = vst [vmem:[#allocation193_spill] sm:$0xff] %v5432_v29  ;;  %v8884_v29 = vld [vmem:[#allocation54_spill] sm:$0xff] }
 0x1b1   :  { %8873 = vst [vmem:[#allocation194_spill] sm:$0xff] %v5438_v37  ;;  %v5456_v37 = vor.u32 1.1754944e-38, %v1371_v55  ;;  %v1169_v55 = vadd.f32 %v1168_v8, %v1167_v27  ;;  %2283 = vrot.lane.b32.xlu1 %v8884_v29, %s4180_s1  ;;  %3849 = vrcp.f32 %v5466_v7 }
 0x1b2   :  { %8874 = vst [vmem:[#allocation195_spill] sm:$0xff] %v5441_v32 }
 0x1b3   :  { %8876 = vst [vmem:[#allocation41_spill] sm:$0xff] %v5451_v23  ;;  %v1235_v36 = vadd.f32 %v1169_v55, %v5113_v58  ;;  %v1539_v27 = vmul.f32 0.3, %v1169_v55  ;;  %v8889_v55 = vld [vmem:[#allocation51_spill] sm:$0xff] }
 0x1b4   :  { %8877 = vst [vmem:[#allocation196_spill] sm:$0xff] %v5454_v59  ;;  %2285 = vrot.lane.b32.xlu0 %v8889_v55, %s4180_s1  ;;  %v1377_v59 = vsub.f32 1.0, %v1376_v61 }
 0x1b5   :  { %8878 = vst [vmem:[#allocation197_spill] sm:$0xff] %v5456_v37  ;;  %v1161_v37 = vrot.slane %v1160_v28, 1  ;;  %v5492_v48 = vadd.f32 1.0, %v1235_v36  ;;  %v5510_v36 = vor.u32 1.1754944e-38, %v1386_v13 }
 0x1b6   :  { %8880 = vst [vmem:[#allocation40_spill] sm:$0xff] %v5463_v18  ;;  %v1392_v18 = vsub.f32 1.0, %v1391_v57  ;;  %v1555_v57 = vadd.f32 %v1539_v27, %v5148_v3  ;;  %v1406_v3 = vmul.f32 %v5483_v22, %v5420_v24 }
 0x1b7   :  { %8881 = vst [vmem:[#allocation198_spill] sm:$0xff] %v5466_v7  ;;  %v1162_v8 = vadd.f32 %v1161_v37, %v1160_v28  ;;  %v1074_v37 = vpop.xlane.xlu0 %1073  ;;  %3851 = vrcp.f32 %v5492_v48  ;;  %v5524_v13 = vpop.eup %3849 }
 0x1b8   :  { %8882 = vst [vmem:[#allocation199_spill] sm:$0xff] %v5468_v17  ;;  %v5514_v61 = vadd.f32 1.0, %v1555_v57  ;;  %v1416_v57 = vand.u32 2147483648, %v5420_v24 }
 0x1b9   :  { %8883 = vst [vmem:[#allocation200_spill] sm:$0xff] %v5471_v63  ;;  %v1711_v63 = vmul.f32 %v5468_v17, %v5402_v51  ;;  %v1234_v58 = vadd.f32 %v1162_v8, %v5105_v9  ;;  %v1538_v28 = vmul.f32 0.3, %v1162_v8  ;;  %v5499_v51 = vmul.f32 %v5414_v14, %v1682_v20  ;;  %v8892_v9 = vld [vmem:[#allocation50_spill] sm:$0xff]  ;;  %2289 = vrot.lane.b32.xlu1 %v8897_v39, %s4180_s1 }
 0x1ba   :  { %8885 = vst [vmem:[#allocation54_spill] sm:$0xff] %v5476_v26  ;;  %v1184_v26 = vadd.f32 %v5386_v52, %v1076_v54  ;;  %v1173_v54 = vrot.slane %v1172_v33, 2  ;;  %v5502_v52 = vor.u32 1.1754944e-38, %v1721_v0  ;;  %2287 = vrot.lane.b32.xlu2 %v8892_v9, %s4180_s1  ;;  %v1696_v20 = vmul.f32 %v5490_v25, %v5425_v12  ;;  %v5518_v0 = vpop.permute.xlu2 %2137 }
 0x1bb   :  { %8886 = vst [vmem:[#allocation201_spill] sm:$0xff] %v5483_v22  ;;  %v5516_v27 = vadd.f32 1.0, %v1234_v58  ;;  %v1393_v8 = vmul.f32 %v5427_v11, %v1392_v18  ;;  %v1712_v62 = vsub.f32 1.0, %v1711_v63  ;;  %v5527_v12 = vor.u32 1.1754944e-38, %v1706_v50 }
 0x1bc   :  { %8887 = vst [vmem:[#allocation202_spill] sm:$0xff] %v5490_v25  ;;  %v1174_v14 = vadd.f32 %v1173_v54, %v1172_v33  ;;  %3853 = vrcp.f32 %v5514_v61  ;;  %v1407_v58 = vsub.f32 1.0, %v1406_v3  ;;  %v1736_v63 = vand.u32 2147483648, %v5466_v7 }
 0x1bd   :  { %8888 = vst [vmem:[#allocation203_spill] sm:$0xff] %v5492_v48  ;;  %3855 = vrcp.f32 %v5516_v27  ;;  %v1697_v33 = vsub.f32 1.0, %v1696_v20  ;;  %v5536_v32 = vpop.eup %3851  ;;  %v5542_v50 = vmul.f32 %v5468_v17, %v1712_v62  ;;  %v1726_v3 = vmul.f32 %v5524_v13, %v5466_v7 }
 0x1be   :  { %8890 = vst [vmem:[#allocation51_spill] sm:$0xff] %v5499_v51  ;;  %v1175_v54 = vrot.slane %v1174_v14, 1  ;;  %v1177_v18 = vadd.f32 %v1074_v37, %v5329_v41  ;;  %v1408_v62 = vmul.f32 %v5483_v22, %v1407_v58  ;;  %v8907_v37 = vld [vmem:[#allocation58_spill] sm:$0xff]  ;;  %v1446_v17 = vand.u32 2147483648, %v5492_v48 }
 0x1bf   :  { %8891 = vst [vmem:[#allocation204_spill] sm:$0xff] %v5502_v52  ;;  %v8896_v52 = vld [vmem:[#allocation134_spill] sm:$0xff]  ;;  %v5547_v24 = vpop.permute.xlu0 %2129  ;;  %v1727_v58 = vsub.f32 1.0, %v1726_v3 }
 0x1c0   :  { %8893 = vst [vmem:[#allocation50_spill] sm:$0xff] %v5510_v36  ;;  %v1554_v51 = vadd.f32 %v1538_v28, %v8896_v52  ;;  %v1378_v36 = vmul.f32 %v5451_v23, %v1377_v59  ;;  %v1185_v52 = vrot.slane %v1184_v26, 4  ;;  %v5539_v59 = vadd.f32 %v5427_v11, %v1393_v8 }
 0x1c1   :  { %8894 = vst [vmem:[#allocation205_spill] sm:$0xff] %v5514_v61  ;;  %v1436_v8 = vmul.f32 %v5536_v32, %v5492_v48  ;;  %v1176_v7 = vadd.f32 %v1175_v54, %v1174_v14  ;;  %v1178_v41 = vrot.slane %v1177_v18, 4  ;;  %v8912_v54 = vld [vmem:[#allocation131_spill] sm:$0xff]  ;;  %v5586_v3 = vadd.f32 %v5483_v22, %v1408_v62 }
 0x1c2   :  { %8895 = vst [vmem:[#allocation206_spill] sm:$0xff] %v5516_v27  ;;  %v5534_v28 = vadd.f32 1.0, %v1554_v51  ;;  %v8904_v51 = vld [vmem:[#allocation61_spill] sm:$0xff]  ;;  %v5552_v20 = vadd.f32 %v5451_v23, %v1378_v36  ;;  %2293 = vrot.lane.b32.xlu2 %v8907_v37, %s4180_s1  ;;  %v5565_v36 = vmul.f32 %v5490_v25, %v1697_v33  ;;  %v8913_v23 = vld [vmem:[#allocation71_spill] sm:$0xff]  ;;  %v5583_v48 = vpop.permute.xlu2 %2143  ;;  %v5592_v10 = vor.u32 1.1754944e-38, %v1446_v17 }
 0x1c3   :  { %8898 = vst [vmem:[#allocation134_spill] sm:$0xff] %v5524_v13  ;;  %2291 = vrot.lane.b32.xlu0 %v8904_v51, %s4180_s1  ;;  %v1437_v14 = vsub.f32 1.0, %v1436_v8  ;;  %2295 = vrot.lane.b32.xlu1 %v8913_v23, %s4180_s1  ;;  %v5598_v42 = vmul.f32 %v5524_v13, %v1727_v58 }
 0x1c4   :  { %8899 = vst [vmem:[#allocation62_spill] sm:$0xff] %v5527_v12  ;;  %v5554_v12 = vor.u32 1.1754944e-38, %v1416_v57  ;;  %3857 = vrcp.f32 %v5534_v28  ;;  %v5567_v57 = vor.u32 1.1754944e-38, %v1736_v63  ;;  %v1751_v31 = vand.u32 2147483648, %v5534_v28 }
 0x1c5   :  { %8900 = vst [vmem:[#allocation207_spill] sm:$0xff] %v5534_v28  ;;  %v1438_v62 = vmul.f32 %v5536_v32, %v1437_v14 }
 0x1c6   :  { %8901 = vst [vmem:[#allocation208_spill] sm:$0xff] %v5536_v32  ;;  %v5619_v13 = vor.u32 1.1754944e-38, %v1751_v31 }
 0x1c7   :  { %8902 = vst [vmem:[#allocation209_spill] sm:$0xff] %v5539_v59  ;;  %v5562_v59 = vpop.eup %3853 }
 0x1c8   :  { %8903 = vst [vmem:[#allocation210_spill] sm:$0xff] %v5542_v50  ;;  %v1186_v50 = vadd.f32 %v1185_v52, %v1184_v26  ;;  %v5571_v11 = vpop.eup %3855  ;;  %v1766_v26 = vand.u32 2147483648, %v5514_v61  ;;  %v1236_v52 = vadd.f32 %v1176_v7, %v8912_v54  ;;  %v1756_v63 = vmul.f32 %v5562_v59, %v5514_v61 }
 0x1c9   :  { %8905 = vst [vmem:[#allocation61_spill] sm:$0xff] %v5552_v20  ;;  %v5575_v20 = vpop.permute.xlu1 %2131  ;;  %v1421_v33 = vmul.f32 %v5571_v11, %v5516_v27  ;;  %v1431_v61 = vand.u32 2147483648, %v5516_v27 }
 0x1ca   :  { %8906 = vst [vmem:[#allocation211_spill] sm:$0xff] %v5554_v12  ;;  %v1540_v12 = vmul.f32 0.3, %v1176_v7  ;;  %v5588_v8 = vadd.f32 1.0, %v1236_v52  ;;  %v1187_v54 = vrot.slane %v1186_v50, 2  ;;  %v5590_v25 = vpop.eup %3857  ;;  %v5602_v52 = vpop.permute.xlu0 %2135  ;;  %v1757_v17 = vsub.f32 1.0, %v1756_v63 }
 0x1cb   :  { %8908 = vst [vmem:[#allocation58_spill] sm:$0xff] %v5562_v59  ;;  %v1833_v63 = vmul.f32 -4.0, %v4299_v40 }
 0x1cc   :  { %8909 = vst [vmem:[#allocation212_spill] sm:$0xff] %v5565_v36  ;;  %v1179_v36 = vadd.f32 %v1178_v41, %v1177_v18  ;;  %v1556_v7 = vadd.f32 %v1540_v12, %v8918_v2  ;;  %3859 = vrcp.f32 %v5588_v8  ;;  %v8920_v18 = vld [vmem:[#allocation69_spill] sm:$0xff]  ;;  %v5606_v41 = vor.u32 1.1754944e-38, %v1766_v26 }
 0x1cd   :  { %8910 = vst [vmem:[#allocation213_spill] sm:$0xff] %v5567_v57  ;;  %v140_v57 = vlaneseq  ;;  %2297 = vrot.lane.b32.xlu0 %v8920_v18, %s4180_s1  ;;  %v1741_v2 = vmul.f32 %v5590_v25, %v5534_v28  ;;  %v1188_v58 = vadd.f32 %v1187_v54, %v1186_v50 }
 0x1ce   :  { %8911 = vst [vmem:[#allocation214_spill] sm:$0xff] %v5571_v11  ;;  %v5613_v12 = vadd.f32 1.0, %v1556_v7  ;;  %v1180_v14 = vrot.slane %v1179_v36, 2  ;;  %v1461_v7 = vand.u32 2147483648, %v5588_v8 }
 0x1cf   :  { %8914 = vst [vmem:[#allocation131_spill] sm:$0xff] %v5586_v3  ;;  %v1422_v3 = vsub.f32 1.0, %v1421_v33  ;;  %v5609_v22 = vshrl.u32 %v140_v57, 7  ;;  %v8923_v33 = vld [vmem:[#allocation68_spill] sm:$0xff]  ;;  %v5621_v26 = vand.u32 127, %v140_v57  ;;  %v1189_v31 = vrot.slane %v1188_v58, 1 }
 0x1d0   :  { %8915 = vst [vmem:[#allocation71_spill] sm:$0xff] %v5588_v8  ;;  %2299 = vrot.lane.b32.xlu2 %v8923_v33, %s4180_s1  ;;  %3861 = vrcp.f32 %v5613_v12  ;;  %v1181_v54 = vadd.f32 %v1180_v14, %v1179_v36  ;;  %v1781_v27 = vand.u32 2147483648, %v5613_v12 }
 0x1d1   :  { %8916 = vst [vmem:[#allocation215_spill] sm:$0xff] %v5590_v25  ;;  %v5630_v50 = vpop.permute.xlu1 %2139  ;;  %vm145_vm0 = vcmp.ne.s32.totalorder %v5609_v22, 0  ;;  %v1190_v36 = vadd.f32 %v1189_v31, %v1188_v58  ;;  %vm1895_vm1 = vcmp.lt.s32.totalorder %v5609_v22, 1  ;;  %vm149_vm2 = vcmp.ne.s32.totalorder %v5621_v26, 0  ;;  %v8934_v58 = vld [vmem:[#allocation76_spill] sm:$0xff] }
 0x1d2   :  { %8917 = vst [vmem:[#allocation216_spill] sm:$0xff] %v5592_v10  ;;  %v5625_v10 = vadd.f32 %v5536_v32, %v1438_v62  ;;  %v5638_v62 = vpop.eup %3859  ;;  %v1182_v14 = vrot.slane %v1181_v54, 1  ;;  %vm2028_vm3 = vcmp.lt.s32.totalorder %v5609_v22, 7  ;;  %vm150_vm5 = vcmp.ne.s32.totalorder %v5621_v26, 127 }
 0x1d3   :  { %8919 = vst [vmem:[#allocation136_spill] sm:$0xff] %v5598_v42  ;;  %v5617_v42 = vor.u32 1.1754944e-38, %v1431_v61  ;;  %v8927_v61 = vld [vmem:[#allocation79_spill] sm:$0xff]  ;;  %v1451_v28 = vmul.f32 %v5638_v62, %v5588_v8  ;;  %v8935_v8 = vld [vmem:[#allocation141_spill] sm:$0xff] }
 0x1d4   :  { %8921 = vst [vmem:[#allocation69_spill] sm:$0xff] %v5606_v41  ;;  %v1423_v41 = vmul.f32 %v5571_v11, %v1422_v3  ;;  %2301 = vrot.lane.b32.xlu1 %v8927_v61, %s4180_s1  ;;  %v5641_v3 = vmul.f32 %v5562_v59, %v1757_v17  ;;  %v8932_v17 = vrot.slane %v4299_v40, 7  ;;  %v1542_v59 = vmul.f32 0.3, %v1190_v36 }
 0x1d5   :  { %8922 = vst [vmem:[#allocation217_spill] sm:$0xff] %v5613_v12  ;;  %2303 = vrot.lane.b32.xlu0 %v8934_v58, %s4180_s1  ;;  %v1452_v31 = vsub.f32 1.0, %v1451_v28 }
 0x1d6   :  { %8924 = vst [vmem:[#allocation68_spill] sm:$0xff] %v5617_v42  ;;  %v5636_v42 = vpop.permute.xlu2 %2149  ;;  %v5649_v57 = vadd.f32 %v5571_v11, %v1423_v41  ;;  %v1238_v41 = vadd.f32 %v1190_v36, %v8935_v8  ;;  %v8940_v36 = vld [vmem:[#allocation145_spill] sm:$0xff]  ;;  %v8941_v11 = vld [vmem:[#allocation135_spill] sm:$0xff]  ;;  %v8943_v8 = vrot.slane %v4293_v30, 7 }
 0x1d7   :  { %8925 = vst [vmem:[#allocation218_spill] sm:$0xff] %v5619_v13  ;;  %v5651_v13 = vor.u32 1.1754944e-38, %v1461_v7  ;;  %v1183_v7 = vadd.f32 %v1182_v14, %v1181_v54  ;;  %v8497_v54 = vrot.slane %v4325_v38, 7  ;;  %v1558_v14 = vadd.f32 %v1542_v59, %v8940_v36 }
 0x1d8   :  { %8926 = vst [vmem:[#allocation219_spill] sm:$0xff] %v5625_v10  ;;  %v1742_v10 = vsub.f32 1.0, %v1741_v2  ;;  %v8933_v2 = vrot.slane %v4329_v60, 7  ;;  %v5675_v43 = vadd.f32 1.0, %v1238_v41  ;;  %v8942_v41 = vld [vmem:[#allocation88_spill] sm:$0xff]  ;;  %v1453_v5 = vmul.f32 %v5638_v62, %v1452_v31 }
 0x1d9   :  { %8928 = vst [vmem:[#allocation220_spill] sm:$0xff] %v5638_v62  ;;  %v1923_v59 = vsel %vm1895_vm1, %v8497_v54, %v8943_v8 }
 0x1da   :  { %8929 = vst [vmem:[#allocation221_spill] sm:$0xff] %v5641_v3  ;;  %v1925_v32 = vsel %vm1895_vm1, %v8933_v2, %v8932_v17  ;;  %v5660_v3 = vpop.permute.xlu0 %2141  ;;  %v8938_v2 = vld [vmem:[#allocation75_spill] sm:$0xff]  ;;  %v1541_v17 = vmul.f32 0.3, %v1183_v7  ;;  %3863 = vrcp.f32 %v5675_v43  ;;  %v1936_v46 = vsel %vm145_vm0, %v1923_v59, 0.0 }
 0x1db   :  { %8930 = vst [vmem:[#allocation222_spill] sm:$0xff] %v5649_v57  ;;  %v5668_v57 = vmul.f32 %v5590_v25, %v1742_v10  ;;  %2305 = vrot.lane.b32.xlu2 %v8938_v2, %s4180_s1  ;;  %v1934_v28 = vsel %vm145_vm0, %v1925_v32, 0.0  ;;  %v5685_v25 = vpop.permute.xlu1 %2145  ;;  %v1835_v32 = vmul.f32 -4.0, %v4293_v30  ;;  %v8498_v2 = vrot.slane %v4318_v4, 1 }
 0x1dc   :  { %8931 = vst [vmem:[#allocation223_spill] sm:$0xff] %v5651_v13  ;;  %v5665_v13 = vpop.eup %3861  ;;  %2307 = vrot.lane.b32.xlu1 %v8942_v41, %s4180_s1  ;;  %v1966_v31 = vadd.f32 %v1934_v28, %v1833_v63  ;;  %v8499_v41 = vrot.slane %v4293_v30, 1  ;;  %v2197_v63 = vsel %vm149_vm2, %v5449_v49, 0.0  ;;  %v8950_v28 = vld [vmem:[#allocation86_spill] sm:$0xff]  ;;  %v1831_v49 = vmul.f32 -4.0, %v4307_v47 }
 0x1dd   :  { %8936 = vst [vmem:[#allocation76_spill] sm:$0xff] %v5665_v13  ;;  %v1771_v10 = vmul.f32 %v5665_v13, %v5613_v12  ;;  %v8946_v12 = vld [vmem:[#allocation143_spill] sm:$0xff]  ;;  %2309 = vrot.lane.b32.xlu0 %v8950_v28, %s4180_s1 }
 0x1de   :  { %8937 = vst [vmem:[#allocation141_spill] sm:$0xff] %v5668_v57  ;;  %v1237_v57 = vadd.f32 %v1183_v7, %v8941_v11  ;;  %v5698_v11 = vpop.permute.xlu2 %2155  ;;  %v5700_v7 = vor.u32 1.1754944e-38, %v1781_v27  ;;  %v1557_v35 = vadd.f32 %v1541_v17, %v8946_v12  ;;  %v8948_v27 = vrot.slane %v4325_v38, 1 }
 0x1df   :  { %8939 = vst [vmem:[#allocation224_spill] sm:$0xff] %v5675_v43  ;;  %v1772_v61 = vsub.f32 1.0, %v1771_v10  ;;  %v5726_v10 = vadd.f32 %v5638_v62, %v1453_v5  ;;  %v2055_v59 = vsel %vm2028_vm3, %v8499_v41, %v8498_v2  ;;  %v8952_v5 = vld [vmem:[#allocation84_spill] sm:$0xff]  ;;  %v1997_v2 = vrot.slane %v4329_v60, 1 }
 0x1e0   :  { %8944 = vst [vmem:[#allocation145_spill] sm:$0xff] %v5700_v7  ;;  %v5702_v36 = vadd.f32 1.0, %v1237_v57  ;;  %v5710_v8 = vadd.f32 1.0, %v1557_v35  ;;  %v8949_v57 = vrot.slane %v4299_v40, 1  ;;  %v1968_v35 = vadd.f32 %v1936_v46, %v1835_v32  ;;  %v5741_v54 = vpop.eup %3863 }
 0x1e1   :  { %8951 = vst [vmem:[#allocation86_spill] sm:$0xff] %v5726_v10  ;;  %v5743_v46 = vadd.f32 1.0, %v1558_v14  ;;  %v5748_v41 = vmul.f32 %v5665_v13, %v1772_v61  ;;  %v5755_v62 = vadd.s32 8, %v5609_v22  ;;  %v2199_v61 = vsel %vm149_vm2, %v5518_v0, 0.0 }
 0x1e2   :  { %8945 = vst [vmem:[#allocation135_spill] sm:$0xff] %v5702_v36  ;;  %v2057_v12 = vsel %vm2028_vm3, %v8949_v57, %v8948_v27  ;;  %v5721_v17 = vpop.permute.xlu0 %2147  ;;  %3865 = vrcp.f32 %v5702_v36  ;;  %v1863_v27 = vrot.slane %v4307_v47, 7  ;;  %v8502_v57 = vrot.slane %v8834_v1, 7 }
 0x1e3   :  { %8947 = vst [vmem:[#allocation143_spill] sm:$0xff] %v5710_v8  ;;  %3867 = vrcp.f32 %v5710_v8  ;;  %2311 = vrot.lane.b32.xlu2 %v8952_v5, %s4180_s1  ;;  %v2099_v32 = vadd.f32 %v2057_v12, %v1966_v31  ;;  %v1832_v5 = vmul.f32 -4.0, %v4329_v60  ;;  %v5758_v14 = vpop.permute.xlu1 %2151  ;;  %v2101_v31 = vadd.f32 %v2055_v59, %v1968_v35 }
 0x1e4   :  { %8953 = vst [vmem:[#allocation225_spill] sm:$0xff] %v5741_v54  ;;  %v1927_v10 = vsel %vm1895_vm1, %v8502_v57, %v1863_v27  ;;  %2313 = vrot.lane.b32.xlu1 %v8815_v56, %s4180_s1  ;;  %v8956_v57 = vrot.slane %v4329_v60, 7  ;;  %v5775_v13 = vmul.f32 %v5741_v54, %v5675_v43  ;;  %v8958_v35 = vrot.slane %v4307_v47, 1 }
 0x1e5   :  { %8954 = vst [vmem:[#allocation226_spill] sm:$0xff] %v5743_v46  ;;  %v1932_v12 = vsel %vm145_vm0, %v1927_v10, 0.0  ;;  %vm8623_vm4 = vcmp.ne.s32.totalorder %v5755_v62, 15  ;;  %3869 = vrcp.f32 %v5743_v46  ;;  %v5785_v60 = vadd.f32 %v2197_v63, %v2099_v32  ;;  %2315 = vrot.lane.b32.xlu0 %v8821_v53, %s4180_s1 }
 0x1e6   :  { %8955 = vst [vmem:[#allocation227_spill] sm:$0xff] %v5748_v41  ;;  %v1926_v7 = vsel %vm1895_vm1, %v1863_v27, %v8956_v57  ;;  %v5771_v41 = vpop.permute.xlu2 %2161  ;;  %v1964_v56 = vadd.f32 %v1932_v12, %v1831_v49  ;;  %v2059_v0 = vsel %vm2028_vm3, %v8958_v35, %v1997_v2  ;;  %v8960_v27 = vrot.slane %v4299_v40, 1 }
 0x1e7   :  { %8957 = vst [vmem:[#allocation228_spill] sm:$0xff] %v5775_v13  ;;  %v1965_v59 = vadd.f32 %v1926_v7, %v1832_v5  ;;  %v2195_v35 = vsel %vm149_vm2, %v5547_v24, 0.0  ;;  %v1838_v7 = vmul.f32 -4.0, %v8759_v15  ;;  %v8517_v43 = vrot.slane %v8759_v15, 7 }
 0x1e8   :  { %v5782_v10 = vpop.eup %3865  ;;  %v2058_v57 = vsel %vm2028_vm3, %v1997_v2, %v8960_v27  ;;  %v5807_v2 = vadd.f32 %v2199_v61, %v2101_v31  ;;  %v2097_v32 = vadd.f32 %v2059_v0, %v1964_v56  ;;  %v1869_v27 = vrot.slane %v8756_v6, 7 }
 0x1e9   :  { %8959 = vst [vmem:[#allocation229_spill] sm:$0xff] %v5782_v10  ;;  %v5791_v49 = vpop.eup %3867  ;;  %v5795_v12 = vmul.f32 %v5782_v10, %v5702_v36  ;;  %v2066_v63 = vsel %vm8623_vm4, %v2058_v57, 0.0  ;;  %v2196_v24 = vsel %vm149_vm2, %v5575_v20, 0.0  ;;  %v2003_v57 = vrot.slane %v8759_v15, 1 }
 0x1ea   :  { %8961 = vst [vmem:[#allocation230_spill] sm:$0xff] %v5791_v49  ;;  %v5803_v5 = vpop.permute.xlu0 %2153  ;;  %v8518_v54 = vrot.slane %v8762_v45, 1  ;;  %v5821_v56 = vmul.f32 %v5791_v49, %v5710_v8  ;;  %v2098_v31 = vadd.f32 %v2066_v63, %v1965_v59  ;;  %v1920_v61 = vsel %vm1895_vm1, %v1869_v27, %v8517_v43 }
 0x1eb   :  { %8962 = vst [vmem:[#allocation231_spill] sm:$0xff] %v5795_v12  ;;  %2317 = vrot.lane.b32.xlu2 %v8824_v16, %s4180_s1  ;;  %v1834_v0 = vmul.f32 -4.0, %v4325_v38  ;;  %v1971_v46 = vadd.f32 %v1920_v61, %v1838_v7  ;;  %v8965_v10 = vrot.slane %v4325_v38, 7  ;;  %v8966_v8 = vrot.slane %v4299_v40, 7  ;;  %v5839_v63 = vpop.permute.xlu1 %2157  ;;  %v5843_v43 = vpop.eup %3869 }
 0x1ec   :  { %8963 = vst [vmem:[#allocation232_spill] sm:$0xff] %v5807_v2  ;;  %v2052_v13 = vsel %vm2028_vm3, %v2003_v57, %v8518_v54  ;;  %2319 = vrot.lane.b32.xlu1 %v8830_v19, %s4180_s1  ;;  %v5845_v7 = vadd.f32 %v2195_v35, %v2097_v32  ;;  %v8968_v54 = vrot.slane %v4293_v30, 1  ;;  %v8969_v40 = vrot.slane %v4325_v38, 1 }
 0x1ed   :  { %8964 = vst [vmem:[#allocation233_spill] sm:$0xff] %v5821_v56  ;;  %v1924_v59 = vsel %vm1895_vm1, %v8966_v8, %v8965_v10  ;;  %v2072_v61 = vsel %vm8623_vm4, %v2052_v13, 0.0  ;;  %v2202_v49 = vsel %vm149_vm2, %v5583_v48, 0.0  ;;  %v1836_v32 = vmul.f32 -4.0, %v4318_v4  ;;  %2321 = vrot.lane.b32.xlu0 %v8834_v1, %s4180_s1 }
 0x1ee   :  { %8967 = vst [vmem:[#allocation234_spill] sm:$0xff] %v5843_v43  ;;  %v1967_v20 = vadd.f32 %v1924_v59, %v1834_v0  ;;  %v2056_v8 = vsel %vm2028_vm3, %v8969_v40, %v8968_v54  ;;  %v5855_v10 = vpop.permute.xlu2 %2167  ;;  %v1868_v13 = vrot.slane %v4318_v4, 7  ;;  %v5864_v0 = vadd.f32 %v2196_v24, %v2098_v31 }
 0x1ef   :  { %v2068_v35 = vsel %vm8623_vm4, %v2056_v8, 0.0  ;;  %v2104_v59 = vadd.f32 %v2072_v61, %v1971_v46  ;;  %v2198_v38 = vsel %vm149_vm2, %v5602_v52, 0.0  ;;  %v2002_v54 = vrot.slane %v8756_v6, 1 }
 0x1f0   :  { %8970 = vst [vmem:[#allocation235_spill] sm:$0xff] %v5864_v0  ;;  %v8971_v40 = vrot.slane %v4293_v30, 7  ;;  %v1841_v8 = vmul.f32 -4.0, %v8875_v44  ;;  %v1872_v43 = vrot.slane %v8867_v34, 7  ;;  %v8525_v56 = vrot.slane %v8875_v44, 7 }
 0x1f1   :  { %v2100_v46 = vadd.f32 %v2068_v35, %v1967_v20  ;;  %v8972_v31 = vrot.slane %v4318_v4, 1  ;;  %v2200_v61 = vsel %vm149_vm2, %v5630_v50, 0.0  ;;  %v2006_v20 = vrot.slane %v8875_v44, 1 }
 0x1f2   :  { %v1922_v48 = vsel %vm1895_vm1, %v8971_v40, %v1868_v13  ;;  %v5877_v24 = vpop.permute.xlu0 %2159  ;;  %v1917_v12 = vsel %vm1895_vm1, %v1872_v43, %v8525_v56  ;;  %v2007_v35 = vrot.slane %v8879_v21, 1  ;;  %v1921_v50 = vsel %vm1895_vm1, %v1868_v13, %v1869_v27 }
 0x1f3   :  { %v1969_v52 = vadd.f32 %v1922_v48, %v1836_v32  ;;  %v2054_v30 = vsel %vm2028_vm3, %v8972_v31, %v2002_v54  ;;  %v1942_v32 = vsel %vm145_vm0, %v1917_v12, 0.0  ;;  %v1837_v48 = vmul.f32 -4.0, %v8756_v6  ;;  %v5907_v2 = vpop.permute.xlu1 %2163 }
 0x1f4   :  { %v2070_v40 = vsel %vm8623_vm4, %v2054_v30, 0.0  ;;  %v5901_v31 = vadd.f32 %v2202_v49, %v2104_v59  ;;  %v1974_v30 = vadd.f32 %v1942_v32, %v1841_v8  ;;  %v2049_v36 = vsel %vm2028_vm3, %v2006_v20, %v2007_v35 }
 0x1f5   :  { %v2102_v4 = vadd.f32 %v2070_v40, %v1969_v52  ;;  %v1938_v56 = vsel %vm145_vm0, %v1921_v50, 0.0  ;;  %v5909_v52 = vadd.f32 %v2198_v38, %v2100_v46  ;;  %v2205_v6 = vsel %vm149_vm2, %v5636_v42, 0.0 }
 0x1f6   :  { %8973 = vst [vmem:[#allocation236_spill] sm:$0xff] %v5901_v31  ;;  %v2053_v49 = vsel %vm2028_vm3, %v2002_v54, %v2003_v57  ;;  %v5918_v12 = vpop.permute.xlu2 %2173  ;;  %v1970_v27 = vadd.f32 %v1938_v56, %v1837_v48  ;;  %v1839_v13 = vmul.f32 -4.0, %v8762_v45  ;;  %v1871_v59 = vrot.slane %v8762_v45, 7 }
 0x1f7   :  { %8974 = vst [vmem:[#allocation237_spill] sm:$0xff] %v5909_v52  ;;  %v5911_v40 = vadd.f32 %v2200_v61, %v2102_v4  ;;  %v2005_v8 = vrot.slane %v8867_v34, 1  ;;  %v2107_v38 = vadd.f32 %v2049_v36, %v1974_v30  ;;  %v1844_v46 = vmul.f32 -4.0, %v8889_v55 }
 0x1f8   :  { %v1875_v61 = vrot.slane %v8884_v29, 7  ;;  %v8526_v4 = vrot.slane %v8889_v55, 7  ;;  %v2201_v42 = vsel %vm149_vm2, %v5660_v3, 0.0  ;;  %v8975_v57 = vrot.slane %v8759_v15, 7 }
 0x1f9   :  { %v8976_v54 = vrot.slane %v8762_v45, 1  ;;  %v2203_v32 = vsel %vm149_vm2, %v5685_v25, 0.0  ;;  %v2009_v3 = vrot.slane %v8889_v55, 1  ;;  %v2010_v45 = vrot.slane %v8892_v9, 1 }
 0x1fa   :  { %v1919_v56 = vsel %vm1895_vm1, %v8975_v57, %v1871_v59  ;;  %v5940_v48 = vpop.permute.xlu0 %2165  ;;  %v1914_v15 = vsel %vm1895_vm1, %v1875_v61, %v8526_v4  ;;  %v2103_v30 = vadd.f32 %v2053_v49, %v1970_v27  ;;  %v1840_v31 = vmul.f32 -4.0, %v8867_v34 }
 0x1fb   :  { %v2051_v36 = vsel %vm2028_vm3, %v8976_v54, %v2005_v8  ;;  %v1940_v50 = vsel %vm145_vm0, %v1919_v56, 0.0  ;;  %v1977_v54 = vadd.f32 %v1914_v15, %v1844_v46  ;;  %v5951_v25 = vadd.f32 %v2205_v6, %v2107_v38  ;;  %v5965_v6 = vpop.permute.xlu1 %2169 }
 0x1fc   :  { %v1972_v57 = vadd.f32 %v1940_v50, %v1839_v13  ;;  %v2046_v56 = vsel %vm2028_vm3, %v2009_v3, %v2010_v45  ;;  %v1918_v52 = vsel %vm1895_vm1, %v1871_v59, %v1872_v43  ;;  %v2050_v4 = vsel %vm2028_vm3, %v2005_v8, %v2006_v20 }
 0x1fd   :  { %v2078_v49 = vsel %vm8623_vm4, %v2046_v56, 0.0  ;;  %v1973_v27 = vadd.f32 %v1918_v52, %v1840_v31  ;;  %v2074_v34 = vsel %vm8623_vm4, %v2050_v4, 0.0  ;;  %v1842_v38 = vmul.f32 -4.0, %v8879_v21 }
 0x1fe   :  { %v2105_v0 = vadd.f32 %v2051_v36, %v1972_v57  ;;  %v2110_v13 = vadd.f32 %v2078_v49, %v1977_v54  ;;  %v1874_v46 = vrot.slane %v8879_v21, 7  ;;  %v2008_v43 = vrot.slane %v8884_v29, 1  ;;  %v5970_v59 = vpop.permute.xlu2 %2179 }
 0x1ff   :  { %v5972_v20 = vadd.f32 %v2201_v42, %v2103_v30  ;;  %v2208_v31 = vsel %vm149_vm2, %v5698_v11, 0.0  ;;  %v2204_v52 = vsel %vm149_vm2, %v5721_v17, 0.0  ;;  %v2106_v4 = vadd.f32 %v2074_v34, %v1973_v27 }
 0x200   :  { %v5974_v8 = vadd.f32 %v2203_v32, %v2105_v0  ;;  %v8977_v36 = vrot.slane %v8875_v44, 7  ;;  %v2048_v42 = vsel %vm2028_vm3, %v2007_v35, %v2008_v43  ;;  %v1847_v0 = vmul.f32 -4.0, %v8904_v51 }
 0x201   :  { %v2076_v50 = vsel %vm8623_vm4, %v2048_v42, 0.0  ;;  %v1878_v11 = vrot.slane %v8897_v39, 7  ;;  %v1879_v15 = vrot.slane %v8904_v51, 7  ;;  %v5995_v30 = vadd.f32 %v2208_v31, %v2110_v13 }
 0x202   :  { %v1916_v21 = vsel %vm1895_vm1, %v8977_v36, %v1874_v46  ;;  %v5993_v17 = vpop.permute.xlu0 %2171  ;;  %v2206_v44 = vsel %vm149_vm2, %v5758_v14, 0.0  ;;  %v2013_v35 = vrot.slane %v8907_v37, 1  ;;  %v1843_v57 = vmul.f32 -4.0, %v8884_v29 }
 0x203   :  { %v1975_v32 = vadd.f32 %v1916_v21, %v1842_v38  ;;  %v1911_v56 = vsel %vm1895_vm1, %v1878_v11, %v1879_v15  ;;  %v2012_v49 = vrot.slane %v8904_v51, 1  ;;  %v1915_v27 = vsel %vm1895_vm1, %v1874_v46, %v1875_v61  ;;  %v6020_v46 = vpop.permute.xlu1 %2175 }
 0x204   :  { %v6007_v34 = vadd.f32 %v2204_v52, %v2106_v4  ;;  %v1948_v13 = vsel %vm145_vm0, %v1911_v56, 0.0  ;;  %v2211_v14 = vsel %vm149_vm2, %v5771_v41, 0.0  ;;  %v1944_v29 = vsel %vm145_vm0, %v1915_v27, 0.0 }
 0x205   :  { %v2108_v54 = vadd.f32 %v2076_v50, %v1975_v32  ;;  %v1980_v38 = vadd.f32 %v1948_v13, %v1847_v0  ;;  %v2043_v31 = vsel %vm2028_vm3, %v2012_v49, %v2013_v35  ;;  %v1976_v51 = vadd.f32 %v1944_v29, %v1843_v57 }
 0x206   :  { %v2047_v61 = vsel %vm2028_vm3, %v2008_v43, %v2009_v3  ;;  %v1845_v52 = vmul.f32 -4.0, %v8892_v9  ;;  %v1877_v4 = vrot.slane %v8892_v9, 7  ;;  %v2011_v36 = vrot.slane %v8897_v39, 1  ;;  %v6026_v21 = vpop.permute.xlu2 %2185 }
 0x207   :  { %v1850_v41 = vmul.f32 -4.0, %v8920_v18  ;;  %v6028_v42 = vadd.f32 %v2206_v44, %v2108_v54  ;;  %v2207_v0 = vsel %vm149_vm2, %v5803_v5, 0.0  ;;  %v1881_v3 = vrot.slane %v8913_v23, 7 }
 0x208   :  { %v8527_v43 = vrot.slane %v8920_v18, 7  ;;  %v2113_v32 = vadd.f32 %v2043_v31, %v1980_v38  ;;  %v8978_v50 = vrot.slane %v8889_v55, 7  ;;  %v2015_v56 = vrot.slane %v8920_v18, 1 }
 0x209   :  { %v2016_v27 = vrot.slane %v8923_v33, 1  ;;  %v2045_v5 = vsel %vm2028_vm3, %v2010_v45, %v2011_v36  ;;  %v2209_v54 = vsel %vm149_vm2, %v5839_v63, 0.0  ;;  %v2109_v29 = vadd.f32 %v2047_v61, %v1976_v51 }
 0x20a   :  { %v1913_v57 = vsel %vm1895_vm1, %v8978_v50, %v1877_v4  ;;  %v1908_v55 = vsel %vm1895_vm1, %v1881_v3, %v8527_v43  ;;  %v6054_v13 = vpop.permute.xlu0 %2177  ;;  %v1846_v63 = vmul.f32 -4.0, %v8897_v39  ;;  %v1912_v50 = vsel %vm1895_vm1, %v1877_v4, %v1878_v11 }
 0x20b   :  { %v1946_v44 = vsel %vm145_vm0, %v1913_v57, 0.0  ;;  %v1983_v31 = vadd.f32 %v1908_v55, %v1850_v41  ;;  %v2040_v9 = vsel %vm2028_vm3, %v2015_v56, %v2016_v27  ;;  %v2044_v57 = vsel %vm2028_vm3, %v2011_v36, %v2012_v49 }
 0x20c   :  { %v1978_v38 = vadd.f32 %v1946_v44, %v1845_v52  ;;  %v2084_v45 = vsel %vm8623_vm4, %v2040_v9, 0.0  ;;  %v6067_v43 = vadd.f32 %v2211_v14, %v2113_v32  ;;  %v2080_v52 = vsel %vm8623_vm4, %v2044_v57, 0.0  ;;  %v6074_v9 = vpop.permute.xlu1 %2181 }
 0x20d   :  { %v2116_v61 = vadd.f32 %v2084_v45, %v1983_v31  ;;  %v1979_v41 = vadd.f32 %v1912_v50, %v1846_v63  ;;  %v1848_v44 = vmul.f32 -4.0, %v8907_v37  ;;  %v1880_v55 = vrot.slane %v8907_v37, 7 }
 0x20e   :  { %8979 = vst [vmem:[#allocation238_spill] sm:$0xff] %v6067_v43  ;;  %v2111_v51 = vadd.f32 %v2045_v5, %v1978_v38  ;;  %v2014_v39 = vrot.slane %v8913_v23, 1  ;;  %v6076_v11 = vadd.f32 %v2207_v0, %v2109_v29  ;;  %v2214_v49 = vsel %vm149_vm2, %v5855_v10, 0.0  ;;  %v6086_v36 = vpop.permute.xlu2 %2191  ;;  %v8980_v10 = vld [vmem:[#allocation79_spill] sm:$0xff] }
 0x20f   :  { %v2210_v14 = vsel %vm149_vm2, %v5877_v24, 0.0  ;;  %v2112_v32 = vadd.f32 %v2080_v52, %v1979_v41  ;;  %v1910_v37 = vsel %vm1895_vm1, %v1879_v15, %v1880_v55  ;;  %v1853_v5 = vmul.f32 -4.0, %v8934_v58  ;;  %v8982_v15 = vld [vmem:[#allocation75_spill] sm:$0xff] }
 0x210   :  { %v6078_v4 = vadd.f32 %v2209_v54, %v2111_v51  ;;  %v2042_v0 = vsel %vm2028_vm3, %v2013_v35, %v2014_v39  ;;  %v1981_v54 = vadd.f32 %v1910_v37, %v1848_v44  ;;  %v1884_v38 = vrot.slane %v8980_v10, 7 }
 0x211   :  { %v2082_v29 = vsel %vm8623_vm4, %v2042_v0, 0.0  ;;  %v1885_v31 = vrot.slane %v8934_v58, 7  ;;  %v6097_v24 = vadd.f32 %v2214_v49, %v2116_v61  ;;  %v2212_v45 = vsel %vm149_vm2, %v5907_v2, 0.0 }
 0x212   :  { %v8528_v63 = vrot.slane %v8982_v15, 1  ;;  %v1849_v35 = vmul.f32 -4.0, %v8913_v23  ;;  %v6104_v50 = vpop.permute.xlu0 %2183  ;;  %v2114_v57 = vadd.f32 %v2082_v29, %v1981_v54  ;;  %v2018_v52 = vrot.slane %v8934_v58, 1  ;;  %v8984_v29 = vld [vmem:[#allocation88_spill] sm:$0xff] }
 0x213   :  { %8981 = vst [vmem:[#allocation79_spill] sm:$0xff] %v6097_v24  ;;  %v1905_v51 = vsel %vm1895_vm1, %v1884_v38, %v1885_v31  ;;  %v1909_v61 = vsel %vm1895_vm1, %v1880_v55, %v1881_v3  ;;  %v6111_v41 = vadd.f32 %v2210_v14, %v2112_v32  ;;  %v2217_v23 = vsel %vm149_vm2, %v5918_v12, 0.0 }
 0x214   :  { %v1954_v2 = vsel %vm145_vm0, %v1905_v51, 0.0  ;;  %v1950_v44 = vsel %vm145_vm0, %v1909_v61, 0.0  ;;  %v2037_v58 = vsel %vm2028_vm3, %v2018_v52, %v8528_v63  ;;  %v2041_v3 = vsel %vm2028_vm3, %v2014_v39, %v2015_v56  ;;  %v6130_v0 = vpop.permute.xlu1 %2187 }
 0x215   :  { %8983 = vst [vmem:[#allocation75_spill] sm:$0xff] %v6111_v41  ;;  %v1986_v49 = vadd.f32 %v1954_v2, %v1853_v5  ;;  %v1982_v37 = vadd.f32 %v1950_v44, %v1849_v35  ;;  %v1851_v55 = vmul.f32 -4.0, %v8923_v33  ;;  %v1883_v14 = vrot.slane %v8923_v33, 7 }
 0x216   :  { %v2017_v32 = vrot.slane %v8980_v10, 1  ;;  %v1856_v12 = vmul.f32 -4.0, %v8950_v28  ;;  %v6132_v5 = vadd.f32 %v2212_v45, %v2114_v57  ;;  %v2213_v54 = vsel %vm149_vm2, %v5940_v48, 0.0  ;;  %v6139_v39 = vpop.permute.xlu2 %2263  ;;  %v8986_v45 = vld [vmem:[#allocation84_spill] sm:$0xff] }
 0x217   :  { %v1887_v35 = vrot.slane %v8984_v29, 7  ;;  %v8529_v56 = vrot.slane %v8950_v28, 7  ;;  %v2119_v51 = vadd.f32 %v2037_v58, %v1986_v49  ;;  %v8985_v61 = vrot.slane %v8920_v18, 7 }
 0x218   :  { %v2021_v44 = vrot.slane %v8950_v28, 1  ;;  %v2039_v48 = vsel %vm2028_vm3, %v2016_v27, %v2017_v32  ;;  %v2215_v49 = vsel %vm149_vm2, %v5965_v6, 0.0  ;;  %v2115_v58 = vadd.f32 %v2041_v3, %v1982_v37 }
 0x219   :  { %v1907_v2 = vsel %vm1895_vm1, %v8985_v61, %v1883_v14  ;;  %v1902_v18 = vsel %vm1895_vm1, %v1887_v35, %v8529_v56  ;;  %v8987_v24 = vrot.slane %v8986_v45, 1  ;;  %v1852_v6 = vmul.f32 -4.0, %v8980_v10  ;;  %v8990_v56 = vld [vmem:[#allocation16_spill] sm:$0xff] }
 0x21a   :  { %v1952_v63 = vsel %vm145_vm0, %v1907_v2, 0.0  ;;  %v1989_v57 = vadd.f32 %v1902_v18, %v1856_v12  ;;  %v6164_v2 = vpop.permute.xlu0 %2189  ;;  %v1906_v43 = vsel %vm1895_vm1, %v1883_v14, %v1884_v38  ;;  %v2038_v37 = vsel %vm2028_vm3, %v2017_v32, %v2018_v52  ;;  %v8989_v18 = vld [vmem:[#allocation12_spill] sm:$0xff] }
 0x21b   :  { %v1984_v61 = vadd.f32 %v1952_v63, %v1851_v55  ;;  %v2034_v33 = vsel %vm2028_vm3, %v2021_v44, %v8987_v24  ;;  %v6173_v63 = vadd.f32 %v2217_v23, %v2119_v51  ;;  %v2086_v24 = vsel %vm8623_vm4, %v2038_v37, 0.0 }
 0x21c   :  { %v2090_v27 = vsel %vm8623_vm4, %v2034_v33, 0.0  ;;  %v1985_v12 = vadd.f32 %v1906_v43, %v1852_v6  ;;  %v6179_v41 = vpack.i.bf16 %v8990_v56, %v8989_v18  ;;  %v1854_v10 = vmul.f32 -4.0, %v8982_v15 }
 0x21d   :  { %8988 = vst [vmem:[#allocation88_spill] sm:$0xff] %v6173_v63  ;;  %v2117_v3 = vadd.f32 %v2039_v48, %v1984_v61  ;;  %v2122_v55 = vadd.f32 %v2090_v27, %v1989_v57  ;;  %v1886_v33 = vrot.slane %v8982_v15, 7  ;;  %v6183_v38 = vadd.f32 %v2213_v54, %v2115_v58  ;;  %v6199_v57 = vpop.permute.xlu1 %2259  ;;  %v8992_v58 = vld [vmem:[#allocation96_spill] sm:$0xff] }
 0x21e   :  { %v2220_v52 = vsel %vm149_vm2, %v5970_v59, 0.0  ;;  %v2216_v23 = vsel %vm149_vm2, %v5993_v17, 0.0  ;;  %v2020_v43 = vrot.slane %v8984_v29, 1  ;;  %v2118_v32 = vadd.f32 %v2086_v24, %v1985_v12  ;;  %3525 = vrot.lane.b32.xlu1 %v6179_v41, %s4179_s0  ;;  %v6201_v59 = vpop.permute.xlu2 %2269  ;;  %v8994_v12 = vld [vmem:[#allocation11_spill] sm:$0xff] }
 0x21f   :  { %v6192_v14 = vadd.f32 %v2215_v49, %v2117_v3  ;;  %v1904_v54 = vsel %vm1895_vm1, %v1885_v31, %v1886_v33  ;;  %v1859_v51 = vmul.f32 -4.0, %v8821_v53  ;;  %v8991_v17 = vrot.slane %v8982_v15, 1 }
 0x220   :  { %v1987_v48 = vadd.f32 %v1904_v54, %v1854_v10  ;;  %v1890_v61 = vrot.slane %v8992_v58, 7  ;;  %v8530_v27 = vrot.slane %v8821_v53, 7  ;;  %v6209_v6 = vadd.f32 %v2220_v52, %v2122_v55  ;;  %v8995_v10 = vld [vmem:[#allocation14_spill] sm:$0xff] }
 0x221   :  { %v2036_v49 = vsel %vm2028_vm3, %v8991_v17, %v2020_v43  ;;  %v2024_v37 = vrot.slane %v8821_v53, 1  ;;  %v8531_v3 = vrot.slane %v8824_v16, 1  ;;  %v2218_v15 = vsel %vm149_vm2, %v6020_v46, 0.0 }
 0x222   :  { %8993 = vst [vmem:[#allocation84_spill] sm:$0xff] %v6209_v6  ;;  %v2088_v31 = vsel %vm8623_vm4, %v2036_v49, 0.0  ;;  %v1899_v24 = vsel %vm1895_vm1, %v1890_v61, %v8530_v27  ;;  %v6224_v55 = vpack.i.bf16 %v8995_v10, %v8994_v12  ;;  %v1855_v52 = vmul.f32 -4.0, %v8984_v29  ;;  %v6227_v54 = vpop.permute.xlu0 %2261  ;;  %v8998_v10 = vld [vmem:[#allocation39_spill] sm:$0xff] }
 0x223   :  { %v2120_v17 = vadd.f32 %v2088_v31, %v1987_v48  ;;  %v1960_v49 = vsel %vm145_vm0, %v1899_v24, 0.0  ;;  %v2031_v46 = vsel %vm2028_vm3, %v2024_v37, %v8531_v3  ;;  %v1903_v27 = vsel %vm1895_vm1, %v1886_v33, %v1887_v35  ;;  %v8997_v3 = vld [vmem:[#allocation26_spill] sm:$0xff]  ;;  %v8999_v33 = vld [vmem:[#allocation17_spill] sm:$0xff] }
 0x224   :  { %v6237_v56 = vadd.f32 %v2216_v23, %v2118_v32  ;;  %v1992_v12 = vadd.f32 %v1960_v49, %v1859_v51  ;;  %v2223_v29 = vsel %vm149_vm2, %v6026_v21, 0.0  ;;  %3530 = vrot.lane.b32.xlu0 %v6224_v55, %s4179_s0  ;;  %v1956_v48 = vsel %vm145_vm0, %v1903_v27, 0.0  ;;  %v9000_v23 = vld [vmem:[#allocation23_spill] sm:$0xff] }
 0x225   :  { %v1988_v31 = vadd.f32 %v1956_v48, %v1855_v52  ;;  %v2035_v24 = vsel %vm2028_vm3, %v2020_v43, %v2021_v44  ;;  %v6250_v35 = vpack.i.bf16 %v8998_v10, %v8997_v3  ;;  %v6254_v32 = vpack.i.bf16 %v9000_v23, %v8999_v33  ;;  %v6268_v52 = vpop.permute.xlu1 %2265 }
 0x226   :  { %8996 = vst [vmem:[#allocation96_spill] sm:$0xff] %v6237_v56  ;;  %v2125_v51 = vadd.f32 %v2031_v46, %v1992_v12  ;;  %v1857_v21 = vmul.f32 -4.0, %v8986_v45  ;;  %v1889_v49 = vrot.slane %v8986_v45, 7  ;;  %v2023_v18 = vrot.slane %v8992_v58, 1  ;;  %v6270_v46 = vpop.permute.xlu2 %2275  ;;  %v9006_v56 = vld [vmem:[#allocation37_spill] sm:$0xff] }
 0x227   :  { %v6259_v27 = vadd.f32 %v2218_v15, %v2120_v17  ;;  %3540 = vrot.lane.b32.xlu1 %v6250_v35, %s4179_s0  ;;  %3520 = vrot.lane.b32.xlu2 %v6254_v32, %s4179_s0  ;;  %v1862_v44 = vmul.f32 -4.0, %v8834_v1  ;;  %v1893_v43 = vrot.slane %v8830_v19, 7  ;;  %v2027_v12 = vrot.slane %v8834_v1, 1 }
 0x228   :  { %v2121_v48 = vadd.f32 %v2035_v24, %v1988_v31  ;;  %v2219_v15 = vsel %vm149_vm2, %v6054_v13, 0.0  ;;  %v9001_v17 = vrot.slane %v8950_v28, 7  ;;  %v2221_v3 = vsel %vm149_vm2, %v6074_v9, 0.0 }
 0x229   :  { %v9002_v33 = vrot.slane %v8986_v45, 1  ;;  %v9003_v24 = vrot.slane %v8834_v1, 7  ;;  %v9004_v13 = vrot.slane %v4307_v47, 1  ;;  %v6296_v6 = vadd.f32 %v2223_v29, %v2125_v51  ;;  %v9007_v51 = vld [vmem:[#allocation43_spill] sm:$0xff] }
 0x22a   :  { %v1901_v10 = vsel %vm1895_vm1, %v9001_v17, %v1889_v49  ;;  %v1858_v1 = vmul.f32 -4.0, %v8992_v58  ;;  %v2032_v47 = vsel %vm2028_vm3, %v2023_v18, %v2024_v37  ;;  %v2226_v29 = vsel %vm149_vm2, %v6086_v36, 0.0 }
 0x22b   :  { %v1958_v23 = vsel %vm145_vm0, %v1901_v10, 0.0  ;;  %v2033_v31 = vsel %vm2028_vm3, %v9002_v33, %v2023_v18  ;;  %v1896_v28 = vsel %vm1895_vm1, %v1893_v43, %v9003_v24  ;;  %v2060_v17 = vsel %vm2028_vm3, %v2027_v12, %v9004_v13  ;;  %v9005_v10 = vld [vmem:[#allocation38_spill] sm:$0xff]  ;;  %v9010_v18 = vld [vmem:[#allocation27_spill] sm:$0xff] }
 0x22c   :  { %v1990_v9 = vadd.f32 %v1958_v23, %v1857_v21  ;;  %v1995_v63 = vadd.f32 %v1896_v28, %v1862_v44  ;;  %v6300_v45 = vpack.i.bf16 %v9006_v56, %v9005_v10  ;;  %v2096_v33 = vsel %vm8623_vm4, %v2060_v17, 0.0  ;;  %v9008_v21 = vld [vmem:[#allocation56_spill] sm:$0xff]  ;;  %v6320_v44 = vpop.permute.xlu0 %2267 }
 0x22d   :  { %v1900_v24 = vsel %vm1895_vm1, %v1889_v49, %v1890_v61  ;;  %v2092_v23 = vsel %vm8623_vm4, %v2032_v47, 0.0  ;;  %v6318_v58 = vpack.i.bf16 %v9008_v21, %v9007_v51  ;;  %v9009_v49 = vld [vmem:[#allocation31_spill] sm:$0xff]  ;;  %v1892_v36 = vrot.slane %v8824_v16, 7 }
 0x22e   :  { %v2123_v13 = vadd.f32 %v2033_v31, %v1990_v9  ;;  %3545 = vrot.lane.b32.xlu0 %v6300_v45, %s4179_s0  ;;  %v1991_v61 = vadd.f32 %v1900_v24, %v1858_v1  ;;  %v6324_v37 = vpack.i.bf16 %v9010_v18, %v9009_v49  ;;  %v1860_v31 = vmul.f32 -4.0, %v8824_v16  ;;  %v6357_v10 = vpop.permute.xlu2 %2281 }
 0x22f   :  { %v6328_v28 = vadd.f32 %v2219_v15, %v2121_v48  ;;  %v2128_v17 = vadd.f32 %v2096_v33, %v1995_v63  ;;  %v2222_v9 = vsel %vm149_vm2, %v6104_v50, 0.0  ;;  %v2026_v47 = vrot.slane %v8830_v19, 1  ;;  %3555 = vrot.lane.b32.xlu1 %v6318_v58, %s4179_s0  ;;  %v9012_v63 = vld [vmem:[#allocation55_spill] sm:$0xff]  ;;  %v9013_v15 = vld [vmem:[#allocation53_spill] sm:$0xff]  ;;  %v6347_v50 = vpop.permute.xlu1 %2271 }
 0x230   :  { %v2124_v21 = vadd.f32 %v2092_v23, %v1991_v61  ;;  %3535 = vrot.lane.b32.xlu2 %v6324_v37, %s4179_s0  ;;  %v9011_v1 = vrot.slane %v8821_v53, 7  ;;  %v6345_v33 = vpack.i.bf16 %v9013_v15, %v9012_v63  ;;  %v9014_v23 = vrot.slane %v8824_v16, 1 }
 0x231   :  { %v2327_v53 = vsel %vm150_vm5, %v6139_v39, 0.0  ;;  %v6359_v51 = vadd.f32 %v2221_v3, %v2123_v13  ;;  %v1897_v16 = vsel %vm1895_vm1, %v1892_v36, %v1893_v43 }
 0x232   :  { %v1898_v48 = vsel %vm1895_vm1, %v9011_v1, %v1892_v36  ;;  %v2030_v61 = vsel %vm2028_vm3, %v9014_v23, %v2026_v47  ;;  %v1861_v1 = vmul.f32 -4.0, %v8830_v19  ;;  %v2224_v19 = vsel %vm149_vm2, %v6130_v0, 0.0  ;;  %v9019_v0 = vld [vmem:[#allocation44_spill] sm:$0xff] }
 0x233   :  { %v1993_v24 = vadd.f32 %v1898_v48, %v1860_v31  ;;  %v2094_v63 = vsel %vm8623_vm4, %v2030_v61, 0.0  ;;  %v6364_v31 = vadd.f32 %v2327_v53, %v5785_v60  ;;  %v6368_v48 = vadd.f32 %v2226_v29, %v2128_v17  ;;  %v9016_v61 = vld [vmem:[#allocation59_spill] sm:$0xff]  ;;  %v9017_v53 = vld [vmem:[#allocation77_spill] sm:$0xff]  ;;  %v9018_v29 = vld [vmem:[#allocation48_spill] sm:$0xff] }
 0x234   :  { %v1962_v39 = vsel %vm145_vm0, %v1897_v16, 0.0  ;;  %v2029_v60 = vsel %vm2028_vm3, %v2026_v47, %v2027_v12  ;;  %v6380_v15 = vpack.i.bf16 %v9017_v53, %v9016_v61  ;;  %v6382_v43 = vadd.f32 %v2222_v9, %v2124_v21  ;;  %v2274_v16 = vpop.permute.xlu0 %2273 }
 0x235   :  { %9015 = vst [vmem:[#allocation37_spill] sm:$0xff] %v6364_v31  ;;  %v2126_v23 = vadd.f32 %v2094_v63, %v1993_v24  ;;  %v3031_v3 = vand.u32 2147483647, %v6364_v31  ;;  %v1994_v13 = vadd.f32 %v1962_v39, %v1861_v1  ;;  %v6388_v36 = vpack.i.bf16 %v9019_v0, %v9018_v29  ;;  %v9027_v31 = vld [vmem:[#allocation237_spill] sm:$0xff] }
 0x236   :  { %3560 = vrot.lane.b32.xlu0 %v6345_v33, %s4179_s0  ;;  %v2325_v17 = vsel %vm150_vm5, %v6199_v57, 0.0  ;;  %v2330_v12 = vsel %vm150_vm5, %v6201_v59, 0.0  ;;  %v2225_v21 = vsel %vm149_vm2, %v6164_v2, 0.0  ;;  %v2326_v59 = vsel %vm150_vm5, %v6227_v54, 0.0  ;;  %v9022_v2 = vld [vmem:[#allocation73_spill] sm:$0xff]  ;;  %v9025_v54 = vld [vmem:[#allocation66_spill] sm:$0xff] }
 0x237   :  { %v3063_v47 = vsub.f32 0.0, %v3031_v3  ;;  %v6400_v9 = vadd.f32 %v2325_v17, %v5845_v7  ;;  %v6403_v63 = vadd.f32 %v2330_v12, %v5911_v40  ;;  %v6405_v24 = vadd.f32 %v2224_v19, %v2126_v23  ;;  %3570 = vrot.lane.b32.xlu1 %v6380_v15, %s4179_s0  ;;  %v9021_v40 = vld [vmem:[#allocation74_spill] sm:$0xff]  ;;  %v9023_v3 = vld [vmem:[#allocation235_spill] sm:$0xff] }
 0x238   :  { %v2127_v57 = vadd.f32 %v2029_v60, %v1994_v13  ;;  %3550 = vrot.lane.b32.xlu2 %v6388_v36, %s4179_s0  ;;  %v6418_v23 = vpack.i.bf16 %v9022_v2, %v9021_v40  ;;  %v6422_v13 = vadd.f32 %v2326_v59, %v9023_v3  ;;  %v9026_v60 = vld [vmem:[#allocation63_spill] sm:$0xff]  ;;  %v2328_v12 = vsel %vm150_vm5, %v6268_v52, 0.0  ;;  %v6445_v52 = vpop.permute.xlu2 %2287 }
 0x239   :  { %9020 = vst [vmem:[#allocation31_spill] sm:$0xff] %v6400_v9  ;;  %v3097_v39 = vmul.f32 1.442695, %v3063_v47  ;;  %v3029_v7 = vand.u32 2147483647, %v6400_v9  ;;  %v6426_v17 = vpack.i.bf16 %v9026_v60, %v9025_v54  ;;  %v6431_v47 = vpop.permute.xlu1 %2277  ;;  %v6434_v40 = vadd.f32 %v2328_v12, %v9027_v31 }
 0x23a   :  { %v3034_v19 = vand.u32 2147483647, %v6403_v63  ;;  %9024 = vst [vmem:[#allocation27_spill] sm:$0xff] %v6422_v13  ;;  %v2333_v59 = vsel %vm150_vm5, %v6270_v46, 0.0  ;;  %v6439_v3 = vadd.f32 %v2225_v21, %v2127_v57  ;;  %v3030_v2 = vand.u32 2147483647, %v6422_v13 }
 0x23b   :  { %3871 = vpow2.f32 %v3097_v39  ;;  %v3061_v1 = vsub.f32 0.0, %v3029_v7  ;;  %9028 = vst [vmem:[#allocation235_spill] sm:$0xff] %v6434_v40  ;;  %v6443_v61 = vadd.f32 %v2333_v59, %v5974_v8  ;;  %v3032_v12 = vand.u32 2147483647, %v6434_v40 }
 0x23c   :  { %v3066_v53 = vsub.f32 0.0, %v3034_v19  ;;  %v3062_v21 = vsub.f32 0.0, %v3030_v2 }
 0x23d   :  { %9029 = vst [vmem:[#allocation237_spill] sm:$0xff] %v6443_v61  ;;  %v3093_v7 = vmul.f32 1.442695, %v3061_v1  ;;  %v3037_v57 = vand.u32 2147483647, %v6443_v61  ;;  %v3064_v19 = vsub.f32 0.0, %v3032_v12 }
 0x23e   :  { %v3103_v60 = vmul.f32 1.442695, %v3066_v53  ;;  %3575 = vrot.lane.b32.xlu0 %v6418_v23, %s4179_s0  ;;  %v2329_v1 = vsel %vm150_vm5, %v6320_v44, 0.0  ;;  %v3095_v59 = vmul.f32 1.442695, %v3062_v21  ;;  %v9030_v53 = vld [vmem:[#allocation232_spill] sm:$0xff] }
 0x23f   :  { %3873 = vpow2.f32 %v3093_v7  ;;  %v3069_v39 = vsub.f32 0.0, %v3037_v57  ;;  %v6459_v31 = vadd.f32 %v2329_v1, %v9030_v53  ;;  %3585 = vrot.lane.b32.xlu1 %v6254_v32, %s4180_s1  ;;  %v3099_v2 = vmul.f32 1.442695, %v3064_v19  ;;  %v2280_v57 = vpop.permute.xlu0 %2279  ;;  %v9033_v53 = vld [vmem:[#allocation85_spill] sm:$0xff] }
 0x240   :  { %3875 = vpow2.f32 %v3103_v60  ;;  %3565 = vrot.lane.b32.xlu2 %v6426_v17, %s4179_s0  ;;  %v2331_v7 = vsel %vm150_vm5, %v6347_v50, 0.0  ;;  %v2336_v44 = vsel %vm150_vm5, %v6357_v10, 0.0  ;;  %v9032_v50 = vld [vmem:[#allocation87_spill] sm:$0xff]  ;;  %v2332_v10 = vsel %vm150_vm5, %v2274_v16, 0.0  ;;  %v6495_v16 = vpop.permute.xlu2 %2293 }
 0x241   :  { %v3872_v9 = vpop.eup %3871  ;;  %3877 = vpow2.f32 %v3095_v59  ;;  %v3109_v21 = vmul.f32 1.442695, %v3069_v39  ;;  %v3033_v32 = vand.u32 2147483647, %v6459_v31  ;;  %v6474_v1 = vadd.f32 %v2331_v7, %v5972_v20 }
 0x242   :  { %v3159_v60 = vadd.f32 1.0, %v3872_v9  ;;  %3879 = vpow2.f32 %v3099_v2  ;;  %v6477_v19 = vadd.f32 %v2336_v44, %v6028_v42  ;;  %v6481_v8 = vpack.i.bf16 %v9033_v53, %v9032_v50  ;;  %v6485_v9 = vpop.permute.xlu1 %2283 }
 0x243   :  { %9031 = vst [vmem:[#allocation232_spill] sm:$0xff] %v6474_v1  ;;  %v3065_v2 = vsub.f32 0.0, %v3033_v32  ;;  %v3035_v20 = vand.u32 2147483647, %v6474_v1 }
 0x244   :  { %3881 = vlog2.f32 %v3159_v60  ;;  %v3040_v44 = vand.u32 2147483647, %v6477_v19  ;;  %v9034_v60 = vld [vmem:[#allocation236_spill] sm:$0xff] }
 0x245   :  { %v3874_v39 = vpop.eup %3873  ;;  %3883 = vpow2.f32 %v3109_v21  ;;  %v6493_v12 = vadd.f32 %v2332_v10, %v9034_v60  ;;  %v3101_v61 = vmul.f32 1.442695, %v3065_v2  ;;  %v3067_v21 = vsub.f32 0.0, %v3035_v20 }
 0x246   :  { %v3876_v7 = vpop.eup %3875  ;;  %v3157_v42 = vadd.f32 1.0, %v3874_v39  ;;  %3590 = vrot.lane.b32.xlu0 %v6179_v41, %s4180_s1  ;;  %v3072_v59 = vsub.f32 0.0, %v3040_v44  ;;  %v2334_v2 = vsel %vm150_vm5, %v6431_v47, 0.0 }
 0x247   :  { %9035 = vst [vmem:[#allocation87_spill] sm:$0xff] %v6493_v12  ;;  %v3162_v46 = vadd.f32 1.0, %v3876_v7  ;;  %v3878_v40 = vpop.eup %3877  ;;  %v3036_v39 = vand.u32 2147483647, %v6493_v12  ;;  %3600 = vrot.lane.b32.xlu1 %v6324_v37, %s4180_s1  ;;  %v3105_v10 = vmul.f32 1.442695, %v3067_v21 }
 0x248   :  { %3885 = vlog2.f32 %v3157_v42  ;;  %v3880_v13 = vpop.eup %3879  ;;  %v3158_v41 = vadd.f32 1.0, %v3878_v40  ;;  %3580 = vrot.lane.b32.xlu2 %v6481_v8, %s4179_s0  ;;  %v3115_v40 = vmul.f32 1.442695, %v3072_v59  ;;  %v2339_v37 = vsel %vm150_vm5, %v6445_v52, 0.0 }
 0x249   :  { %3887 = vlog2.f32 %v3162_v46  ;;  %v3160_v7 = vadd.f32 1.0, %v3880_v13  ;;  %v3068_v44 = vsub.f32 0.0, %v3036_v39  ;;  %v6508_v46 = vadd.f32 %v2334_v2, %v6007_v34 }
 0x24a   :  { %v3882_v20 = vpop.eup %3881  ;;  %3889 = vpow2.f32 %v3101_v61  ;;  %v6514_v47 = vadd.f32 %v2339_v37, %v6078_v4  ;;  %v2286_v61 = vpop.permute.xlu0 %2285  ;;  %v2335_v52 = vsel %vm150_vm5, %v2280_v57, 0.0 }
 0x24b   :  { %v3884_v60 = vpop.eup %3883  ;;  %3891 = vlog2.f32 %v3158_v41  ;;  %9036 = vst [vmem:[#allocation236_spill] sm:$0xff] %v6508_v46  ;;  %v3107_v32 = vmul.f32 1.442695, %v3068_v44  ;;  %v3038_v39 = vand.u32 2147483647, %v6508_v46  ;;  %v2290_v4 = vpop.permute.xlu1 %2289  ;;  %v6527_v44 = vadd.f32 %v2335_v52, %v5951_v25 }
 0x24c   :  { %3893 = vlog2.f32 %v3160_v7  ;;  %v3165_v21 = vadd.f32 1.0, %v3884_v60  ;;  %9037 = vst [vmem:[#allocation239_spill] sm:$0xff] %v6514_v47  ;;  %v6518_v41 = vmul.f32 0.6931472, %v3882_v20  ;;  %v3043_v34 = vand.u32 2147483647, %v6514_v47 }
 0x24d   :  { %3895 = vpow2.f32 %v3105_v10  ;;  %v3070_v7 = vsub.f32 0.0, %v3038_v39  ;;  %v3039_v25 = vand.u32 2147483647, %v6527_v44  ;;  %v9048_v47 = vld [vmem:[#allocation95_spill] sm:$0xff] }
 0x24e   :  { %v3886_v59 = vpop.eup %3885  ;;  %9038 = vst [vmem:[#allocation240_spill] sm:$0xff] %v6518_v41  ;;  %3897 = vlog2.f32 %v3165_v21  ;;  %3605 = vrot.lane.b32.xlu0 %v6250_v35, %s4180_s1  ;;  %v3075_v37 = vsub.f32 0.0, %v3043_v34  ;;  %v2300_v35 = vpop.permute.xlu2 %2299 }
 0x24f   :  { %v3888_v2 = vpop.eup %3887  ;;  %3899 = vpow2.f32 %v3115_v40  ;;  %v6529_v60 = vmul.f32 0.6931472, %v3886_v59  ;;  %3615 = vrot.lane.b32.xlu1 %v6388_v36, %s4180_s1  ;;  %v3111_v57 = vmul.f32 1.442695, %v3070_v7 }
 0x250   :  { %v3890_v20 = vpop.eup %3889  ;;  %3901 = vpow2.f32 %v3107_v32  ;;  %3595 = vrot.lane.b32.xlu2 %v6224_v55, %s4180_s1  ;;  %v6537_v52 = vmul.f32 0.6931472, %v3888_v2  ;;  %v3121_v59 = vmul.f32 1.442695, %v3075_v37  ;;  %v2337_v32 = vsel %vm150_vm5, %v6485_v9, 0.0 }
 0x251   :  { %v3892_v21 = vpop.eup %3891  ;;  %v3161_v13 = vadd.f32 1.0, %v3890_v20  ;;  %v3071_v20 = vsub.f32 0.0, %v3039_v25  ;;  %v6544_v55 = vadd.f32 %v2337_v32, %v6076_v11  ;;  %v2342_v2 = vsel %vm150_vm5, %v6495_v16, 0.0 }
 0x252   :  { %v3894_v39 = vpop.eup %3893  ;;  %v6546_v40 = vmul.f32 0.6931472, %v3892_v21  ;;  %v6557_v21 = vadd.f32 %v2342_v2, %v6132_v5  ;;  %v2338_v16 = vsel %vm150_vm5, %v2286_v61, 0.0  ;;  %v2340_v61 = vsel %vm150_vm5, %v2290_v4, 0.0 }
 0x253   :  { %v3896_v34 = vpop.eup %3895  ;;  %3903 = vlog2.f32 %v3161_v13  ;;  %9039 = vst [vmem:[#allocation241_spill] sm:$0xff] %v6544_v55  ;;  %v6551_v42 = vmul.f32 0.6931472, %v3894_v39  ;;  %v3113_v9 = vmul.f32 1.442695, %v3071_v20 }
 0x254   :  { %v3898_v7 = vpop.eup %3897  ;;  %v3163_v10 = vadd.f32 1.0, %v3896_v34  ;;  %3905 = vpow2.f32 %v3111_v57  ;;  %v3041_v11 = vand.u32 2147483647, %v6544_v55  ;;  %9040 = vst [vmem:[#allocation242_spill] sm:$0xff] %v6557_v21  ;;  %v2292_v57 = vpop.permute.xlu0 %2291 }
 0x255   :  { %v3900_v37 = vpop.eup %3899  ;;  %3907 = vpow2.f32 %v3121_v59  ;;  %v6561_v39 = vmul.f32 0.6931472, %v3898_v7  ;;  %v2296_v34 = vpop.permute.xlu1 %2295 }
 0x256   :  { %v3902_v13 = vpop.eup %3901  ;;  %3909 = vlog2.f32 %v3163_v10  ;;  %v3168_v25 = vadd.f32 1.0, %v3900_v37  ;;  %3620 = vrot.lane.b32.xlu0 %v6318_v58, %s4180_s1  ;;  %v3073_v59 = vsub.f32 0.0, %v3041_v11  ;;  %v3046_v10 = vand.u32 2147483647, %v6557_v21 }
 0x257   :  { %v3164_v32 = vadd.f32 1.0, %v3902_v13  ;;  %3911 = vpow2.f32 %v3113_v9  ;;  %9041 = vst [vmem:[#allocation243_spill] sm:$0xff] %v6561_v39  ;;  %3630 = vrot.lane.b32.xlu1 %v6426_v17, %s4180_s1  ;;  %v6570_v58 = vadd.f32 %v2338_v16, %v5995_v30  ;;  %v9043_v9 = vld [vmem:[#allocation75_spill] sm:$0xff]  ;;  %v2345_v30 = vsel %vm150_vm5, %v2300_v35, 0.0 }
 0x258   :  { %3913 = vlog2.f32 %v3168_v25  ;;  %3610 = vrot.lane.b32.xlu2 %v6300_v45, %s4180_s1  ;;  %v3117_v2 = vmul.f32 1.442695, %v3073_v59  ;;  %v3078_v37 = vsub.f32 0.0, %v3046_v10  ;;  %v6575_v13 = vadd.f32 %v2340_v61, %v9043_v9  ;;  %v2306_v25 = vpop.permute.xlu2 %2305 }
 0x259   :  { %v3904_v20 = vpop.eup %3903  ;;  %3915 = vlog2.f32 %v3164_v32  ;;  %9042 = vst [vmem:[#allocation244_spill] sm:$0xff] %v6570_v58  ;;  %v3042_v45 = vand.u32 2147483647, %v6570_v58  ;;  %v6588_v35 = vadd.f32 %v2345_v30, %v6192_v14  ;;  %v2341_v30 = vsel %vm150_vm5, %v2292_v57, 0.0 }
 0x25a   :  { %v3906_v7 = vpop.eup %3905  ;;  %9044 = vst [vmem:[#allocation75_spill] sm:$0xff] %v6575_v13  ;;  %3917 = vpow2.f32 %v3117_v2  ;;  %v3127_v4 = vmul.f32 1.442695, %v3078_v37  ;;  %v6581_v59 = vmul.f32 0.6931472, %v3904_v20 }
 0x25b   :  { %v3908_v11 = vpop.eup %3907  ;;  %v3166_v17 = vadd.f32 1.0, %v3906_v7  ;;  %v3074_v10 = vsub.f32 0.0, %v3042_v45  ;;  %v3044_v61 = vand.u32 2147483647, %v6575_v13  ;;  %9045 = vst [vmem:[#allocation245_spill] sm:$0xff] %v6588_v35 }
 0x25c   :  { %v3910_v16 = vpop.eup %3909  ;;  %v3171_v5 = vadd.f32 1.0, %v3908_v11  ;;  %v2298_v32 = vpop.permute.xlu0 %2297 }
 0x25d   :  { %v3912_v36 = vpop.eup %3911  ;;  %3919 = vlog2.f32 %v3166_v17  ;;  %v3119_v37 = vmul.f32 1.442695, %v3074_v10  ;;  %v3076_v11 = vsub.f32 0.0, %v3044_v61  ;;  %v6591_v17 = vmul.f32 0.6931472, %v3910_v16  ;;  %v9050_v10 = vld [vmem:[#allocation238_spill] sm:$0xff] }
 0x25e   :  { %v3914_v9 = vpop.eup %3913  ;;  %3921 = vlog2.f32 %v3171_v5  ;;  %v3167_v7 = vadd.f32 1.0, %v3912_v36  ;;  %3635 = vrot.lane.b32.xlu0 %v6380_v15, %s4180_s1  ;;  %v3049_v36 = vand.u32 2147483647, %v6588_v35  ;;  %v9047_v5 = vld [vmem:[#allocation83_spill] sm:$0xff]  ;;  %v6609_v61 = vadd.f32 %v2341_v30, %v9050_v10 }
 0x25f   :  { %v3916_v2 = vpop.eup %3915  ;;  %3923 = vpow2.f32 %v3127_v4  ;;  %9046 = vst [vmem:[#allocation246_spill] sm:$0xff] %v6591_v17  ;;  %v6593_v45 = vmul.f32 0.6931472, %v3914_v9  ;;  %v6598_v15 = vpack.i.bf16 %v9048_v47, %v9047_v5  ;;  %3645 = vrot.lane.b32.xlu1 %v6481_v8, %s4180_s1  ;;  %v3123_v14 = vmul.f32 1.442695, %v3076_v11  ;;  %v9054_v30 = vld [vmem:[#allocation91_spill] sm:$0xff] }
 0x260   :  { %v6600_v58 = vmul.f32 0.6931472, %v3916_v2  ;;  %3925 = vpow2.f32 %v3119_v37  ;;  %3625 = vrot.lane.b32.xlu2 %v6345_v33, %s4180_s1  ;;  %v3918_v16 = vpop.eup %3917  ;;  %v3081_v4 = vsub.f32 0.0, %v3049_v36  ;;  %9051 = vst [vmem:[#allocation238_spill] sm:$0xff] %v6609_v61  ;;  %v2343_v9 = vsel %vm150_vm5, %v2296_v34, 0.0  ;;  %v2302_v2 = vpop.permute.xlu1 %2301  ;;  %v9053_v36 = vld [vmem:[#allocation93_spill] sm:$0xff] }
 0x261   :  { %3927 = vlog2.f32 %v3167_v7  ;;  %v3169_v20 = vadd.f32 1.0, %v3918_v16  ;;  %v6614_v8 = vadd.f32 %v2343_v9, %v6183_v38  ;;  %v2348_v33 = vsel %vm150_vm5, %v2306_v25, 0.0  ;;  %v2312_v34 = vpop.permute.xlu2 %2311 }
 0x262   :  { %9049 = vst [vmem:[#allocation247_spill] sm:$0xff] %v6600_v58  ;;  %3929 = vpow2.f32 %v3123_v14  ;;  %v3133_v11 = vmul.f32 1.442695, %v3081_v4  ;;  %v3659_v10 = vpack.i.bf16 %v9054_v30, %v9053_v36  ;;  %v6622_v47 = vadd.f32 %v2348_v33, %v6259_v27 }
 0x263   :  { %v3920_v37 = vpop.eup %3919  ;;  %9052 = vst [vmem:[#allocation248_spill] sm:$0xff] %v6614_v8  ;;  %3931 = vlog2.f32 %v3169_v20  ;;  %v3045_v38 = vand.u32 2147483647, %v6609_v61  ;;  %v3047_v4 = vand.u32 2147483647, %v6614_v8 }
 0x264   :  { %v3922_v57 = vpop.eup %3921  ;;  %9055 = vst [vmem:[#allocation249_spill] sm:$0xff] %v6622_v47  ;;  %v6624_v16 = vmul.f32 0.6931472, %v3920_v37  ;;  %3933 = vpow2.f32 %v3133_v11  ;;  %v3052_v37 = vand.u32 2147483647, %v6622_v47  ;;  %v2344_v11 = vsel %vm150_vm5, %v2298_v32, 0.0 }
 0x265   :  { %v3924_v13 = vpop.eup %3923  ;;  %v6631_v7 = vmul.f32 0.6931472, %v3922_v57  ;;  %v3077_v27 = vsub.f32 0.0, %v3045_v38  ;;  %v9058_v38 = vld [vmem:[#allocation79_spill] sm:$0xff] }
 0x266   :  { %9056 = vst [vmem:[#allocation250_spill] sm:$0xff] %v6624_v16  ;;  %v3174_v14 = vadd.f32 1.0, %v3924_v13  ;;  %3650 = vrot.lane.b32.xlu0 %v6598_v15, %s4179_s0  ;;  %v3926_v9 = vpop.eup %3925  ;;  %v3079_v13 = vsub.f32 0.0, %v3047_v4  ;;  %v3084_v57 = vsub.f32 0.0, %v3052_v37  ;;  %v6641_v25 = vadd.f32 %v2344_v11, %v9058_v38  ;;  %v2304_v4 = vpop.permute.xlu0 %2303  ;;  %v9060_v37 = vld [vmem:[#allocation96_spill] sm:$0xff] }
 0x267   :  { %9057 = vst [vmem:[#allocation251_spill] sm:$0xff] %v6631_v7  ;;  %v3928_v20 = vpop.eup %3927  ;;  %v3170_v30 = vadd.f32 1.0, %v3926_v9  ;;  %v3125_v35 = vmul.f32 1.442695, %v3077_v27  ;;  %3660 = vrot.lane.b32.xlu1 %v3659_v10, %s4179_s0 }
 0x268   :  { %3935 = vlog2.f32 %v3174_v14  ;;  %v3930_v36 = vpop.eup %3929  ;;  %3640 = vrot.lane.b32.xlu2 %v6418_v23, %s4180_s1  ;;  %9059 = vst [vmem:[#allocation79_spill] sm:$0xff] %v6641_v25  ;;  %v3129_v8 = vmul.f32 1.442695, %v3079_v13  ;;  %v2346_v14 = vsel %vm150_vm5, %v2302_v2, 0.0  ;;  %v3139_v27 = vmul.f32 1.442695, %v3084_v57 }
 0x269   :  { %3937 = vlog2.f32 %v3170_v30  ;;  %v3172_v33 = vadd.f32 1.0, %v3930_v36  ;;  %v3932_v9 = vpop.eup %3931  ;;  %v3048_v7 = vand.u32 2147483647, %v6641_v25  ;;  %v6647_v23 = vmul.f32 0.6931472, %v3928_v20  ;;  %v2308_v30 = vpop.permute.xlu1 %2307  ;;  %v9062_v13 = vld [vmem:[#allocation99_spill] sm:$0xff] }
 0x26a   :  { %3939 = vpow2.f32 %v3125_v35  ;;  %v3934_v55 = vpop.eup %3933  ;;  %v6650_v11 = vadd.f32 %v2346_v14, %v9060_v37  ;;  %v2351_v36 = vsel %vm150_vm5, %v2312_v34, 0.0  ;;  %v9063_v35 = vld [vmem:[#allocation97_spill] sm:$0xff]  ;;  %v2347_v34 = vsel %vm150_vm5, %v2304_v4, 0.0  ;;  %v2318_v14 = vpop.permute.xlu2 %2317 }
 0x26b   :  { %3941 = vlog2.f32 %v3172_v33  ;;  %v3080_v2 = vsub.f32 0.0, %v3048_v7  ;;  %v6656_v38 = vpack.i.bf16 %v9063_v35, %v9062_v13  ;;  %v6659_v57 = vadd.f32 %v2351_v36, %v6359_v51 }
 0x26c   :  { %9061 = vst [vmem:[#allocation96_spill] sm:$0xff] %v6650_v11  ;;  %3943 = vpow2.f32 %v3129_v8  ;;  %v3177_v20 = vadd.f32 1.0, %v3934_v55  ;;  %v3050_v33 = vand.u32 2147483647, %v6650_v11  ;;  %v6665_v8 = vmul.f32 0.6931472, %v3932_v9 }
 0x26d   :  { %9064 = vst [vmem:[#allocation252_spill] sm:$0xff] %v6659_v57  ;;  %3945 = vpow2.f32 %v3139_v27  ;;  %v3131_v37 = vmul.f32 1.442695, %v3080_v2  ;;  %v3055_v55 = vand.u32 2147483647, %v6659_v57  ;;  %v9066_v27 = vld [vmem:[#allocation88_spill] sm:$0xff] }
 0x26e   :  { %v3936_v32 = vpop.eup %3935  ;;  %3665 = vrot.lane.b32.xlu0 %v3659_v10, %s4180_s1  ;;  %9065 = vst [vmem:[#allocation253_spill] sm:$0xff] %v6665_v8  ;;  %v3082_v36 = vsub.f32 0.0, %v3050_v33  ;;  %v6671_v47 = vadd.f32 %v2347_v34, %v9066_v27  ;;  %v2349_v10 = vsel %vm150_vm5, %v2308_v30, 0.0  ;;  %v2354_v2 = vsel %vm150_vm5, %v2318_v14, 0.0 }
 0x26f   :  { %v3938_v51 = vpop.eup %3937  ;;  %v6675_v4 = vmul.f32 0.6931472, %v3936_v32  ;;  %3947 = vpow2.f32 %v3131_v37  ;;  %3675 = vrot.lane.b32.xlu1 %v6656_v38, %s4180_s1  ;;  %v6680_v9 = vadd.f32 %v2349_v10, %v6328_v28  ;;  %v3087_v13 = vsub.f32 0.0, %v3055_v55 }
 0x270   :  { %9067 = vst [vmem:[#allocation88_spill] sm:$0xff] %v6671_v47  ;;  %v3940_v39 = vpop.eup %3939  ;;  %3949 = vlog2.f32 %v3177_v20  ;;  %v3135_v27 = vmul.f32 1.442695, %v3082_v36  ;;  %v6684_v30 = vmul.f32 0.6931472, %v3938_v51  ;;  %v6689_v11 = vadd.f32 %v2354_v2, %v6405_v24  ;;  %v2310_v20 = vpop.permute.xlu0 %2309  ;;  %3655 = vrot.lane.b32.xlu2 %v6598_v15, %s4180_s1 }
 0x271   :  { %9068 = vst [vmem:[#allocation254_spill] sm:$0xff] %v6675_v4  ;;  %v3942_v33 = vpop.eup %3941  ;;  %v3173_v34 = vadd.f32 1.0, %v3940_v39  ;;  %v3051_v37 = vand.u32 2147483647, %v6671_v47  ;;  %v3145_v25 = vmul.f32 1.442695, %v3087_v13  ;;  %v2314_v24 = vpop.permute.xlu1 %2313 }
 0x272   :  { %9069 = vst [vmem:[#allocation255_spill] sm:$0xff] %v6680_v9  ;;  %v3944_v7 = vpop.eup %3943  ;;  %v3053_v14 = vand.u32 2147483647, %v6680_v9  ;;  %v6693_v55 = vmul.f32 0.6931472, %v3942_v33  ;;  %v2350_v13 = vsel %vm150_vm5, %v2310_v20, 0.0 }
 0x273   :  { %9070 = vst [vmem:[#allocation256_spill] sm:$0xff] %v6684_v30  ;;  %v3946_v28 = vpop.eup %3945  ;;  %3951 = vlog2.f32 %v3173_v34  ;;  %v3175_v10 = vadd.f32 1.0, %v3944_v7  ;;  %v3083_v51 = vsub.f32 0.0, %v3051_v37  ;;  %v3058_v57 = vand.u32 2147483647, %v6689_v11  ;;  %v9073_v37 = vld [vmem:[#allocation84_spill] sm:$0xff] }
 0x274   :  { %9071 = vst [vmem:[#allocation257_spill] sm:$0xff] %v6689_v11  ;;  %v3180_v39 = vadd.f32 1.0, %v3946_v28  ;;  %3953 = vpow2.f32 %v3135_v27  ;;  %v3085_v32 = vsub.f32 0.0, %v3053_v14  ;;  %v2352_v14 = vsel %vm150_vm5, %v2314_v24, 0.0 }
 0x275   :  { %9072 = vst [vmem:[#allocation258_spill] sm:$0xff] %v6693_v55  ;;  %3955 = vlog2.f32 %v3175_v10  ;;  %v3948_v2 = vpop.eup %3947  ;;  %v3137_v34 = vmul.f32 1.442695, %v3083_v51  ;;  %v3090_v28 = vsub.f32 0.0, %v3058_v57  ;;  %v6702_v10 = vadd.f32 %v2350_v13, %v9073_v37 }
 0x276   :  { %3957 = vlog2.f32 %v3180_v39  ;;  %v3950_v7 = vpop.eup %3949  ;;  %v3176_v30 = vadd.f32 1.0, %v3948_v2  ;;  %v3141_v27 = vmul.f32 1.442695, %v3085_v32  ;;  %v9077_v2 = vld [vmem:[#allocation17_spill] sm:$0xff] }
 0x277   :  { %3959 = vpow2.f32 %v3145_v25  ;;  %9074 = vst [vmem:[#allocation84_spill] sm:$0xff] %v6702_v10  ;;  %v3151_v51 = vmul.f32 1.442695, %v3090_v28  ;;  %v6708_v25 = vadd.f32 %v2352_v14, %v6382_v43  ;;  %v6710_v32 = vmul.f32 0.6931472, %v3950_v7 }
 0x278   :  { %3961 = vpow2.f32 %v3137_v34  ;;  %v3054_v15 = vand.u32 2147483647, %v6702_v10  ;;  %v2389_v34 = vmul.f32 -4.0, %v9077_v2  ;;  %v2421_v14 = vrot.slane %v9077_v2, 7  ;;  %v9081_v10 = vld [vmem:[#allocation12_spill] sm:$0xff]  ;;  %3670 = vrot.lane.b32.xlu2 %v6656_v38, %s4179_s0 }
 0x279   :  { %v3952_v39 = vpop.eup %3951  ;;  %3963 = vlog2.f32 %v3176_v30  ;;  %9075 = vst [vmem:[#allocation259_spill] sm:$0xff] %v6708_v25  ;;  %v3056_v24 = vand.u32 2147483647, %v6708_v25  ;;  %v9078_v30 = vld [vmem:[#allocation23_spill] sm:$0xff] }
 0x27a   :  { %v3954_v57 = vpop.eup %3953  ;;  %9076 = vst [vmem:[#allocation260_spill] sm:$0xff] %v6710_v32  ;;  %3965 = vpow2.f32 %v3141_v27  ;;  %v2390_v33 = vmul.f32 -4.0, %v9078_v30  ;;  %v6716_v28 = vmul.f32 0.6931472, %v3952_v39  ;;  %v3086_v43 = vsub.f32 0.0, %v3054_v15 }
 0x27b   :  { %v3956_v13 = vpop.eup %3955  ;;  %v3178_v37 = vadd.f32 1.0, %v3954_v57  ;;  %3967 = vpow2.f32 %v3151_v51  ;;  %v8568_v7 = vrot.slane %v9078_v30, 7  ;;  %v3088_v11 = vsub.f32 0.0, %v3056_v24 }
 0x27c   :  { %v3958_v20 = vpop.eup %3957  ;;  %9079 = vst [vmem:[#allocation23_spill] sm:$0xff] %v6716_v28  ;;  %v8574_v57 = vrot.slane %v9063_v35, 7  ;;  %v3143_v32 = vmul.f32 1.442695, %v3086_v43  ;;  %v6727_v47 = vmul.f32 0.6931472, %v3956_v13 }
 0x27d   :  { %v3960_v27 = vpop.eup %3959  ;;  %3969 = vlog2.f32 %v3178_v37  ;;  %v2483_v39 = vsel %vm1895_vm1, %v2421_v14, %v8568_v7  ;;  %v3147_v55 = vmul.f32 1.442695, %v3088_v11  ;;  %v2550_v7 = vrot.slane %v9078_v30, 1 }
 0x27e   :  { %v3962_v51 = vpop.eup %3961  ;;  %v3183_v9 = vadd.f32 1.0, %v3960_v27  ;;  %9080 = vst [vmem:[#allocation261_spill] sm:$0xff] %v6727_v47  ;;  %v2484_v37 = vsel %vm1895_vm1, %v8574_v57, %v2421_v14  ;;  %v2316_v27 = vpop.permute.xlu0 %2315  ;;  %v8575_v35 = vrot.slane %v9081_v10, 1  ;;  %v6738_v47 = vmul.f32 0.6931472, %v3958_v20 }
 0x27f   :  { %v3964_v15 = vpop.eup %3963  ;;  %v3179_v8 = vadd.f32 1.0, %v3962_v51  ;;  %v2485_v36 = vsel %vm145_vm0, %v2484_v37, 0.0  ;;  %v2518_v51 = vadd.f32 %v2483_v39, %v2390_v33  ;;  %v2320_v39 = vpop.permute.xlu1 %2319 }
 0x280   :  { %v3966_v43 = vpop.eup %3965  ;;  %3971 = vlog2.f32 %v3183_v9  ;;  %9082 = vst [vmem:[#allocation12_spill] sm:$0xff] %v6738_v47  ;;  %v2517_v14 = vadd.f32 %v2485_v36, %v2389_v34  ;;  %v2353_v9 = vsel %vm150_vm5, %v2316_v27, 0.0  ;;  %v2610_v37 = vsel %vm2028_vm3, %v2550_v7, %v8575_v35 }
 0x281   :  { %v3968_v25 = vpop.eup %3967  ;;  %3973 = vlog2.f32 %v3179_v8  ;;  %v3181_v13 = vadd.f32 1.0, %v3966_v43  ;;  %v3521_v57 = vpop.permute.xlu2 %3520  ;;  %v9083_v8 = vrot.slane %v9077_v2, 1  ;;  %v2614_v36 = vsel %vm8623_vm4, %v2610_v37, 0.0 }
 0x282   :  { %3975 = vpow2.f32 %v3143_v32  ;;  %v3186_v24 = vadd.f32 1.0, %v3968_v25  ;;  %v3523_v20 = vunpack.i.h.bf16 %v3521_v57  ;;  %v6750_v32 = vmul.f32 0.6931472, %v3964_v15 }
 0x283   :  { %v3970_v11 = vpop.eup %3969  ;;  %v2611_v33 = vsel %vm2028_vm3, %v9083_v8, %v2550_v7  ;;  %3977 = vlog2.f32 %v3181_v13  ;;  %v3522_v34 = vunpack.i.l.bf16 %v3521_v57  ;;  %v2646_v25 = vadd.f32 %v2614_v36, %v2518_v51 }
 0x284   :  { %9084 = vst [vmem:[#allocation262_spill] sm:$0xff] %v6750_v32  ;;  %3979 = vpow2.f32 %v3147_v55  ;;  %v2742_v27 = vsel %vm149_vm2, %v3523_v20, 0.0  ;;  %v6757_v43 = vadd.f32 %v2353_v9, %v6296_v6  ;;  %v6759_v47 = vmul.f32 0.6931472, %v3970_v11 }
 0x285   :  { %v2645_v7 = vadd.f32 %v2611_v33, %v2517_v14  ;;  %v2355_v15 = vsel %vm150_vm5, %v2320_v39, 0.0  ;;  %3981 = vlog2.f32 %v3186_v24  ;;  %v2741_v55 = vsel %vm149_vm2, %v3522_v34, 0.0  ;;  %v9089_v24 = vld [vmem:[#allocation14_spill] sm:$0xff] }
 0x286   :  { %9085 = vst [vmem:[#allocation263_spill] sm:$0xff] %v6757_v43  ;;  %v3972_v35 = vpop.eup %3971  ;;  %v2395_v57 = vmul.f32 -4.0, %v9009_v49  ;;  %v6768_v37 = vadd.f32 %v2742_v27, %v2646_v25  ;;  %v3057_v6 = vand.u32 2147483647, %v6757_v43  ;;  %v6774_v14 = vadd.f32 %v2355_v15, %v6439_v3 }
 0x287   :  { %9086 = vst [vmem:[#allocation264_spill] sm:$0xff] %v6759_v47  ;;  %v3974_v13 = vpop.eup %3973  ;;  %v6763_v8 = vmul.f32 0.6931472, %v3972_v35  ;;  %v2396_v35 = vmul.f32 -4.0, %v9010_v18  ;;  %v8581_v11 = vrot.slane %v9089_v24, 7  ;;  %v2427_v33 = vrot.slane %v9009_v49, 7 }
 0x288   :  { %v3976_v51 = vpop.eup %3975  ;;  %9088 = vst [vmem:[#allocation266_spill] sm:$0xff] %v6774_v14  ;;  %v8580_v20 = vrot.slane %v9010_v18, 7  ;;  %v6780_v36 = vadd.f32 %v2741_v55, %v2645_v7  ;;  %v3089_v25 = vsub.f32 0.0, %v3057_v6  ;;  %v3059_v38 = vand.u32 2147483647, %v6774_v14  ;;  %v2322_v14 = vpop.permute.xlu0 %2321  ;;  %v9091_v47 = vld [vmem:[#allocation26_spill] sm:$0xff] }
 0x289   :  { %9087 = vst [vmem:[#allocation265_spill] sm:$0xff] %v6763_v8  ;;  %v3182_v9 = vadd.f32 1.0, %v3976_v51  ;;  %v3978_v39 = vpop.eup %3977  ;;  %v2478_v15 = vsel %vm1895_vm1, %v8581_v11, %v2427_v33  ;;  %v8582_v32 = vrot.slane %v9091_v47, 1 }
 0x28a   :  { %v3980_v27 = vpop.eup %3979  ;;  %v2477_v3 = vsel %vm1895_vm1, %v2427_v33, %v8580_v20  ;;  %v3149_v51 = vmul.f32 1.442695, %v3089_v25  ;;  %v3091_v34 = vsub.f32 0.0, %v3059_v38  ;;  %v2491_v6 = vsel %vm145_vm0, %v2478_v15, 0.0  ;;  %v3536_v16 = vpop.permute.xlu2 %3535 }
 0x28b   :  { %3983 = vlog2.f32 %v3182_v9  ;;  %v3184_v55 = vadd.f32 1.0, %v3980_v27  ;;  %v6795_v9 = vpop.eup %3981  ;;  %v2523_v43 = vadd.f32 %v2491_v6, %v2395_v57  ;;  %v2524_v8 = vadd.f32 %v2477_v3, %v2396_v35 }
 0x28c   :  { %9090 = vst [vmem:[#allocation14_spill] sm:$0xff] %v6795_v9  ;;  %v2556_v20 = vrot.slane %v9010_v18, 1  ;;  %v3153_v33 = vmul.f32 1.442695, %v3091_v34  ;;  %v3538_v11 = vunpack.i.h.bf16 %v3536_v16  ;;  %v3537_v7 = vunpack.i.l.bf16 %v3536_v16 }
 0x28d   :  { %3985 = vlog2.f32 %v3184_v55  ;;  %v9092_v38 = vrot.slane %v9009_v49, 1  ;;  %v2356_v35 = vsel %vm150_vm5, %v2322_v14, 0.0  ;;  %v6809_v27 = vmul.f32 0.6931472, %v3974_v13 }
 0x28e   :  { %3987 = vpow2.f32 %v3149_v51  ;;  %v2604_v25 = vsel %vm2028_vm3, %v2556_v20, %v8582_v32  ;;  %v6813_v15 = vmul.f32 0.6931472, %v3978_v39  ;;  %v2747_v51 = vsel %vm149_vm2, %v3537_v7, 0.0 }
 0x28f   :  { %v2605_v57 = vsel %vm2028_vm3, %v9092_v38, %v2556_v20  ;;  %9093 = vst [vmem:[#allocation267_spill] sm:$0xff] %v6809_v27  ;;  %3989 = vpow2.f32 %v3153_v33  ;;  %v2620_v16 = vsel %vm8623_vm4, %v2604_v25, 0.0  ;;  %v6818_v6 = vadd.f32 %v2356_v35, %v6368_v48  ;;  %v9096_v20 = vld [vmem:[#allocation16_spill] sm:$0xff] }
 0x290   :  { %v2651_v34 = vadd.f32 %v2605_v57, %v2523_v43  ;;  %9094 = vst [vmem:[#allocation268_spill] sm:$0xff] %v6813_v15  ;;  %v2652_v55 = vadd.f32 %v2620_v16, %v2524_v8  ;;  %v2748_v14 = vsel %vm149_vm2, %v3538_v11, 0.0  ;;  %v2391_v13 = vmul.f32 -4.0, %v9081_v10  ;;  %v3526_v43 = vpop.permute.xlu1 %3525  ;;  %v9100_v16 = vld [vmem:[#allocation11_spill] sm:$0xff] }
 0x291   :  { %v3984_v3 = vpop.eup %3983  ;;  %9095 = vst [vmem:[#allocation269_spill] sm:$0xff] %v6818_v6  ;;  %v2392_v33 = vmul.f32 -4.0, %v9096_v20  ;;  %v2423_v25 = vrot.slane %v9081_v10, 7  ;;  %v3060_v8 = vand.u32 2147483647, %v6818_v6  ;;  %v8589_v7 = vrot.slane %v9096_v20, 7 }
 0x292   :  { %v6825_v38 = vmul.f32 0.6931472, %v3984_v3  ;;  %v6827_v39 = vadd.f32 %v2747_v51, %v2651_v34  ;;  %v9099_v57 = vrot.slane %v9078_v30, 7  ;;  %v2552_v35 = vrot.slane %v9096_v20, 1 }
 0x293   :  { %v3986_v48 = vpop.eup %3985  ;;  %v8588_v32 = vrot.slane %v9100_v16, 1  ;;  %v3528_v9 = vunpack.i.h.bf16 %v3526_v43  ;;  %v6837_v3 = vadd.f32 %v2748_v14, %v2652_v55  ;;  %v3092_v34 = vsub.f32 0.0, %v3060_v8 }
 0x294   :  { %9097 = vst [vmem:[#allocation16_spill] sm:$0xff] %v6825_v38  ;;  %v2482_v11 = vsel %vm1895_vm1, %v9099_v57, %v2423_v25  ;;  %v3988_v15 = vpop.eup %3987  ;;  %v2481_v51 = vsel %vm1895_vm1, %v2423_v25, %v8589_v7  ;;  %v9102_v8 = vrot.slane %v9081_v10, 1 }
 0x295   :  { %9098 = vst [vmem:[#allocation270_spill] sm:$0xff] %v6827_v39  ;;  %v2487_v6 = vsel %vm145_vm0, %v2482_v11, 0.0  ;;  %v3990_v38 = vpop.eup %3989  ;;  %v3185_v27 = vadd.f32 1.0, %v3988_v15  ;;  %v2520_v46 = vadd.f32 %v2481_v51, %v2392_v33  ;;  %v2608_v4 = vsel %vm2028_vm3, %v2552_v35, %v8588_v32 }
 0x296   :  { %9101 = vst [vmem:[#allocation11_spill] sm:$0xff] %v6837_v3  ;;  %v2519_v57 = vadd.f32 %v2487_v6, %v2391_v13  ;;  %v3187_v55 = vadd.f32 1.0, %v3990_v38  ;;  %v3155_v14 = vmul.f32 1.442695, %v3092_v34  ;;  %v2609_v28 = vsel %vm2028_vm3, %v9102_v8, %v2552_v35 }
 0x297   :  { %v2616_v25 = vsel %vm8623_vm4, %v2608_v4, 0.0  ;;  %v6855_v11 = vmul.f32 0.6931472, %v3986_v48  ;;  %3991 = vlog2.f32 %v3185_v27  ;;  %v2744_v6 = vsel %vm149_vm2, %v3528_v9, 0.0  ;;  %v3551_v48 = vpop.permute.xlu2 %3550 }
 0x298   :  { %v2648_v15 = vadd.f32 %v2616_v25, %v2520_v46  ;;  %3993 = vlog2.f32 %v3187_v55  ;;  %v2647_v13 = vadd.f32 %v2609_v28, %v2519_v57  ;;  %v3527_v33 = vunpack.i.l.bf16 %v3526_v43  ;;  %v9104_v57 = vld [vmem:[#allocation43_spill] sm:$0xff] }
 0x299   :  { %9103 = vst [vmem:[#allocation271_spill] sm:$0xff] %v6855_v11  ;;  %v2401_v38 = vmul.f32 -4.0, %v9018_v29  ;;  %3995 = vpow2.f32 %v3155_v14  ;;  %v2402_v34 = vmul.f32 -4.0, %v9019_v0  ;;  %v8587_v35 = vrot.slane %v9006_v56, 7 }
 0x29a   :  { %v2433_v51 = vrot.slane %v9018_v29, 7  ;;  %v6863_v4 = vadd.f32 %v2744_v6, %v2648_v15  ;;  %v8590_v27 = vrot.slane %v9019_v0, 7  ;;  %v8591_v46 = vrot.slane %v9018_v29, 1 }
 0x29b   :  { %v2562_v9 = vrot.slane %v9019_v0, 1  ;;  %v2743_v28 = vsel %vm149_vm2, %v3527_v33, 0.0  ;;  %v8592_v55 = vrot.slane %v9104_v57, 1  ;;  %v3553_v14 = vunpack.i.h.bf16 %v3551_v48 }
 0x29c   :  { %v2472_v43 = vsel %vm1895_vm1, %v8587_v35, %v2433_v51  ;;  %v2471_v8 = vsel %vm1895_vm1, %v2433_v51, %v8590_v27  ;;  %v3552_v6 = vunpack.i.l.bf16 %v3551_v48  ;;  %v3531_v27 = vpop.permute.xlu0 %3530 }
 0x29d   :  { %v2497_v25 = vsel %vm145_vm0, %v2472_v43, 0.0  ;;  %v2599_v15 = vsel %vm2028_vm3, %v8591_v46, %v2562_v9  ;;  %v6885_v33 = vpop.eup %3991  ;;  %v2530_v32 = vadd.f32 %v2471_v8, %v2402_v34  ;;  %v2598_v7 = vsel %vm2028_vm3, %v2562_v9, %v8592_v55 }
 0x29e   :  { %9105 = vst [vmem:[#allocation272_spill] sm:$0xff] %v6885_v33  ;;  %v2529_v35 = vadd.f32 %v2497_v25, %v2401_v38  ;;  %v2754_v51 = vsel %vm149_vm2, %v3553_v14, 0.0  ;;  %v6893_v43 = vpop.eup %3993  ;;  %v2626_v11 = vsel %vm8623_vm4, %v2598_v7, 0.0  ;;  %v2753_v48 = vsel %vm149_vm2, %v3552_v6, 0.0 }
 0x29f   :  { %9106 = vst [vmem:[#allocation273_spill] sm:$0xff] %v6893_v43  ;;  %v2393_v38 = vmul.f32 -4.0, %v9100_v16  ;;  %v2394_v34 = vmul.f32 -4.0, %v9089_v24  ;;  %v3996_v8 = vpop.eup %3995  ;;  %v2658_v46 = vadd.f32 %v2626_v11, %v2530_v32  ;;  %v2425_v9 = vrot.slane %v9100_v16, 7  ;;  %v3566_v1 = vpop.permute.xlu2 %3565 }
 0x2a0   :  { %v2657_v25 = vadd.f32 %v2599_v15, %v2529_v35  ;;  %v2554_v14 = vrot.slane %v9089_v24, 1  ;;  %v6903_v55 = vadd.f32 1.0, %v3996_v8  ;;  %v6905_v43 = vadd.f32 %v2743_v28, %v2647_v13 }
 0x2a1   :  { %v3533_v33 = vunpack.i.h.bf16 %v3531_v27  ;;  %v3532_v7 = vunpack.i.l.bf16 %v3531_v27  ;;  %v6907_v21 = vadd.f32 %v2754_v51, %v2658_v46  ;;  %v9109_v6 = vrot.slane %v9089_v24, 7 }
 0x2a2   :  { %9107 = vst [vmem:[#allocation274_spill] sm:$0xff] %v6903_v55  ;;  %v9110_v35 = vrot.slane %v9096_v20, 7  ;;  %v2397_v11 = vmul.f32 -4.0, %v9091_v47  ;;  %v6918_v15 = vadd.f32 %v2753_v48, %v2657_v25  ;;  %v9112_v46 = vrot.slane %v9009_v49, 1  ;;  %v3541_v25 = vpop.permute.xlu1 %3540 }
 0x2a3   :  { %9108 = vst [vmem:[#allocation275_spill] sm:$0xff] %v6907_v21  ;;  %v2479_v61 = vsel %vm1895_vm1, %v2425_v9, %v9109_v6  ;;  %v9113_v8 = vrot.slane %v9100_v16, 1  ;;  %v2746_v48 = vsel %vm149_vm2, %v3533_v33, 0.0  ;;  %v9116_v33 = vrot.slane %v9010_v18, 7 }
 0x2a4   :  { %v2480_v32 = vsel %vm1895_vm1, %v9110_v35, %v2425_v9  ;;  %9111 = vst [vmem:[#allocation276_spill] sm:$0xff] %v6918_v15  ;;  %v2522_v27 = vadd.f32 %v2479_v61, %v2394_v34  ;;  %v2606_v28 = vsel %vm2028_vm3, %v2554_v14, %v9112_v46  ;;  %v2745_v61 = vsel %vm149_vm2, %v3532_v7, 0.0  ;;  %v9114_v34 = vld [vmem:[#allocation39_spill] sm:$0xff] }
 0x2a5   :  { %v2489_v13 = vsel %vm145_vm0, %v2480_v32, 0.0  ;;  %v2607_v6 = vsel %vm2028_vm3, %v9113_v8, %v2554_v14  ;;  %v2618_v9 = vsel %vm8623_vm4, %v2606_v28, 0.0  ;;  %v2398_v32 = vmul.f32 -4.0, %v9114_v34  ;;  %v9115_v8 = vld [vmem:[#allocation38_spill] sm:$0xff] }
 0x2a6   :  { %v2521_v51 = vadd.f32 %v2489_v13, %v2393_v38  ;;  %v2650_v35 = vadd.f32 %v2618_v9, %v2522_v27  ;;  %v2429_v38 = vrot.slane %v9091_v47, 7  ;;  %v2430_v46 = vrot.slane %v9114_v34, 7 }
 0x2a7   :  { %v2558_v14 = vrot.slane %v9114_v34, 1  ;;  %v2559_v55 = vrot.slane %v9115_v8, 1  ;;  %v3543_v9 = vunpack.i.h.bf16 %v3541_v25  ;;  %v3542_v7 = vunpack.i.l.bf16 %v3541_v25 }
 0x2a8   :  { %v2649_v13 = vadd.f32 %v2607_v6, %v2521_v51  ;;  %v6941_v28 = vadd.f32 %v2746_v48, %v2650_v35  ;;  %v2476_v27 = vsel %vm1895_vm1, %v9116_v33, %v2429_v38  ;;  %v2475_v51 = vsel %vm1895_vm1, %v2429_v38, %v2430_v46 }
 0x2a9   :  { %v2493_v6 = vsel %vm145_vm0, %v2476_v27, 0.0  ;;  %v2602_v15 = vsel %vm2028_vm3, %v2558_v14, %v2559_v55  ;;  %v2526_v35 = vadd.f32 %v2475_v51, %v2398_v32  ;;  %v9117_v34 = vrot.slane %v9091_v47, 1  ;;  %v9118_v27 = vld [vmem:[#allocation63_spill] sm:$0xff]  ;;  %v9119_v51 = vld [vmem:[#allocation53_spill] sm:$0xff] }
 0x2aa   :  { %v6947_v21 = vadd.f32 %v2745_v61, %v2649_v13  ;;  %v2525_v48 = vadd.f32 %v2493_v6, %v2397_v11  ;;  %v2622_v25 = vsel %vm8623_vm4, %v2602_v15, 0.0  ;;  %v2750_v61 = vsel %vm149_vm2, %v3543_v9, 0.0  ;;  %v9120_v9 = vld [vmem:[#allocation59_spill] sm:$0xff] }
 0x2ab   :  { %v2603_v33 = vsel %vm2028_vm3, %v9117_v34, %v2558_v14  ;;  %v2749_v38 = vsel %vm149_vm2, %v3542_v7, 0.0  ;;  %v2407_v13 = vmul.f32 -4.0, %v9025_v54  ;;  %v2408_v17 = vmul.f32 -4.0, %v9118_v27 }
 0x2ac   :  { %v2653_v11 = vadd.f32 %v2603_v33, %v2525_v48  ;;  %v2654_v32 = vadd.f32 %v2622_v25, %v2526_v35  ;;  %v8603_v6 = vrot.slane %v9119_v51, 7  ;;  %v2439_v47 = vrot.slane %v9025_v54, 7 }
 0x2ad   :  { %v8604_v34 = vrot.slane %v9118_v27, 7  ;;  %v8606_v15 = vrot.slane %v9025_v54, 1  ;;  %v2568_v14 = vrot.slane %v9118_v27, 1  ;;  %v8605_v58 = vrot.slane %v9120_v9, 1 }
 0x2ae   :  { %v6973_v7 = vadd.f32 %v2750_v61, %v2654_v32  ;;  %v6975_v12 = vadd.f32 %v2749_v38, %v2653_v11  ;;  %v2466_v48 = vsel %vm1895_vm1, %v8603_v6, %v2439_v47  ;;  %v3568_v35 = vunpack.i.h.bf16 %v3566_v1  ;;  %v3546_v11 = vpop.permute.xlu0 %3545 }
 0x2af   :  { %v2465_v33 = vsel %vm1895_vm1, %v2439_v47, %v8604_v34  ;;  %v2503_v25 = vsel %vm145_vm0, %v2466_v48, 0.0  ;;  %v2592_v61 = vsel %vm2028_vm3, %v2568_v14, %v8605_v58  ;;  %v2593_v38 = vsel %vm2028_vm3, %v8606_v15, %v2568_v14 }
 0x2b0   :  { %9121 = vst [vmem:[#allocation38_spill] sm:$0xff] %v6973_v7  ;;  %v2535_v32 = vadd.f32 %v2503_v25, %v2407_v13  ;;  %v2536_v6 = vadd.f32 %v2465_v33, %v2408_v17  ;;  %v2760_v47 = vsel %vm149_vm2, %v3568_v35, 0.0  ;;  %v3567_v48 = vunpack.i.l.bf16 %v3566_v1 }
 0x2b1   :  { %9122 = vst [vmem:[#allocation277_spill] sm:$0xff] %v6975_v12  ;;  %v2632_v12 = vsel %vm8623_vm4, %v2592_v61, 0.0  ;;  %v2399_v34 = vmul.f32 -4.0, %v9115_v8  ;;  %v2400_v7 = vmul.f32 -4.0, %v9006_v56  ;;  %v2431_v58 = vrot.slane %v9115_v8, 7 }
 0x2b2   :  { %v2663_v39 = vadd.f32 %v2593_v38, %v2535_v32  ;;  %v2664_v3 = vadd.f32 %v2632_v12, %v2536_v6  ;;  %v2560_v14 = vrot.slane %v9006_v56, 1  ;;  %v3548_v15 = vunpack.i.h.bf16 %v3546_v11 }
 0x2b3   :  { %v2759_v17 = vsel %vm149_vm2, %v3567_v48, 0.0  ;;  %v9123_v13 = vrot.slane %v9006_v56, 7  ;;  %v2474_v1 = vsel %vm1895_vm1, %v2430_v46, %v2431_v58  ;;  %v3547_v33 = vunpack.i.l.bf16 %v3546_v11 }
 0x2b4   :  { %v7011_v25 = vadd.f32 %v2760_v47, %v2664_v3  ;;  %v7013_v61 = vadd.f32 %v2759_v17, %v2663_v39  ;;  %v2495_v12 = vsel %vm145_vm0, %v2474_v1, 0.0  ;;  %v9126_v32 = vrot.slane %v9018_v29, 1  ;;  %v3556_v3 = vpop.permute.xlu1 %3555 }
 0x2b5   :  { %v2473_v35 = vsel %vm1895_vm1, %v2431_v58, %v9123_v13  ;;  %v2527_v38 = vadd.f32 %v2495_v12, %v2399_v34  ;;  %v2601_v13 = vsel %vm2028_vm3, %v2559_v55, %v2560_v14  ;;  %v2752_v58 = vsel %vm149_vm2, %v3548_v15, 0.0  ;;  %v9128_v15 = vld [vmem:[#allocation55_spill] sm:$0xff] }
 0x2b6   :  { %9124 = vst [vmem:[#allocation278_spill] sm:$0xff] %v7011_v25  ;;  %v2528_v6 = vadd.f32 %v2473_v35, %v2400_v7  ;;  %v2600_v48 = vsel %vm2028_vm3, %v2560_v14, %v9126_v32  ;;  %v2751_v46 = vsel %vm149_vm2, %v3547_v33, 0.0  ;;  %v2403_v34 = vmul.f32 -4.0, %v9104_v57  ;;  %v9127_v7 = vld [vmem:[#allocation56_spill] sm:$0xff] }
 0x2b7   :  { %9125 = vst [vmem:[#allocation279_spill] sm:$0xff] %v7013_v61  ;;  %v2624_v39 = vsel %vm8623_vm4, %v2600_v48, 0.0  ;;  %v2404_v11 = vmul.f32 -4.0, %v9127_v7  ;;  %v2655_v47 = vadd.f32 %v2601_v13, %v2527_v38  ;;  %v2435_v35 = vrot.slane %v9104_v57, 7 }
 0x2b8   :  { %v2656_v17 = vadd.f32 %v2624_v39, %v2528_v6  ;;  %v2436_v55 = vrot.slane %v9127_v7, 7  ;;  %v2564_v14 = vrot.slane %v9127_v7, 1  ;;  %v2565_v1 = vrot.slane %v9128_v15, 1 }
 0x2b9   :  { %v3558_v12 = vunpack.i.h.bf16 %v3556_v3  ;;  %v3557_v32 = vunpack.i.l.bf16 %v3556_v3  ;;  %v7037_v25 = vadd.f32 %v2751_v46, %v2655_v47  ;;  %v9129_v38 = vrot.slane %v9019_v0, 7 }
 0x2ba   :  { %v7035_v48 = vadd.f32 %v2752_v58, %v2656_v17  ;;  %v2469_v33 = vsel %vm1895_vm1, %v2435_v35, %v2436_v55  ;;  %v2596_v61 = vsel %vm2028_vm3, %v2564_v14, %v2565_v1  ;;  %v9130_v58 = vrot.slane %v9104_v57, 1 }
 0x2bb   :  { %v2470_v6 = vsel %vm1895_vm1, %v9129_v38, %v2435_v35  ;;  %v2532_v39 = vadd.f32 %v2469_v33, %v2404_v11  ;;  %v2628_v47 = vsel %vm8623_vm4, %v2596_v61, 0.0  ;;  %v2756_v17 = vsel %vm149_vm2, %v3558_v12, 0.0 }
 0x2bc   :  { %v2499_v13 = vsel %vm145_vm0, %v2470_v6, 0.0  ;;  %v2597_v3 = vsel %vm2028_vm3, %v9130_v58, %v2564_v14  ;;  %v2755_v35 = vsel %vm149_vm2, %v3557_v32, 0.0  ;;  %v2413_v11 = vmul.f32 -4.0, %v9032_v50  ;;  %v9131_v6 = vld [vmem:[#allocation73_spill] sm:$0xff] }
 0x2bd   :  { %v2531_v46 = vadd.f32 %v2499_v13, %v2403_v34  ;;  %v2660_v38 = vadd.f32 %v2628_v47, %v2532_v39  ;;  %v2414_v33 = vmul.f32 -4.0, %v9033_v53  ;;  %v8612_v7 = vrot.slane %v9131_v6, 7  ;;  %v3581_v13 = vpop.permute.xlu2 %3580 }
 0x2be   :  { %v2445_v14 = vrot.slane %v9032_v50, 7  ;;  %v8609_v34 = vrot.slane %v9033_v53, 7  ;;  %v2574_v12 = vrot.slane %v9033_v53, 1  ;;  %v8611_v32 = vrot.slane %v9047_v5, 1  ;;  %v3561_v53 = vpop.permute.xlu0 %3560  ;;  %v9136_v5 = vld [vmem:[#allocation139_spill] sm:$0xff] }
 0x2bf   :  { %v2659_v57 = vadd.f32 %v2597_v3, %v2531_v46  ;;  %v7065_v58 = vadd.f32 %v2756_v17, %v2660_v38  ;;  %v3583_v39 = vunpack.i.h.bf16 %v3581_v13  ;;  %v3582_v61 = vunpack.i.l.bf16 %v3581_v13 }
 0x2c0   :  { %v2459_v3 = vsel %vm1895_vm1, %v2445_v14, %v8609_v34  ;;  %v2460_v46 = vsel %vm1895_vm1, %v8612_v7, %v2445_v14  ;;  %v2406_v7 = vmul.f32 -4.0, %v9119_v51  ;;  %vm1290_vm7 = vweird.f32 %v9136_v5 }
 0x2c1   :  { %9132 = vst [vmem:[#allocation73_spill] sm:$0xff] %v7065_v58  ;;  %v7069_v47 = vadd.f32 %v2755_v35, %v2659_v57  ;;  %v2509_v17 = vsel %vm145_vm0, %v2460_v46, 0.0  ;;  %v2542_v38 = vadd.f32 %v2459_v3, %v2414_v33  ;;  %v2586_v57 = vsel %vm2028_vm3, %v2574_v12, %v8611_v32  ;;  %v9135_v3 = vld [vmem:[#allocation148_spill] sm:$0xff] }
 0x2c2   :  { %v9134_v35 = vrot.slane %v9032_v50, 1  ;;  %v2638_v14 = vsel %vm8623_vm4, %v2586_v57, 0.0  ;;  %v2766_v13 = vsel %vm149_vm2, %v3583_v39, 0.0  ;;  %v2765_v33 = vsel %vm149_vm2, %v3582_v61, 0.0 }
 0x2c3   :  { %9133 = vst [vmem:[#allocation280_spill] sm:$0xff] %v7069_v47  ;;  %v2541_v47 = vadd.f32 %v2509_v17, %v2413_v11  ;;  %vm1291_vm6 = vweird.f32 %v9135_v3  ;;  %v2670_v46 = vadd.f32 %v2638_v14, %v2542_v38  ;;  %v2405_v32 = vmul.f32 -4.0, %v9128_v15 }
 0x2c4   :  { %v2587_v34 = vsel %vm2028_vm3, %v9134_v35, %v2574_v12  ;;  %v2437_v12 = vrot.slane %v9128_v15, 7  ;;  %v2566_v11 = vrot.slane %v9119_v51, 1  ;;  %v3563_v17 = vunpack.i.h.bf16 %v3561_v53  ;;  %vm7171_vm11 = vmor %vm1290_vm7, %vm1291_vm6 }
 0x2c5   :  { %v2669_v35 = vadd.f32 %v2587_v34, %v2541_v47  ;;  %v3562_v57 = vunpack.i.l.bf16 %v3561_v53  ;;  %v7101_v39 = vadd.f32 %v2766_v13, %v2670_v46  ;;  %v9138_v61 = vrot.slane %v9119_v51, 7  ;;  %v9141_v46 = vld [vmem:[#allocation98_spill] sm:$0xff] }
 0x2c6   :  { %v2468_v14 = vsel %vm1895_vm1, %v2436_v55, %v2437_v12  ;;  %v2409_v58 = vmul.f32 -4.0, %v9120_v9  ;;  %v9140_v47 = vrot.slane %v9025_v54, 1  ;;  %vm1611_vm8 = vweird.f32 %v9141_v46 }
 0x2c7   :  { %9137 = vst [vmem:[#allocation148_spill] sm:$0xff] %v7101_v39  ;;  %v2467_v38 = vsel %vm1895_vm1, %v2437_v12, %v9138_v61  ;;  %v7110_v0 = vadd.f32 %v2765_v33, %v2669_v35  ;;  %v2501_v34 = vsel %vm145_vm0, %v2468_v14, 0.0  ;;  %v2595_v61 = vsel %vm2028_vm3, %v2565_v1, %v2566_v11  ;;  %v3571_v12 = vpop.permute.xlu1 %3570  ;;  %v9145_v14 = vld [vmem:[#allocation77_spill] sm:$0xff]  ;;  %v3576_v35 = vpop.permute.xlu0 %3575 }
 0x2c8   :  { %v2534_v53 = vadd.f32 %v2467_v38, %v2406_v7  ;;  %v2594_v13 = vsel %vm2028_vm3, %v2566_v11, %v9140_v47  ;;  %v2533_v39 = vadd.f32 %v2501_v34, %v2405_v32  ;;  %v2758_v33 = vsel %vm149_vm2, %v3563_v17, 0.0  ;;  %v9146_v11 = vld [vmem:[#allocation151_spill] sm:$0xff] }
 0x2c9   :  { %9139 = vst [vmem:[#allocation139_spill] sm:$0xff] %v7110_v0  ;;  %v2630_v55 = vsel %vm8623_vm4, %v2594_v13, 0.0  ;;  %v9142_v7 = vand.u32 2147483647, %v9136_v5  ;;  %v2757_v32 = vsel %vm149_vm2, %v3562_v57, 0.0  ;;  %v2410_v34 = vmul.f32 -4.0, %v9145_v14 }
 0x2ca   :  { %v2662_v38 = vadd.f32 %v2630_v55, %v2534_v53  ;;  %v2441_v1 = vrot.slane %v9120_v9, 7  ;;  %vm1610_vm10 = vweird.f32 %v9146_v11  ;;  %v2661_v47 = vadd.f32 %v2595_v61, %v2533_v39  ;;  %v9147_v0 = vld [vmem:[#allocation74_spill] sm:$0xff] }
 0x2cb   :  { %vm7127_vm9 = vcmp.eq.f32.partialorder %v9142_v7, 8.507059e+37  ;;  %v8619_v17 = vrot.slane %v9145_v14, 7  ;;  %v2570_v13 = vrot.slane %v9145_v14, 1  ;;  %v8620_v7 = vrot.slane %v9147_v0, 1  ;;  %vm7198_vm12 = vmor %vm1610_vm10, %vm1611_vm8 }
 0x2cc   :  { %v7139_v54 = vadd.f32 %v2758_v33, %v2662_v38  ;;  %v9149_v53 = vrot.slane %v9118_v27, 7  ;;  %v3573_v55 = vunpack.i.h.bf16 %v3571_v12  ;;  %v3572_v29 = vunpack.i.l.bf16 %v3571_v12 }
 0x2cd   :  { %v7145_v51 = vadd.f32 %v2757_v32, %v2661_v47  ;;  %v2463_v39 = vsel %vm1895_vm1, %v2441_v1, %v8619_v17  ;;  %v2590_v33 = vsel %vm2028_vm3, %v2570_v13, %v8620_v7  ;;  %v3596_v47 = vpop.permute.xlu2 %3595  ;;  %v4063_v17 = vld [vmem:[#allocation2 + $0x20] sm:$0xff]  ;;  %v4064_v7 = vld [vmem:[#allocation2 + $0x28] sm:$0xff] }
 0x2ce   :  { %9148 = vst [vmem:[#allocation98_spill] sm:$0xff] %v7139_v54  ;;  %v2464_v57 = vsel %vm1895_vm1, %v9149_v53, %v2441_v1  ;;  %v2538_v27 = vadd.f32 %v2463_v39, %v2410_v34  ;;  %v9151_v53 = vrot.slane %v9120_v9, 1  ;;  %v2634_v32 = vsel %vm8623_vm4, %v2590_v33, 0.0  ;;  %v9154_v33 = vld [vmem:[#allocation13_spill] sm:$0xff] }
 0x2cf   :  { %9150 = vst [vmem:[#allocation77_spill] sm:$0xff] %v7145_v51  ;;  %v2505_v61 = vsel %vm145_vm0, %v2464_v57, 0.0  ;;  %v2762_v1 = vsel %vm149_vm2, %v3573_v55, 0.0  ;;  %v2761_v57 = vsel %vm149_vm2, %v3572_v29, 0.0  ;;  %v443_v54 = vmax.f32 %v4063_v17, 0.0  ;;  %v9155_v9 = vld [vmem:[#allocation169_spill] sm:$0xff] }
 0x2d0   :  { %v2537_v38 = vadd.f32 %v2505_v61, %v2409_v58  ;;  %v2591_v12 = vsel %vm2028_vm3, %v9151_v53, %v2570_v13  ;;  %v444_v58 = vmax.f32 %v4064_v7, 0.0  ;;  %v2666_v39 = vadd.f32 %v2634_v32, %v2538_v27  ;;  %v9156_v27 = vld [vmem:[#allocation19_spill] sm:$0xff] }
 0x2d1   :  { %v475_v61 = vmul.f32 %v4063_v17, %v9100_v16  ;;  %v476_v55 = vmul.f32 %v4064_v7, %v9089_v24  ;;  %3997 = vlog2.f32 %v9154_v33  ;;  %v3598_v29 = vunpack.i.h.bf16 %v3596_v47  ;;  %v9157_v16 = vld [vmem:[#allocation161_spill] sm:$0xff]  ;;  %v9158_v7 = vld [vmem:[#allocation174_spill] sm:$0xff] }
 0x2d2   :  { %v2665_v13 = vadd.f32 %v2591_v12, %v2537_v38  ;;  %v3597_v53 = vunpack.i.l.bf16 %v3596_v47  ;;  %v1293_v51 = vsel %vm7171_vm11, %v9135_v3, %v9155_v9  ;;  %v7182_v5 = vadd.f32 %v2762_v1, %v2666_v39 }
 0x2d3   :  { %v507_v41 = vsub.f32 %v443_v54, %v475_v61  ;;  %v508_v38 = vsub.f32 %v444_v58, %v476_v55  ;;  %3999 = vlog2.f32 %v9156_v27  ;;  %v2874_v24 = vsel %vm150_vm5, %v3598_v29, 0.0  ;;  %v9161_v54 = vld [vmem:[#allocation110_spill] sm:$0xff]  ;;  %v9163_v55 = vld [vmem:[#allocation164_spill] sm:$0xff] }
 0x2d4   :  { %v7184_v15 = vadd.f32 %v2761_v57, %v2665_v13  ;;  %v1298_v17 = vsel %vm7127_vm9, %v9157_v16, %v1293_v51  ;;  %v1609_v12 = vadd.f32 %v9141_v46, %v9158_v7  ;;  %v1614_v32 = vand.u32 2147483647, %v9146_v11  ;;  %v9162_v13 = vld [vmem:[#allocation132_spill] sm:$0xff] }
 0x2d5   :  { %v1299_v3 = vmul.f32 %v1298_v17, %v9161_v54  ;;  %v2873_v47 = vsel %vm150_vm5, %v3597_v53, 0.0  ;;  %v2906_v51 = vadd.f32 %v2874_v24, %v6941_v28  ;;  %v2411_v58 = vmul.f32 -4.0, %v9147_v0  ;;  %v9164_v53 = vld [vmem:[#allocation105_spill] sm:$0xff]  ;;  %v9165_v27 = vld [vmem:[#allocation140_spill] sm:$0xff] }
 0x2d6   :  { %v1613_v1 = vsel %vm7198_vm12, %v9141_v46, %v1609_v12  ;;  %v2905_v57 = vadd.f32 %v2873_v47, %v6947_v21  ;;  %v2412_v34 = vmul.f32 -4.0, %v9131_v6  ;;  %vm1261_vm13 = vweird.f32 %v9162_v13  ;;  %v9166_v16 = vld [vmem:[#allocation108_spill] sm:$0xff] }
 0x2d7   :  { %vm1615_vm14 = vcmp.eq.f32.partialorder %v1614_v32, 8.507059e+37  ;;  %v2970_v11 = vmul.f32 %v2906_v51, %v6403_v63  ;;  %v2443_v39 = vrot.slane %v9147_v0, 7  ;;  %v2572_v28 = vrot.slane %v9131_v6, 1  ;;  %v3998_v61 = vpop.eup %3997 }
 0x2d8   :  { %v1618_v33 = vsel %vm1615_vm14, %v9163_v55, %v1613_v1  ;;  %v2969_v46 = vmul.f32 %v2905_v57, %v6459_v31  ;;  %v3578_v29 = vunpack.i.h.bf16 %v3576_v35  ;;  %v3577_v21 = vunpack.i.l.bf16 %v3576_v35 }
 0x2d9   :  { %vm1260_vm15 = vweird.f32 %v9164_v53  ;;  %vm1581_vm6 = vweird.f32 %v9165_v27  ;;  %v544_v24 = vmul.f32 0.6931472, %v3998_v61  ;;  %v1619_v17 = vmul.f32 %v1618_v33, %v9166_v16  ;;  %v4000_v32 = vpop.eup %3999  ;;  %v9175_v33 = vld [vmem:[#allocation107_spill] sm:$0xff] }
 0x2da   :  { %v9167_v7 = vmax.f32 %v6403_v63, 0.0  ;;  %v9168_v9 = vrot.slane %v9131_v6, 7  ;;  %v9169_v47 = vmax.f32 %v6459_v31, 0.0  ;;  %v9170_v35 = vrot.slane %v9145_v14, 7  ;;  %vm1262_vm12 = vmor %vm1260_vm15, %vm1261_vm13 }
 0x2db   :  { %v9171_v61 = vrot.slane %v9032_v50, 1  ;;  %vm1580_vm8 = vweird.f32 %v9175_v33  ;;  %v546_v31 = vmul.f32 0.6931472, %v4000_v32  ;;  %v7245_v16 = vadd.f32 %v1619_v17, %v1299_v3  ;;  %v4065_v17 = vld [vmem:[#allocation2] sm:$0xff] }
 0x2dc   :  { %v3002_v12 = vsub.f32 %v9167_v7, %v2970_v11  ;;  %v2461_v54 = vsel %vm1895_vm1, %v2443_v39, %v9168_v9  ;;  %v3001_v51 = vsub.f32 %v9169_v47, %v2969_v46  ;;  %v2462_v1 = vsel %vm1895_vm1, %v9170_v35, %v2443_v39  ;;  %vm1582_vm13 = vmor %vm1580_vm8, %vm1581_vm6 }
 0x2dd   :  { %v2540_v57 = vadd.f32 %v2461_v54, %v2412_v34  ;;  %v2588_v63 = vsel %vm2028_vm3, %v2572_v28, %v9171_v61  ;;  %v9172_v11 = vand.u32 2147483647, %v9164_v53  ;;  %v603_v46 = vadd.f32 %v544_v24, %v507_v41 }
 0x2de   :  { %v3258_v39 = vadd.f32 %v6537_v52, %v3002_v12  ;;  %v3257_v34 = vadd.f32 %v6581_v59, %v3001_v51  ;;  %v2507_v7 = vsel %vm145_vm0, %v2462_v1, 0.0  ;;  %v9176_v9 = vrot.slane %v9147_v0, 1  ;;  %v3586_v51 = vpop.permute.xlu1 %3585  ;;  %v9177_v1 = vld [vmem:[#allocation173_spill] sm:$0xff] }
 0x2df   :  { %vm7240_vm7 = vcmp.eq.f32.partialorder %v9172_v11, 8.507059e+37  ;;  %v2636_v47 = vsel %vm8623_vm4, %v2588_v63, 0.0  ;;  %v604_v35 = vadd.f32 %v546_v31, %v508_v38  ;;  %v2539_v41 = vadd.f32 %v2507_v7, %v2411_v58  ;;  %v4066_v38 = vld [vmem:[#allocation2 + $0x8] sm:$0xff]  ;;  %v9178_v31 = vld [vmem:[#allocation18_spill] sm:$0xff] }
 0x2e0   :  { %v2589_v54 = vsel %vm2028_vm3, %v9176_v9, %v2572_v28  ;;  %v3290_v32 = vmul.f32 2.0, %v3258_v39  ;;  %v2668_v3 = vadd.f32 %v2636_v47, %v2540_v57  ;;  %v3289_v24 = vmul.f32 2.0, %v3257_v34  ;;  %v9180_v39 = vld [vmem:[#allocation177_spill] sm:$0xff] }
 0x2e1   :  { %v2764_v52 = vsel %vm149_vm2, %v3578_v29, 0.0  ;;  %v2763_v59 = vsel %vm149_vm2, %v3577_v21, 0.0  ;;  %v439_v12 = vmax.f32 %v4065_v17, 0.0  ;;  %vm1336_vm9 = vweird.f32 %v9177_v1  ;;  %v9179_v21 = vld [vmem:[#allocation162_spill] sm:$0xff]  ;;  %v9181_v9 = vld [vmem:[#allocation21_spill] sm:$0xff] }
 0x2e2   :  { %v7262_v28 = vadd.f32 %v3290_v32, %v604_v35  ;;  %v2667_v61 = vadd.f32 %v2589_v54, %v2539_v41  ;;  %v7264_v63 = vadd.f32 %v2764_v52, %v2668_v3  ;;  %v440_v58 = vmax.f32 %v4066_v38, 0.0  ;;  %v9185_v3 = vld [vmem:[#allocation165_spill] sm:$0xff]  ;;  %v9186_v52 = vld [vmem:[#allocation152_spill] sm:$0xff] }
 0x2e3   :  { %v7266_v57 = vadd.f32 %v3289_v24, %v603_v46  ;;  %v471_v11 = vmul.f32 %v4065_v17, %v9077_v2  ;;  %v472_v29 = vmul.f32 %v4066_v38, %v9078_v30  ;;  %4001 = vlog2.f32 %v9178_v31  ;;  %v9193_v2 = vld [vmem:[#allocation31_spill] sm:$0xff] }
 0x2e4   :  { %vm1335_vm10 = vweird.f32 %v9179_v21  ;;  %vm1656_vm11 = vweird.f32 %v9180_v39  ;;  %v7275_v7 = vadd.f32 %v2763_v59, %v2667_v61  ;;  %4003 = vlog2.f32 %v9181_v9  ;;  %v9187_v59 = vld [vmem:[#allocation92_spill] sm:$0xff] }
 0x2e5   :  { %v3588_v54 = vunpack.i.h.bf16 %v3586_v51  ;;  %v503_v46 = vsub.f32 %v439_v12, %v471_v11  ;;  %v504_v47 = vsub.f32 %v440_v58, %v472_v29  ;;  %v3587_v35 = vunpack.i.l.bf16 %v3586_v51  ;;  %v9188_v51 = vld [vmem:[#allocation149_spill] sm:$0xff] }
 0x2e6   :  { %v9182_v32 = vand.u32 2147483647, %v9179_v21  ;;  %vm1655_vm4 = vweird.f32 %v9185_v3  ;;  %v1263_v53 = vsel %vm1262_vm12, %v9162_v13, %v9186_v52  ;;  %v1579_v17 = vadd.f32 %v9165_v27, %v9187_v59  ;;  %v4067_v13 = vld [vmem:[#allocation2 + $0x50] sm:$0xff]  ;;  %v9189_v29 = vld [vmem:[#allocation113_spill] sm:$0xff]  ;;  %v9191_v59 = vld [vmem:[#allocation27_spill] sm:$0xff] }
 0x2e7   :  { %v2870_v24 = vsel %vm150_vm5, %v3588_v54, 0.0  ;;  %v1584_v12 = vand.u32 2147483647, %v9175_v33  ;;  %v1268_v61 = vsel %vm7240_vm7, %v9188_v51, %v1263_v53  ;;  %v2869_v38 = vsel %vm150_vm5, %v3587_v35, 0.0  ;;  %v4068_v53 = vld [vmem:[#allocation2 + $0x58] sm:$0xff]  ;;  %vm1337_vm7 = vmor %vm1335_vm10, %vm1336_vm9 }
 0x2e8   :  { %vm7286_vm14 = vcmp.eq.f32.partialorder %v9182_v32, 8.507059e+37  ;;  %v2902_v58 = vadd.f32 %v2870_v24, %v6768_v37  ;;  %v449_v11 = vmax.f32 %v4067_v13, 0.0  ;;  %v1269_v31 = vmul.f32 %v1268_v61, %v9189_v29  ;;  %v9190_v32 = vld [vmem:[#allocation150_spill] sm:$0xff]  ;;  %v9192_v24 = vld [vmem:[#allocation112_spill] sm:$0xff]  ;;  %vm7340_vm9 = vmor %vm1655_vm4, %vm1656_vm11 }
 0x2e9   :  { %v1583_v9 = vsel %vm1582_vm13, %v9165_v27, %v1579_v17  ;;  %vm1585_vm15 = vcmp.eq.f32.partialorder %v1584_v12, 8.507059e+37  ;;  %v2901_v54 = vadd.f32 %v2869_v38, %v6780_v36  ;;  %v4002_v33 = vpop.eup %4001  ;;  %v450_v51 = vmax.f32 %v4068_v53, 0.0  ;;  %v3611_v17 = vpop.permute.xlu2 %3610 }
 0x2ea   :  { %v1588_v52 = vsel %vm1585_vm15, %v9190_v32, %v1583_v9  ;;  %v2966_v55 = vmul.f32 %v2902_v58, %v9191_v59  ;;  %v481_v35 = vmul.f32 %v4067_v13, %v9115_v8  ;;  %v4004_v34 = vpop.eup %4003  ;;  %v536_v37 = vmul.f32 0.6931472, %v4002_v33  ;;  %v9195_v9 = vld [vmem:[#allocation29_spill] sm:$0xff]  ;;  %v9196_v58 = vld [vmem:[#allocation138_spill] sm:$0xff] }
 0x2eb   :  { %v1589_v30 = vmul.f32 %v1588_v52, %v9192_v24  ;;  %v2965_v61 = vmul.f32 %v2901_v54, %v9193_v2  ;;  %v482_v27 = vmul.f32 %v4068_v53, %v9006_v56  ;;  %v538_v12 = vmul.f32 0.6931472, %v4004_v34  ;;  %v9198_v54 = vld [vmem:[#allocation28_spill] sm:$0xff]  ;;  %v9228_v24 = vld [vmem:[#allocation155_spill] sm:$0xff] }
 0x2ec   :  { %v9194_v36 = vmax.f32 %v9191_v59, 0.0  ;;  %v513_v29 = vsub.f32 %v449_v11, %v481_v35  ;;  %4005 = vlog2.f32 %v9195_v9  ;;  %vm1276_vm6 = vweird.f32 %v9196_v58  ;;  %v9199_v59 = vld [vmem:[#allocation106_spill] sm:$0xff]  ;;  %v9202_v53 = vld [vmem:[#allocation196_spill] sm:$0xff] }
 0x2ed   :  { %v599_v32 = vadd.f32 %v536_v37, %v503_v46  ;;  %v1815_v8 = vadd.f32 %v1589_v30, %v1269_v31  ;;  %v9197_v13 = vmax.f32 %v9193_v2, 0.0  ;;  %v514_v52 = vsub.f32 %v450_v51, %v482_v27  ;;  %v9201_v46 = vld [vmem:[#allocation195_spill] sm:$0xff] }
 0x2ee   :  { %v2998_v38 = vsub.f32 %v9194_v36, %v2966_v55  ;;  %v600_v56 = vadd.f32 %v538_v12, %v504_v47  ;;  %4007 = vlog2.f32 %v9198_v54  ;;  %v3613_v11 = vunpack.i.h.bf16 %v3611_v17  ;;  %v9200_v55 = vld [vmem:[#allocation146_spill] sm:$0xff]  ;;  %v9211_v54 = vld [vmem:[#allocation193_spill] sm:$0xff] }
 0x2ef   :  { %v2997_v33 = vsub.f32 %v9197_v13, %v2965_v61  ;;  %vm1275_vm8 = vweird.f32 %v9199_v59  ;;  %vm1596_vm12 = vweird.f32 %v9200_v55  ;;  %v3612_v2 = vunpack.i.l.bf16 %v3611_v17  ;;  %v9209_v61 = vld [vmem:[#allocation133_spill] sm:$0xff]  ;;  %v9210_v17 = vld [vmem:[#allocation118_spill] sm:$0xff] }
 0x2f0   :  { %v3254_v34 = vadd.f32 %v6546_v40, %v2998_v38  ;;  %v1338_v31 = vsel %vm1337_vm7, %v9177_v1, %v9201_v46  ;;  %v1654_v21 = vadd.f32 %v9180_v39, %v9202_v53  ;;  %v2880_v51 = vsel %vm150_vm5, %v3613_v11, 0.0  ;;  %v9212_v40 = vld [vmem:[#allocation116_spill] sm:$0xff]  ;;  %vm1277_vm13 = vmor %vm1275_vm8, %vm1276_vm6 }
 0x2f1   :  { %v3253_v30 = vadd.f32 %v6529_v60, %v2997_v33  ;;  %v9205_v60 = vld [vmem:[#allocation188_spill] sm:$0xff]  ;;  %v1659_v1 = vand.u32 2147483647, %v9185_v3  ;;  %v9206_v37 = vand.u32 2147483647, %v9199_v59  ;;  %vm1595_vm4 = vweird.f32 %v9209_v61 }
 0x2f2   :  { %v3286_v47 = vmul.f32 2.0, %v3254_v34  ;;  %v1343_v35 = vsel %vm7286_vm14, %v9205_v60, %v1338_v31  ;;  %v1658_v36 = vsel %vm7340_vm9, %v9180_v39, %v1654_v21  ;;  %v2879_v41 = vsel %vm150_vm5, %v3612_v2, 0.0  ;;  %v4006_v38 = vpop.eup %4005  ;;  %vm1597_vm6 = vmor %vm1595_vm4, %vm1596_vm12 }
 0x2f3   :  { %vm7352_vm10 = vcmp.eq.f32.partialorder %v9206_v37, 8.507059e+37  ;;  %v3285_v27 = vmul.f32 2.0, %v3253_v30  ;;  %v1344_v12 = vmul.f32 %v1343_v35, %v9210_v17  ;;  %vm1660_vm11 = vcmp.eq.f32.partialorder %v1659_v1, 8.507059e+37  ;;  %v4069_v30 = vld [vmem:[#allocation2 + $0x10] sm:$0xff]  ;;  %v9215_v17 = vld [vmem:[#allocation147_spill] sm:$0xff] }
 0x2f4   :  { %v3318_v3 = vadd.f32 %v3286_v47, %v600_v56  ;;  %v2911_v9 = vadd.f32 %v2879_v41, %v7037_v25  ;;  %v2912_v13 = vadd.f32 %v2880_v51, %v7035_v48  ;;  %v556_v34 = vmul.f32 0.6931472, %v4006_v38  ;;  %v4008_v31 = vpop.eup %4007  ;;  %v4070_v25 = vld [vmem:[#allocation2 + $0x18] sm:$0xff]  ;;  %v3591_v38 = vpop.permute.xlu0 %3590 }
 0x2f5   :  { %v3317_v33 = vadd.f32 %v3285_v27, %v599_v32  ;;  %v1663_v11 = vsel %vm1660_vm11, %v9211_v54, %v1658_v36  ;;  %v441_v46 = vmax.f32 %v4069_v30, 0.0  ;;  %v558_v47 = vmul.f32 0.6931472, %v4008_v31  ;;  %v9222_v54 = vld [vmem:[#allocation94_spill] sm:$0xff]  ;;  %v9226_v31 = vld [vmem:[#allocation111_spill] sm:$0xff] }
 0x2f6   :  { %v3350_v53 = vsub.f32 %v3318_v3, %v1815_v8  ;;  %v1664_v39 = vmul.f32 %v1663_v11, %v9212_v40  ;;  %v2975_v21 = vmul.f32 %v2911_v9, %v6527_v44  ;;  %v2976_v2 = vmul.f32 %v2912_v13, %v6477_v19  ;;  %v9218_v3 = vld [vmem:[#allocation137_spill] sm:$0xff]  ;;  %v9219_v9 = vld [vmem:[#allocation154_spill] sm:$0xff]  ;;  %v9220_v13 = vld [vmem:[#allocation100_spill] sm:$0xff] }
 0x2f7   :  { %v3349_v56 = vsub.f32 %v3317_v33, %v1815_v8  ;;  %v609_v60 = vadd.f32 %v556_v34, %v513_v29  ;;  %v442_v35 = vmax.f32 %v4070_v25, 0.0  ;;  %v9213_v32 = vmax.f32 %v6527_v44, 0.0  ;;  %v9216_v29 = vld [vmem:[#allocation15_spill] sm:$0xff] }
 0x2f8   :  { %v7369_v48 = vadd.f32 %v1664_v39, %v1344_v12  ;;  %v9214_v1 = vmax.f32 %v6477_v19, 0.0  ;;  %v473_v27 = vmul.f32 %v4069_v30, %v9081_v10  ;;  %vm1306_vm14 = vweird.f32 %v9215_v17  ;;  %v9217_v12 = vld [vmem:[#allocation20_spill] sm:$0xff] }
 0x2f9   :  { %v3007_v51 = vsub.f32 %v9213_v32, %v2975_v21  ;;  %v7377_v36 = vadd.f32 %v3350_v53, %v3349_v56  ;;  %v610_v41 = vadd.f32 %v558_v47, %v514_v52  ;;  %v474_v8 = vmul.f32 %v4070_v25, %v9096_v20  ;;  %v9227_v39 = vld [vmem:[#allocation144_spill] sm:$0xff] }
 0x2fa   :  { %v3008_v37 = vsub.f32 %v9214_v1, %v2976_v2  ;;  %4009 = vlog2.f32 %v9216_v29  ;;  %v505_v10 = vsub.f32 %v441_v46, %v473_v27  ;;  %vm1305_vm15 = vweird.f32 %v9218_v3  ;;  %v4071_v1 = vld [vmem:[#allocation2 + $0x30] sm:$0xff]  ;;  %v9245_v46 = vld [vmem:[#allocation115_spill] sm:$0xff] }
 0x2fb   :  { %v3263_v19 = vadd.f32 %v6647_v23, %v3007_v51  ;;  %4011 = vlog2.f32 %v9217_v12  ;;  %v506_v52 = vsub.f32 %v442_v35, %v474_v8  ;;  %v1278_v20 = vsel %vm1277_vm13, %v9196_v58, %v9219_v9  ;;  %v9229_v35 = vld [vmem:[#allocation109_spill] sm:$0xff] }
 0x2fc   :  { %v3264_v44 = vadd.f32 %v6593_v45, %v3008_v37  ;;  %v1594_v33 = vadd.f32 %v9200_v55, %v9220_v13  ;;  %v1599_v34 = vand.u32 2147483647, %v9209_v61  ;;  %v9221_v45 = vld [vmem:[#allocation153_spill] sm:$0xff]  ;;  %v1283_v11 = vsel %vm7352_vm10, %v9222_v54, %v1278_v20  ;;  %vm1307_vm10 = vmor %vm1305_vm15, %vm1306_vm14 }
 0x2fd   :  { %vm1626_vm7 = vweird.f32 %v9221_v45  ;;  %v3295_v23 = vmul.f32 2.0, %v3263_v19  ;;  %v3593_v30 = vunpack.i.h.bf16 %v3591_v38  ;;  %v9223_v58 = vand.u32 2147483647, %v9218_v3  ;;  %v4072_v9 = vld [vmem:[#allocation2 + $0x38] sm:$0xff]  ;;  %v9238_v3 = vld [vmem:[#allocation240_spill] sm:$0xff] }
 0x2fe   :  { %v3296_v59 = vmul.f32 2.0, %v3264_v44  ;;  %v1284_v53 = vmul.f32 %v1283_v11, %v9226_v31  ;;  %v1598_v61 = vsel %vm1597_vm6, %v9200_v55, %v1594_v33  ;;  %vm1600_vm12 = vcmp.eq.f32.partialorder %v1599_v34, 8.507059e+37  ;;  %v9231_v33 = vld [vmem:[#allocation37_spill] sm:$0xff] }
 0x2ff   :  { %vm7404_vm8 = vcmp.eq.f32.partialorder %v9223_v58, 8.507059e+37  ;;  %v3592_v40 = vunpack.i.l.bf16 %v3591_v38  ;;  %vm1625_vm9 = vweird.f32 %v9227_v39  ;;  %v7411_v21 = vadd.f32 %v3295_v23, %v609_v60  ;;  %v3601_v38 = vpop.permute.xlu1 %3600 }
 0x300   :  { %v7413_v2 = vadd.f32 %v3296_v59, %v610_v41  ;;  %v1603_v56 = vsel %vm1600_vm12, %v9228_v24, %v1598_v61  ;;  %v2872_v47 = vsel %vm150_vm5, %v3593_v30, 0.0  ;;  %v4010_v25 = vpop.eup %4009  ;;  %v445_v37 = vmax.f32 %v4071_v1, 0.0  ;;  %vm7460_vm11 = vmor %vm1625_vm9, %vm1626_vm7 }
 0x301   :  { %v1604_v32 = vmul.f32 %v1603_v56, %v9229_v35  ;;  %v2904_v51 = vadd.f32 %v2872_v47, %v6863_v4  ;;  %v2871_v55 = vsel %vm150_vm5, %v3592_v40, 0.0  ;;  %v4012_v27 = vpop.eup %4011  ;;  %v3359_v60 = vsub.f32 %v7411_v21, %v7369_v48  ;;  %v9230_v4 = vld [vmem:[#allocation235_spill] sm:$0xff]  ;;  %v9239_v35 = vld [vmem:[#allocation157_spill] sm:$0xff] }
 0x302   :  { %v3360_v41 = vsub.f32 %v7413_v2, %v7369_v48  ;;  %v540_v8 = vmul.f32 0.6931472, %v4010_v25  ;;  %v2903_v29 = vadd.f32 %v2871_v55, %v6905_v43  ;;  %v542_v19 = vmul.f32 0.6931472, %v4012_v27  ;;  %v9233_v43 = vld [vmem:[#allocation25_spill] sm:$0xff]  ;;  %v9237_v56 = vld [vmem:[#allocation167_spill] sm:$0xff] }
 0x303   :  { %v7427_v44 = vadd.f32 %v1604_v32, %v1284_v53  ;;  %v2968_v12 = vmul.f32 %v2904_v51, %v9230_v4  ;;  %v446_v20 = vmax.f32 %v4072_v9, 0.0  ;;  %v477_v23 = vmul.f32 %v4071_v1, %v9009_v49  ;;  %v9235_v49 = vld [vmem:[#allocation24_spill] sm:$0xff]  ;;  %v9360_v48 = vld [vmem:[#allocation43_spill] sm:$0xff] }
 0x304   :  { %v601_v13 = vadd.f32 %v540_v8, %v505_v10  ;;  %v2967_v34 = vmul.f32 %v2903_v29, %v9231_v33  ;;  %v478_v59 = vmul.f32 %v4072_v9, %v9010_v18  ;;  %v602_v54 = vadd.f32 %v542_v19, %v506_v52  ;;  %v9236_v18 = vld [vmem:[#allocation41_spill] sm:$0xff]  ;;  %v9240_v51 = vld [vmem:[#allocation168_spill] sm:$0xff] }
 0x305   :  { %v9232_v11 = vmax.f32 %v9230_v4, 0.0  ;;  %4013 = vlog2.f32 %v9233_v43  ;;  %v3603_v58 = vunpack.i.h.bf16 %v3601_v38  ;;  %v9234_v10 = vmax.f32 %v9231_v33, 0.0  ;;  %v9253_v43 = vld [vmem:[#allocation87_spill] sm:$0xff] }
 0x306   :  { %v509_v53 = vsub.f32 %v445_v37, %v477_v23  ;;  %v510_v61 = vsub.f32 %v446_v20, %v478_v59  ;;  %4015 = vlog2.f32 %v9235_v49  ;;  %vm1381_vm4 = vweird.f32 %v9236_v18  ;;  %v9244_v37 = vld [vmem:[#allocation202_spill] sm:$0xff] }
 0x307   :  { %v3000_v30 = vsub.f32 %v9232_v11, %v2968_v12  ;;  %v2999_v31 = vsub.f32 %v9234_v10, %v2967_v34  ;;  %v2876_v40 = vsel %vm150_vm5, %v3603_v58, 0.0  ;;  %v3602_v24 = vunpack.i.l.bf16 %v3601_v38  ;;  %v9246_v38 = vld [vmem:[#allocation11_spill] sm:$0xff]  ;;  %v9247_v12 = vld [vmem:[#allocation270_spill] sm:$0xff] }
 0x308   :  { %v1308_v47 = vsel %vm1307_vm10, %v9215_v17, %v9237_v56  ;;  %v1624_v55 = vadd.f32 %v9221_v45, %v9240_v51  ;;  %v1629_v1 = vand.u32 2147483647, %v9227_v39  ;;  %v9243_v17 = vld [vmem:[#allocation184_spill] sm:$0xff]  ;;  %vm1701_vm13 = vweird.f32 %v9244_v37  ;;  %v9251_v23 = vld [vmem:[#allocation190_spill] sm:$0xff] }
 0x309   :  { %v3256_v52 = vadd.f32 %v6551_v42, %v3000_v30  ;;  %v3255_v25 = vadd.f32 %v9238_v3, %v2999_v31  ;;  %v1313_v32 = vsel %vm7404_vm8, %v9239_v35, %v1308_v47  ;;  %vm1380_vm14 = vweird.f32 %v9243_v17  ;;  %v9252_v11 = vld [vmem:[#allocation158_spill] sm:$0xff]  ;;  %v9255_v56 = vld [vmem:[#allocation232_spill] sm:$0xff] }
 0x30a   :  { %v1314_v8 = vmul.f32 %v1313_v32, %v9245_v46  ;;  %v2875_v29 = vsel %vm150_vm5, %v3602_v24, 0.0  ;;  %v2908_v19 = vadd.f32 %v2876_v40, %v9246_v38  ;;  %v1628_v39 = vsel %vm7460_vm11, %v9221_v45, %v1624_v55  ;;  %v4073_v10 = vld [vmem:[#allocation2 + $0x80] sm:$0xff]  ;;  %v3626_v55 = vpop.permute.xlu2 %3625  ;;  %vm1382_vm9 = vmor %vm1380_vm14, %vm1381_vm4 }
 0x30b   :  { %v3288_v27 = vmul.f32 2.0, %v3256_v52  ;;  %v3287_v4 = vmul.f32 2.0, %v3255_v25  ;;  %vm1630_vm15 = vcmp.eq.f32.partialorder %v1629_v1, 8.507059e+37  ;;  %v2907_v9 = vadd.f32 %v2875_v29, %v9247_v12  ;;  %v4014_v20 = vpop.eup %4013  ;;  %v9254_v40 = vld [vmem:[#allocation114_spill] sm:$0xff] }
 0x30c   :  { %v9248_v33 = vand.u32 2147483647, %v9243_v17  ;;  %vm1700_vm7 = vweird.f32 %v9251_v23  ;;  %v1633_v30 = vsel %vm1630_vm15, %v9252_v11, %v1628_v39  ;;  %v2972_v58 = vmul.f32 %v2908_v19, %v9253_v43  ;;  %v4016_v45 = vpop.eup %4015  ;;  %v9258_v29 = vld [vmem:[#allocation166_spill] sm:$0xff]  ;;  %v9259_v19 = vld [vmem:[#allocation247_spill] sm:$0xff]  ;;  %v9271_v17 = vld [vmem:[#allocation212_spill] sm:$0xff] }
 0x30d   :  { %v3320_v59 = vadd.f32 %v3288_v27, %v602_v54  ;;  %v455_v31 = vmax.f32 %v4073_v10, 0.0  ;;  %v3319_v49 = vadd.f32 %v3287_v4, %v601_v13  ;;  %v548_v52 = vmul.f32 0.6931472, %v4014_v20  ;;  %v4074_v54 = vld [vmem:[#allocation2 + $0x88] sm:$0xff]  ;;  %vm1702_vm4 = vmor %vm1700_vm7, %vm1701_vm13 }
 0x30e   :  { %vm7476_vm6 = vcmp.eq.f32.partialorder %v9248_v33, 8.507059e+37  ;;  %v1634_v24 = vmul.f32 %v1633_v30, %v9254_v40  ;;  %v2971_v47 = vmul.f32 %v2907_v9, %v9255_v56  ;;  %v550_v25 = vmul.f32 0.6931472, %v4016_v45  ;;  %v9260_v39 = vld [vmem:[#allocation55_spill] sm:$0xff]  ;;  %v9261_v9 = vld [vmem:[#allocation53_spill] sm:$0xff]  ;;  %v9265_v45 = vld [vmem:[#allocation46_spill] sm:$0xff] }
 0x30f   :  { %v3352_v3 = vsub.f32 %v3320_v59, %v7427_v44  ;;  %v9256_v35 = vmax.f32 %v9253_v43, 0.0  ;;  %v456_v51 = vmax.f32 %v4074_v54, 0.0  ;;  %v3351_v1 = vsub.f32 %v3319_v49, %v7427_v44  ;;  %v9262_v59 = vld [vmem:[#allocation246_spill] sm:$0xff]  ;;  %v9263_v30 = vld [vmem:[#allocation47_spill] sm:$0xff] }
 0x310   :  { %v605_v42 = vadd.f32 %v548_v52, %v509_v53  ;;  %v1818_v27 = vadd.f32 %v1634_v24, %v1314_v8  ;;  %v9257_v13 = vmax.f32 %v9255_v56, 0.0  ;;  %vm1321_vm8 = vweird.f32 %v9258_v29  ;;  %v9264_v53 = vld [vmem:[#allocation156_spill] sm:$0xff]  ;;  %v9270_v56 = vld [vmem:[#allocation61_spill] sm:$0xff] }
 0x311   :  { %v3004_v32 = vsub.f32 %v9256_v35, %v2972_v58  ;;  %v606_v38 = vadd.f32 %v550_v25, %v510_v61  ;;  %v487_v12 = vmul.f32 %v4073_v10, %v9260_v39  ;;  %v488_v20 = vmul.f32 %v4074_v54, %v9261_v9  ;;  %v9277_v39 = vld [vmem:[#allocation62_spill] sm:$0xff] }
 0x312   :  { %v3003_v46 = vsub.f32 %v9257_v13, %v2971_v47  ;;  %v3382_v33 = vadd.f32 %v7377_v36, %v3351_v1  ;;  %4017 = vlog2.f32 %v9263_v30  ;;  %v3628_v44 = vunpack.i.h.bf16 %v3626_v55  ;;  %v9274_v1 = vld [vmem:[#allocation159_spill] sm:$0xff]  ;;  %v9280_v30 = vld [vmem:[#allocation98_spill] sm:$0xff] }
 0x313   :  { %v3260_v4 = vadd.f32 %v9259_v19, %v3004_v32  ;;  %vm1320_vm12 = vweird.f32 %v9264_v53  ;;  %v519_v43 = vsub.f32 %v455_v31, %v487_v12  ;;  %v520_v58 = vsub.f32 %v456_v51, %v488_v20  ;;  %v9269_v31 = vld [vmem:[#allocation171_spill] sm:$0xff]  ;;  %v9273_v51 = vld [vmem:[#allocation50_spill] sm:$0xff]  ;;  %v9278_v12 = vld [vmem:[#allocation77_spill] sm:$0xff] }
 0x314   :  { %v3259_v11 = vadd.f32 %v9262_v59, %v3003_v46  ;;  %4019 = vlog2.f32 %v9265_v45  ;;  %v3383_v61 = vadd.f32 %v3382_v33, %v3352_v3  ;;  %v2886_v36 = vsel %vm150_vm5, %v3628_v44, 0.0  ;;  %v9275_v46 = vld [vmem:[#allocation123_spill] sm:$0xff]  ;;  %v9279_v59 = vld [vmem:[#allocation122_spill] sm:$0xff]  ;;  %vm7549_vm15 = vmor %vm1320_vm12, %vm1321_vm8 }
 0x315   :  { %v3292_v8 = vmul.f32 2.0, %v3260_v4  ;;  %v3627_v49 = vunpack.i.l.bf16 %v3626_v55  ;;  %v9266_v52 = vand.u32 2147483647, %v9264_v53  ;;  %vm1641_vm11 = vweird.f32 %v9269_v31  ;;  %v9291_v53 = vld [vmem:[#allocation185_spill] sm:$0xff] }
 0x316   :  { %v3291_v10 = vmul.f32 2.0, %v3259_v11  ;;  %v1383_v47 = vsel %vm1382_vm9, %v9236_v18, %v9270_v56  ;;  %v1699_v3 = vadd.f32 %v9244_v37, %v9271_v17  ;;  %v1704_v25 = vand.u32 2147483647, %v9251_v23 }
 0x317   :  { %vm7508_vm10 = vcmp.eq.f32.partialorder %v9266_v52, 8.507059e+37  ;;  %v3324_v24 = vadd.f32 %v3292_v8, %v606_v38  ;;  %v9272_v35 = vsub.f32 %v7266_v57, %v7245_v16  ;;  %v1388_v55 = vsel %vm7476_vm6, %v9273_v51, %v1383_v47  ;;  %v4075_v8 = vld [vmem:[#allocation2 + $0x40] sm:$0xff] }
 0x318   :  { %v3323_v54 = vadd.f32 %v3291_v10, %v605_v42  ;;  %v2885_v18 = vsel %vm150_vm5, %v3627_v49, 0.0  ;;  %vm1640_vm14 = vweird.f32 %v9274_v1  ;;  %v1389_v38 = vmul.f32 %v1388_v55, %v9275_v46  ;;  %v4018_v19 = vpop.eup %4017  ;;  %v9281_v10 = vld [vmem:[#allocation238_spill] sm:$0xff]  ;;  %v4076_v49 = vld [vmem:[#allocation2 + $0x48] sm:$0xff] }
 0x319   :  { %v3384_v32 = vadd.f32 %v3383_v61, %v9272_v35  ;;  %v3356_v13 = vsub.f32 %v3324_v24, %v1818_v27  ;;  %v1703_v23 = vsel %vm1702_vm4, %v9244_v37, %v1699_v3  ;;  %vm1705_vm13 = vcmp.eq.f32.partialorder %v1704_v25, 8.507059e+37  ;;  %v9282_v24 = vld [vmem:[#allocation242_spill] sm:$0xff]  ;;  %v9286_v3 = vld [vmem:[#allocation172_spill] sm:$0xff]  ;;  %vm1642_vm12 = vmor %vm1640_vm14, %vm1641_vm11 }
 0x31a   :  { %v3355_v4 = vsub.f32 %v3323_v54, %v1818_v27  ;;  %v9276_v57 = vsub.f32 %v7262_v28, %v7245_v16  ;;  %v1708_v34 = vsel %vm1705_vm13, %v9277_v39, %v1703_v23  ;;  %v2917_v9 = vadd.f32 %v2885_v18, %v9278_v12  ;;  %v4020_v20 = vpop.eup %4019  ;;  %v9283_v47 = vld [vmem:[#allocation26_spill] sm:$0xff]  ;;  %v9288_v54 = vld [vmem:[#allocation39_spill] sm:$0xff]  ;;  %v9296_v12 = vld [vmem:[#allocation176_spill] sm:$0xff] }
 0x31b   :  { %v568_v33 = vmul.f32 0.6931472, %v4018_v19  ;;  %v1709_v11 = vmul.f32 %v1708_v34, %v9279_v59  ;;  %v2918_v44 = vadd.f32 %v2886_v36, %v9280_v30  ;;  %v447_v45 = vmax.f32 %v4075_v8, 0.0  ;;  %v3606_v19 = vpop.permute.xlu0 %3605  ;;  %v9295_v39 = vld [vmem:[#allocation178_spill] sm:$0xff] }
 0x31c   :  { %v3385_v42 = vadd.f32 %v3384_v32, %v9276_v57  ;;  %v570_v61 = vmul.f32 0.6931472, %v4020_v20  ;;  %v2981_v27 = vmul.f32 %v2917_v9, %v9281_v10  ;;  %v448_v52 = vmax.f32 %v4076_v49, 0.0  ;;  %v9297_v9 = vld [vmem:[#allocation254_spill] sm:$0xff] }
 0x31d   :  { %v615_v16 = vadd.f32 %v568_v33, %v519_v43  ;;  %v7541_v28 = vadd.f32 %v1709_v11, %v1389_v38  ;;  %v2982_v56 = vmul.f32 %v2918_v44, %v9282_v24  ;;  %v479_v17 = vmul.f32 %v4075_v8, %v9283_v47  ;;  %v9290_v38 = vld [vmem:[#allocation22_spill] sm:$0xff]  ;;  %v9298_v33 = vld [vmem:[#allocation119_spill] sm:$0xff] }
 0x31e   :  { %v3386_v37 = vadd.f32 %v3385_v42, %v3355_v4  ;;  %vm1351_vm6 = vweird.f32 %v9286_v3  ;;  %v616_v35 = vadd.f32 %v570_v61, %v520_v58  ;;  %v9287_v43 = vmax.f32 %v9281_v10, 0.0  ;;  %v9293_v58 = vld [vmem:[#allocation23_spill] sm:$0xff]  ;;  %v9294_v42 = vld [vmem:[#allocation30_spill] sm:$0xff] }
 0x31f   :  { %v480_v51 = vmul.f32 %v4076_v49, %v9288_v54  ;;  %v9289_v55 = vmax.f32 %v9282_v24, 0.0  ;;  %v511_v46 = vsub.f32 %v447_v45, %v479_v17  ;;  %4021 = vlog2.f32 %v9290_v38  ;;  %v9299_v11 = vld [vmem:[#allocation187_spill] sm:$0xff]  ;;  %v4077_v61 = vld [vmem:[#allocation2 + $0x60] sm:$0xff]  ;;  %v9307_v38 = vld [vmem:[#allocation277_spill] sm:$0xff] }
 0x320   :  { %v7554_v25 = vadd.f32 %v3386_v37, %v3356_v13  ;;  %v3013_v32 = vsub.f32 %v9287_v43, %v2981_v27  ;;  %v1323_v23 = vsel %vm7549_vm15, %v9258_v29, %v9291_v53  ;;  %v9292_v13 = vld [vmem:[#allocation160_spill] sm:$0xff]  ;;  %4023 = vlog2.f32 %v9294_v42  ;;  %v9303_v27 = vld [vmem:[#allocation163_spill] sm:$0xff] }
 0x321   :  { %v3014_v18 = vsub.f32 %v9289_v55, %v2982_v56  ;;  %vm1350_vm7 = vweird.f32 %v9292_v13  ;;  %v512_v57 = vsub.f32 %v448_v52, %v480_v51  ;;  %v1328_v34 = vsel %vm7508_vm10, %v9295_v39, %v1323_v23  ;;  %v4078_v24 = vld [vmem:[#allocation2 + $0x68] sm:$0xff]  ;;  %v9305_v51 = vld [vmem:[#allocation117_spill] sm:$0xff]  ;;  %v9309_v42 = vld [vmem:[#allocation44_spill] sm:$0xff] }
 0x322   :  { %v3269_v4 = vadd.f32 %v9293_v58, %v3013_v32  ;;  %vm1671_vm8 = vweird.f32 %v9296_v12  ;;  %v1329_v59 = vmul.f32 %v1328_v34, %v9298_v33  ;;  %v1639_v29 = vadd.f32 %v9269_v31, %v9299_v11  ;;  %v9304_v47 = vld [vmem:[#allocation179_spill] sm:$0xff]  ;;  %v9308_v58 = vld [vmem:[#allocation48_spill] sm:$0xff]  ;;  %v3616_v34 = vpop.permute.xlu1 %3615  ;;  %vm1352_vm11 = vmor %vm1350_vm7, %vm1351_vm6 }
 0x323   :  { %v3270_v20 = vadd.f32 %v9297_v9, %v3014_v18  ;;  %v1644_v30 = vand.u32 2147483647, %v9274_v1  ;;  %v9300_v44 = vand.u32 2147483647, %v9292_v13  ;;  %v3608_v45 = vunpack.i.h.bf16 %v3606_v19  ;;  %v9306_v18 = vld [vmem:[#allocation38_spill] sm:$0xff]  ;;  %v9310_v33 = vld [vmem:[#allocation236_spill] sm:$0xff] }
 0x324   :  { %v3301_v8 = vmul.f32 2.0, %v3269_v4  ;;  %v3607_v37 = vunpack.i.l.bf16 %v3606_v19  ;;  %v451_v10 = vmax.f32 %v4077_v61, 0.0  ;;  %vm1670_vm10 = vweird.f32 %v9303_v27  ;;  %v9318_v13 = vld [vmem:[#allocation250_spill] sm:$0xff] }
 0x325   :  { %vm7584_vm9 = vcmp.eq.f32.partialorder %v9300_v44, 8.507059e+37  ;;  %v3302_v49 = vmul.f32 2.0, %v3270_v20  ;;  %v1643_v52 = vsel %vm1642_vm12, %v9269_v31, %v1639_v29  ;;  %vm1645_vm4 = vcmp.eq.f32.partialorder %v1644_v30, 8.507059e+37  ;;  %v4022_v32 = vpop.eup %4021  ;;  %v9311_v30 = vld [vmem:[#allocation237_spill] sm:$0xff]  ;;  %vm7637_vm13 = vmor %vm1670_vm10, %vm1671_vm8 }
 0x326   :  { %v452_v1 = vmax.f32 %v4078_v24, 0.0  ;;  %v7590_v56 = vadd.f32 %v3301_v8, %v615_v16  ;;  %v1648_v17 = vsel %vm1645_vm4, %v9304_v47, %v1643_v52  ;;  %v2878_v36 = vsel %vm150_vm5, %v3608_v45, 0.0  ;;  %v4024_v23 = vpop.eup %4023  ;;  %v9313_v52 = vld [vmem:[#allocation42_spill] sm:$0xff] }
 0x327   :  { %v2877_v43 = vsel %vm150_vm5, %v3607_v37, 0.0  ;;  %v7597_v54 = vadd.f32 %v3302_v49, %v616_v35  ;;  %v1649_v55 = vmul.f32 %v1648_v17, %v9305_v51  ;;  %v2910_v31 = vadd.f32 %v2878_v36, %v9306_v18  ;;  %v9316_v17 = vld [vmem:[#allocation34_spill] sm:$0xff] }
 0x328   :  { %v2909_v53 = vadd.f32 %v2877_v43, %v9307_v38  ;;  %v3365_v16 = vsub.f32 %v7590_v56, %v7541_v28  ;;  %v552_v19 = vmul.f32 0.6931472, %v4022_v32  ;;  %v483_v4 = vmul.f32 %v4077_v61, %v9308_v58  ;;  %v9319_v32 = vld [vmem:[#allocation180_spill] sm:$0xff]  ;;  %v9324_v38 = vld [vmem:[#allocation215_spill] sm:$0xff] }
 0x329   :  { %v484_v39 = vmul.f32 %v4078_v24, %v9309_v42  ;;  %v3366_v35 = vsub.f32 %v7597_v54, %v7541_v28  ;;  %v554_v9 = vmul.f32 0.6931472, %v4024_v23  ;;  %v7608_v20 = vadd.f32 %v1649_v55, %v1329_v59  ;;  %v9314_v24 = vld [vmem:[#allocation214_spill] sm:$0xff] }
 0x32a   :  { %v2974_v11 = vmul.f32 %v2910_v31, %v9310_v33  ;;  %v607_v29 = vadd.f32 %v552_v19, %v511_v46  ;;  %v2973_v44 = vmul.f32 %v2909_v53, %v9311_v30  ;;  %v515_v8 = vsub.f32 %v451_v10, %v483_v4  ;;  %v9320_v55 = vld [vmem:[#allocation194_spill] sm:$0xff]  ;;  %v9325_v53 = vld [vmem:[#allocation243_spill] sm:$0xff]  ;;  %v9326_v19 = vld [vmem:[#allocation121_spill] sm:$0xff] }
 0x32b   :  { %v516_v45 = vsub.f32 %v452_v1, %v484_v39  ;;  %v608_v37 = vadd.f32 %v554_v9, %v512_v57  ;;  %v9312_v61 = vmax.f32 %v9310_v33, 0.0  ;;  %4025 = vlog2.f32 %v9313_v52  ;;  %v9317_v1 = vld [vmem:[#allocation192_spill] sm:$0xff]  ;;  %v9328_v33 = vld [vmem:[#allocation275_spill] sm:$0xff] }
 0x32c   :  { %v3618_v59 = vunpack.i.h.bf16 %v3616_v34  ;;  %vm1426_vm14 = vweird.f32 %v9314_v24  ;;  %v9315_v46 = vmax.f32 %v9311_v30, 0.0  ;;  %4027 = vlog2.f32 %v9316_v17  ;;  %v9333_v17 = vld [vmem:[#allocation182_spill] sm:$0xff] }
 0x32d   :  { %v3006_v49 = vsub.f32 %v9312_v61, %v2974_v11  ;;  %v3617_v10 = vunpack.i.l.bf16 %v3616_v34  ;;  %v1353_v36 = vsel %vm1352_vm11, %v9286_v3, %v9317_v1  ;;  %v1669_v18 = vadd.f32 %v9296_v12, %v9320_v55  ;;  %v9323_v3 = vld [vmem:[#allocation206_spill] sm:$0xff]  ;;  %v9327_v34 = vld [vmem:[#allocation276_spill] sm:$0xff]  ;;  %v9332_v61 = vld [vmem:[#allocation207_spill] sm:$0xff] }
 0x32e   :  { %v3005_v47 = vsub.f32 %v9315_v46, %v2973_v44  ;;  %v2882_v57 = vsel %vm150_vm5, %v3618_v59, 0.0  ;;  %v1358_v51 = vsel %vm7584_vm9, %v9319_v32, %v1353_v36  ;;  %vm1425_vm15 = vweird.f32 %v9323_v3  ;;  %v4080_v59 = vld [vmem:[#allocation2 + $0xb8] sm:$0xff]  ;;  %v9336_v55 = vld [vmem:[#allocation120_spill] sm:$0xff] }
 0x32f   :  { %v3262_v43 = vadd.f32 %v9318_v13, %v3006_v49  ;;  %vm1746_vm6 = vweird.f32 %v9324_v38  ;;  %v1359_v40 = vmul.f32 %v1358_v51, %v9326_v19  ;;  %v1674_v58 = vand.u32 2147483647, %v9303_v27  ;;  %v4079_v49 = vld [vmem:[#allocation2 + $0xb0] sm:$0xff]  ;;  %v9334_v1 = vld [vmem:[#allocation241_spill] sm:$0xff]  ;;  %vm1427_vm4 = vmor %vm1425_vm15, %vm1426_vm14 }
 0x330   :  { %v3261_v23 = vadd.f32 %v9325_v53, %v3005_v47  ;;  %v2881_v4 = vsel %vm150_vm5, %v3617_v10, 0.0  ;;  %v1673_v39 = vsel %vm7637_vm13, %v9296_v12, %v1669_v18  ;;  %v2914_v11 = vadd.f32 %v2882_v57, %v9328_v33  ;;  %v9335_v13 = vld [vmem:[#allocation244_spill] sm:$0xff]  ;;  %v9339_v33 = vld [vmem:[#allocation181_spill] sm:$0xff] }
 0x331   :  { %v3294_v42 = vmul.f32 2.0, %v3262_v43  ;;  %v2913_v9 = vadd.f32 %v2881_v4, %v9327_v34  ;;  %v9329_v30 = vand.u32 2147483647, %v9323_v3  ;;  %vm1745_vm8 = vweird.f32 %v9332_v61  ;;  %v4026_v47 = vpop.eup %4025 }
 0x332   :  { %v3293_v27 = vmul.f32 2.0, %v3261_v23  ;;  %vm1675_vm12 = vcmp.eq.f32.partialorder %v1674_v58, 8.507059e+37  ;;  %v461_v52 = vmax.f32 %v4079_v49, 0.0  ;;  %v462_v46 = vmax.f32 %v4080_v59, 0.0  ;;  %v4028_v57 = vpop.eup %4027  ;;  %vm7700_vm13 = vmor %vm1745_vm8, %vm1746_vm6 }
 0x333   :  { %vm7655_vm7 = vcmp.eq.f32.partialorder %v9329_v30, 8.507059e+37  ;;  %v3326_v12 = vadd.f32 %v3294_v42, %v608_v37  ;;  %v1678_v10 = vsel %vm1675_vm12, %v9333_v17, %v1673_v39  ;;  %v2977_v36 = vmul.f32 %v2913_v9, %v9334_v1  ;;  %v3641_v42 = vpop.permute.xlu2 %3640 }
 0x334   :  { %v2978_v43 = vmul.f32 %v2914_v11, %v9335_v13  ;;  %v3325_v32 = vadd.f32 %v3293_v27, %v607_v29  ;;  %v560_v51 = vmul.f32 0.6931472, %v4026_v47  ;;  %v1679_v18 = vmul.f32 %v1678_v10, %v9336_v55  ;;  %v9341_v27 = vld [vmem:[#allocation256_spill] sm:$0xff]  ;;  %v9342_v10 = vld [vmem:[#allocation65_spill] sm:$0xff] }
 0x335   :  { %v493_v31 = vmul.f32 %v4079_v49, %v9147_v0  ;;  %v3358_v53 = vsub.f32 %v3326_v12, %v7608_v20  ;;  %v562_v23 = vmul.f32 0.6931472, %v4028_v57  ;;  %v9337_v19 = vmax.f32 %v9334_v1, 0.0  ;;  %v9340_v0 = vld [vmem:[#allocation253_spill] sm:$0xff] }
 0x336   :  { %v9338_v37 = vmax.f32 %v9335_v13, 0.0  ;;  %v3357_v39 = vsub.f32 %v3325_v32, %v7608_v20  ;;  %v611_v34 = vadd.f32 %v560_v51, %v515_v8  ;;  %v1821_v9 = vadd.f32 %v1679_v18, %v1359_v40  ;;  %v9344_v8 = vld [vmem:[#allocation64_spill] sm:$0xff]  ;;  %v9345_v40 = vld [vmem:[#allocation189_spill] sm:$0xff] }
 0x337   :  { %v3009_v58 = vsub.f32 %v9337_v19, %v2977_v36  ;;  %v494_v29 = vmul.f32 %v4080_v59, %v9131_v6  ;;  %vm1366_vm9 = vweird.f32 %v9339_v33  ;;  %v612_v11 = vadd.f32 %v562_v23, %v516_v45  ;;  %v9343_v36 = vld [vmem:[#allocation170_spill] sm:$0xff]  ;;  %v9347_v13 = vld [vmem:[#allocation141_spill] sm:$0xff] }
 0x338   :  { %v3010_v4 = vsub.f32 %v9338_v37, %v2978_v43  ;;  %v525_v47 = vsub.f32 %v461_v52, %v493_v31  ;;  %v3388_v12 = vadd.f32 %v7554_v25, %v3357_v39  ;;  %4029 = vlog2.f32 %v9342_v10  ;;  %v9346_v59 = vld [vmem:[#allocation222_spill] sm:$0xff]  ;;  %v9355_v19 = vld [vmem:[#allocation33_spill] sm:$0xff] }
 0x339   :  { %v3265_v30 = vadd.f32 %v9340_v0, %v3009_v58  ;;  %v526_v17 = vsub.f32 %v462_v46, %v494_v29  ;;  %v3643_v1 = vunpack.i.h.bf16 %v3641_v42  ;;  %vm1365_vm10 = vweird.f32 %v9343_v36  ;;  %v4082_v10 = vld [vmem:[#allocation2 + $0x78] sm:$0xff] }
 0x33a   :  { %v3266_v49 = vadd.f32 %v9341_v27, %v3010_v4  ;;  %4031 = vlog2.f32 %v9344_v8  ;;  %v3642_v45 = vunpack.i.l.bf16 %v3641_v42  ;;  %vm1686_vm11 = vweird.f32 %v9345_v40  ;;  %v9357_v27 = vld [vmem:[#allocation35_spill] sm:$0xff] }
 0x33b   :  { %v3297_v6 = vmul.f32 2.0, %v3265_v30  ;;  %v3389_v52 = vadd.f32 %v3388_v12, %v3358_v53  ;;  %v2892_v25 = vsel %vm150_vm5, %v3643_v1, 0.0  ;;  %v1428_v46 = vsel %vm1427_vm4, %v9314_v24, %v9346_v59  ;;  %v9353_v24 = vld [vmem:[#allocation68_spill] sm:$0xff]  ;;  %v9354_v53 = vld [vmem:[#allocation175_spill] sm:$0xff] }
 0x33c   :  { %v3298_v20 = vmul.f32 2.0, %v3266_v49  ;;  %v1744_v43 = vadd.f32 %v9324_v38, %v9347_v13  ;;  %v9348_v3 = vand.u32 2147483647, %v9343_v36  ;;  %v1433_v18 = vsel %vm7655_vm7, %v9353_v24, %v1428_v46  ;;  %v9358_v12 = vld [vmem:[#allocation88_spill] sm:$0xff]  ;;  %vm7737_vm7 = vmor %vm1365_vm10, %vm1366_vm9  ;;  %v9365_v13 = vld [vmem:[#allocation191_spill] sm:$0xff] }
 0x33d   :  { %v3329_v51 = vadd.f32 %v3297_v6, %v611_v34  ;;  %v1749_v31 = vand.u32 2147483647, %v9332_v61  ;;  %vm1685_vm15 = vweird.f32 %v9354_v53  ;;  %v3390_v23 = vadd.f32 %v3389_v52, %v3359_v60  ;;  %v9356_v60 = vld [vmem:[#allocation218_spill] sm:$0xff]  ;;  %v9367_v24 = vld [vmem:[#allocation267_spill] sm:$0xff]  ;;  %v9369_v36 = vld [vmem:[#allocation200_spill] sm:$0xff] }
 0x33e   :  { %vm7692_vm14 = vcmp.eq.f32.partialorder %v9348_v3, 8.507059e+37  ;;  %v3330_v55 = vadd.f32 %v3298_v20, %v612_v11  ;;  %v1434_v58 = vmul.f32 %v1433_v18, %v9355_v19  ;;  %v1748_v37 = vsel %vm7700_vm13, %v9324_v38, %v1744_v43  ;;  %v4030_v39 = vpop.eup %4029  ;;  %v4081_v11 = vld [vmem:[#allocation2 + $0x70] sm:$0xff]  ;;  %v9359_v20 = vld [vmem:[#allocation249_spill] sm:$0xff]  ;;  %vm7765_vm10 = vmor %vm1685_vm15, %vm1686_vm11 }
 0x33f   :  { %v2891_v4 = vsel %vm150_vm5, %v3642_v45, 0.0  ;;  %v3361_v42 = vsub.f32 %v3329_v51, %v1821_v9  ;;  %vm1750_vm6 = vcmp.eq.f32.partialorder %v1749_v31, 8.507059e+37  ;;  %v3391_v21 = vadd.f32 %v3390_v23, %v3360_v41  ;;  %v9368_v23 = vld [vmem:[#allocation32_spill] sm:$0xff] }
 0x340   :  { %v3362_v44 = vsub.f32 %v3330_v55, %v1821_v9  ;;  %v2923_v61 = vadd.f32 %v2891_v4, %v7275_v7  ;;  %v1753_v34 = vsel %vm1750_vm6, %v9356_v60, %v1748_v37  ;;  %v2924_v29 = vadd.f32 %v2892_v25, %v7264_v63  ;;  %v4032_v38 = vpop.eup %4031  ;;  %v9362_v25 = vld [vmem:[#allocation56_spill] sm:$0xff]  ;;  %v3621_v55 = vpop.permute.xlu0 %3620  ;;  %v9371_v37 = vld [vmem:[#allocation199_spill] sm:$0xff] }
 0x341   :  { %v453_v0 = vmax.f32 %v4081_v11, 0.0  ;;  %v580_v30 = vmul.f32 0.6931472, %v4030_v39  ;;  %v1754_v49 = vmul.f32 %v1753_v34, %v9357_v27  ;;  %v454_v1 = vmax.f32 %v4082_v10, 0.0  ;;  %v9375_v39 = vld [vmem:[#allocation51_spill] sm:$0xff]  ;;  %v9378_v34 = vld [vmem:[#allocation102_spill] sm:$0xff] }
 0x342   :  { %v2987_v9 = vmul.f32 %v2923_v61, %v9358_v12  ;;  %v3392_v7 = vadd.f32 %v3391_v21, %v3361_v42  ;;  %v582_v6 = vmul.f32 0.6931472, %v4032_v38  ;;  %v2988_v8 = vmul.f32 %v2924_v29, %v9359_v20  ;;  %v9373_v42 = vld [vmem:[#allocation49_spill] sm:$0xff]  ;;  %v9386_v46 = vld [vmem:[#allocation280_spill] sm:$0xff]  ;;  %v9413_v38 = vld [vmem:[#allocation278_spill] sm:$0xff] }
 0x343   :  { %v485_v2 = vmul.f32 %v4081_v11, %v9360_v48  ;;  %v621_v41 = vadd.f32 %v580_v30, %v525_v47  ;;  %v7728_v45 = vadd.f32 %v1754_v49, %v1434_v58  ;;  %v9361_v63 = vmax.f32 %v9358_v12, 0.0  ;;  %v9370_v58 = vld [vmem:[#allocation183_spill] sm:$0xff]  ;;  %v9382_v30 = vld [vmem:[#allocation186_spill] sm:$0xff] }
 0x344   :  { %v486_v59 = vmul.f32 %v4082_v10, %v9362_v25  ;;  %vm1396_vm8 = vweird.f32 %v9365_v13  ;;  %v7742_v43 = vadd.f32 %v3392_v7, %v3362_v44  ;;  %v622_v47 = vadd.f32 %v582_v6, %v526_v17  ;;  %v9372_v17 = vld [vmem:[#allocation12_spill] sm:$0xff]  ;;  %v9374_v44 = vld [vmem:[#allocation197_spill] sm:$0xff] }
 0x345   :  { %v3019_v52 = vsub.f32 %v9361_v63, %v2987_v9  ;;  %v9366_v3 = vmax.f32 %v9359_v20, 0.0  ;;  %v517_v51 = vsub.f32 %v453_v0, %v485_v2  ;;  %4033 = vlog2.f32 %v9368_v23  ;;  %v4083_v9 = vld [vmem:[#allocation2 + $0x90] sm:$0xff]  ;;  %v4084_v7 = vld [vmem:[#allocation2 + $0x98] sm:$0xff]  ;;  %v9388_v23 = vld [vmem:[#allocation75_spill] sm:$0xff] }
 0x346   :  { %v518_v31 = vsub.f32 %v454_v1, %v486_v59  ;;  %v1368_v19 = vsel %vm7737_vm7, %v9339_v33, %v9369_v36  ;;  %vm1395_vm12 = vweird.f32 %v9370_v58  ;;  %vm1716_vm9 = vweird.f32 %v9371_v37  ;;  %v9384_v2 = vld [vmem:[#allocation73_spill] sm:$0xff]  ;;  %v9385_v25 = vld [vmem:[#allocation124_spill] sm:$0xff] }
 0x347   :  { %v3020_v32 = vsub.f32 %v9366_v3, %v2988_v8  ;;  %v3275_v18 = vadd.f32 %v9367_v24, %v3019_v52  ;;  %4035 = vlog2.f32 %v9373_v42  ;;  %v1373_v61 = vsel %vm7692_vm14, %v9374_v44, %v1368_v19  ;;  %v9383_v8 = vld [vmem:[#allocation40_spill] sm:$0xff]  ;;  %v9389_v19 = vld [vmem:[#allocation63_spill] sm:$0xff]  ;;  %v9390_v42 = vld [vmem:[#allocation201_spill] sm:$0xff] }
 0x348   :  { %v1684_v21 = vadd.f32 %v9345_v40, %v9375_v39  ;;  %v1374_v29 = vmul.f32 %v1373_v61, %v9378_v34  ;;  %v1689_v11 = vand.u32 2147483647, %v9354_v53  ;;  %v3623_v0 = vunpack.i.h.bf16 %v3621_v55  ;;  %v9391_v39 = vld [vmem:[#allocation239_spill] sm:$0xff]  ;;  %vm7811_vm15 = vmor %vm1395_vm12, %vm1396_vm8 }
 0x349   :  { %v3276_v4 = vadd.f32 %v9372_v17, %v3020_v32  ;;  %v3307_v60 = vmul.f32 2.0, %v3275_v18  ;;  %v9379_v57 = vand.u32 2147483647, %v9370_v58  ;;  %vm1715_vm14 = vweird.f32 %v9382_v30  ;;  %v9387_v32 = vld [vmem:[#allocation66_spill] sm:$0xff] }
 0x34a   :  { %v1688_v49 = vsel %vm7765_vm10, %v9345_v40, %v1684_v21  ;;  %v3622_v12 = vunpack.i.l.bf16 %v3621_v55  ;;  %v457_v10 = vmax.f32 %v4083_v9, 0.0  ;;  %vm1690_vm11 = vcmp.eq.f32.partialorder %v1689_v11, 8.507059e+37  ;;  %vm7830_vm7 = vmor %vm1715_vm14, %vm1716_vm9 }
 0x34b   :  { %vm7773_vm4 = vcmp.eq.f32.partialorder %v9379_v57, 8.507059e+37  ;;  %v3308_v27 = vmul.f32 2.0, %v3276_v4  ;;  %v7781_v1 = vadd.f32 %v3307_v60, %v621_v41  ;;  %v2884_v53 = vsel %vm150_vm5, %v3623_v0, 0.0  ;;  %v4034_v52 = vpop.eup %4033  ;;  %v3631_v4 = vpop.permute.xlu1 %3630  ;;  %v9393_v57 = vld [vmem:[#allocation60_spill] sm:$0xff] }
 0x34c   :  { %v458_v6 = vmax.f32 %v4084_v7, 0.0  ;;  %v1693_v48 = vsel %vm1690_vm11, %v9383_v8, %v1688_v49  ;;  %v2916_v63 = vadd.f32 %v2884_v53, %v9384_v2  ;;  %v2883_v40 = vsel %vm150_vm5, %v3622_v12, 0.0  ;;  %v9399_v53 = vld [vmem:[#allocation258_spill] sm:$0xff]  ;;  %v9400_v8 = vld [vmem:[#allocation209_spill] sm:$0xff] }
 0x34d   :  { %v7785_v20 = vadd.f32 %v3308_v27, %v622_v47  ;;  %v3371_v41 = vsub.f32 %v7781_v1, %v7728_v45  ;;  %v1694_v59 = vmul.f32 %v1693_v48, %v9385_v25  ;;  %v2915_v3 = vadd.f32 %v2883_v40, %v9386_v46  ;;  %v4036_v24 = vpop.eup %4035  ;;  %v9401_v48 = vld [vmem:[#allocation210_spill] sm:$0xff] }
 0x34e   :  { %v489_v55 = vmul.f32 %v4083_v9, %v9387_v32  ;;  %v564_v18 = vmul.f32 0.6931472, %v4034_v52  ;;  %v2980_v36 = vmul.f32 %v2916_v63, %v9388_v23  ;;  %v490_v17 = vmul.f32 %v4084_v7, %v9389_v19  ;;  %v9398_v9 = vld [vmem:[#allocation57_spill] sm:$0xff]  ;;  %v9407_v52 = vld [vmem:[#allocation134_spill] sm:$0xff] }
 0x34f   :  { %v3372_v47 = vsub.f32 %v7785_v20, %v7728_v45  ;;  %vm1411_vm13 = vweird.f32 %v9390_v42  ;;  %v566_v44 = vmul.f32 0.6931472, %v4036_v24  ;;  %v7801_v61 = vadd.f32 %v1694_v59, %v1374_v29  ;;  %v9396_v29 = vld [vmem:[#allocation45_spill] sm:$0xff]  ;;  %v9409_v46 = vld [vmem:[#allocation54_spill] sm:$0xff] }
 0x350   :  { %v2979_v21 = vmul.f32 %v2915_v3, %v9391_v39  ;;  %v521_v33 = vsub.f32 %v457_v10, %v489_v55  ;;  %v613_v60 = vadd.f32 %v564_v18, %v517_v51  ;;  %v9392_v34 = vmax.f32 %v9388_v23, 0.0  ;;  %v9410_v24 = vld [vmem:[#allocation125_spill] sm:$0xff]  ;;  %v9411_v19 = vld [vmem:[#allocation198_spill] sm:$0xff] }
 0x351   :  { %v522_v0 = vsub.f32 %v458_v6, %v490_v17  ;;  %4037 = vlog2.f32 %v9393_v57  ;;  %vm1410_vm6 = vweird.f32 %v9396_v29  ;;  %v614_v49 = vadd.f32 %v566_v44, %v518_v31  ;;  %v4085_v57 = vld [vmem:[#allocation2 + $0xa0] sm:$0xff] }
 0x352   :  { %v3012_v11 = vsub.f32 %v9392_v34, %v2980_v36  ;;  %v9397_v12 = vmax.f32 %v9391_v39, 0.0  ;;  %4039 = vlog2.f32 %v9398_v9  ;;  %v3633_v10 = vunpack.i.h.bf16 %v3631_v4  ;;  %v9414_v34 = vld [vmem:[#allocation204_spill] sm:$0xff]  ;;  %v9479_v20 = vld [vmem:[#allocation82_spill] sm:$0xff] }
 0x353   :  { %v3632_v6 = vunpack.i.l.bf16 %v3631_v4  ;;  %v1398_v58 = vsel %vm7811_vm15, %v9365_v13, %v9400_v8  ;;  %v1714_v2 = vadd.f32 %v9371_v37, %v9401_v48  ;;  %v9404_v63 = vand.u32 2147483647, %v9396_v29  ;;  %v9408_v13 = vld [vmem:[#allocation251_spill] sm:$0xff]  ;;  %v9425_v29 = vld [vmem:[#allocation262_spill] sm:$0xff] }
 0x354   :  { %v3011_v51 = vsub.f32 %v9397_v12, %v2979_v21  ;;  %v3268_v7 = vadd.f32 %v9399_v53, %v3012_v11  ;;  %vm1731_vm12 = vweird.f32 %v9407_v52  ;;  %v2888_v59 = vsel %vm150_vm5, %v3633_v10, 0.0  ;;  %v9412_v4 = vld [vmem:[#allocation279_spill] sm:$0xff]  ;;  %v9415_v53 = vld [vmem:[#allocation36_spill] sm:$0xff] }
 0x355   :  { %vm7836_vm8 = vcmp.eq.f32.partialorder %v9404_v63, 8.507059e+37  ;;  %v1403_v3 = vsel %vm7773_vm4, %v9409_v46, %v1398_v58  ;;  %v1719_v32 = vand.u32 2147483647, %v9382_v30  ;;  %v1718_v23 = vsel %vm7830_vm7, %v9371_v37, %v1714_v2  ;;  %v4086_v12 = vld [vmem:[#allocation2 + $0xa8] sm:$0xff]  ;;  %vm1412_vm4 = vmor %vm1410_vm6, %vm1411_vm13 }
 0x356   :  { %v3267_v25 = vadd.f32 %v9408_v13, %v3011_v51  ;;  %v3300_v55 = vmul.f32 2.0, %v3268_v7  ;;  %v1404_v18 = vmul.f32 %v1403_v3, %v9410_v24  ;;  %v2887_v36 = vsel %vm150_vm5, %v3632_v6, 0.0  ;;  %v9416_v6 = vld [vmem:[#allocation248_spill] sm:$0xff]  ;;  %v9417_v2 = vld [vmem:[#allocation79_spill] sm:$0xff] }
 0x357   :  { %vm1730_vm9 = vweird.f32 %v9411_v19  ;;  %vm1720_vm10 = vcmp.eq.f32.partialorder %v1719_v32, 8.507059e+37  ;;  %v2919_v44 = vadd.f32 %v2887_v36, %v9412_v4  ;;  %v2920_v39 = vadd.f32 %v2888_v59, %v9413_v38  ;;  %v4038_v21 = vpop.eup %4037  ;;  %v9418_v63 = vld [vmem:[#allocation59_spill] sm:$0xff]  ;;  %v9424_v38 = vld [vmem:[#allocation208_spill] sm:$0xff] }
 0x358   :  { %v3299_v17 = vmul.f32 2.0, %v3267_v25  ;;  %v3332_v30 = vadd.f32 %v3300_v55, %v614_v49  ;;  %v1723_v11 = vsel %vm1720_vm10, %v9414_v34, %v1718_v23  ;;  %v459_v27 = vmax.f32 %v4085_v57, 0.0  ;;  %v4040_v37 = vpop.eup %4039  ;;  %vm7891_vm11 = vmor %vm1730_vm9, %vm1731_vm12 }
 0x359   :  { %v460_v51 = vmax.f32 %v4086_v12, 0.0  ;;  %v572_v10 = vmul.f32 0.6931472, %v4038_v21  ;;  %v1724_v7 = vmul.f32 %v1723_v11, %v9415_v53  ;;  %v2983_v8 = vmul.f32 %v2919_v44, %v9416_v6  ;;  %v3636_v44 = vpop.permute.xlu0 %3635  ;;  %v9426_v21 = vld [vmem:[#allocation67_spill] sm:$0xff]  ;;  %v9428_v11 = vld [vmem:[#allocation101_spill] sm:$0xff] }
 0x35a   :  { %v3331_v9 = vadd.f32 %v3299_v17, %v613_v60  ;;  %v3364_v58 = vsub.f32 %v3332_v30, %v7801_v61  ;;  %v574_v48 = vmul.f32 0.6931472, %v4040_v37  ;;  %v2984_v31 = vmul.f32 %v2920_v39, %v9417_v2  ;;  %v9423_v17 = vld [vmem:[#allocation131_spill] sm:$0xff]  ;;  %v9433_v37 = vld [vmem:[#allocation58_spill] sm:$0xff] }
 0x35b   :  { %v491_v49 = vmul.f32 %v4085_v57, %v9418_v63  ;;  %v617_v25 = vadd.f32 %v572_v10, %v521_v33  ;;  %v1824_v59 = vadd.f32 %v1724_v7, %v1404_v18  ;;  %v9419_v46 = vmax.f32 %v9416_v6, 0.0  ;;  %v9422_v18 = vld [vmem:[#allocation52_spill] sm:$0xff]  ;;  %v9427_v30 = vld [vmem:[#allocation211_spill] sm:$0xff] }
 0x35c   :  { %v3363_v13 = vsub.f32 %v3331_v9, %v7801_v61  ;;  %v618_v60 = vadd.f32 %v574_v48, %v522_v0  ;;  %v9420_v32 = vmax.f32 %v9417_v2, 0.0  ;;  %v492_v24 = vmul.f32 %v4086_v12, %v9145_v14  ;;  %v9421_v61 = vld [vmem:[#allocation261_spill] sm:$0xff] }
 0x35d   :  { %v3015_v3 = vsub.f32 %v9419_v46, %v2983_v8  ;;  %v523_v23 = vsub.f32 %v459_v27, %v491_v49  ;;  %4041 = vlog2.f32 %v9422_v18  ;;  %v1413_v4 = vsel %vm1412_vm4, %v9390_v42, %v9423_v17  ;;  %v9429_v27 = vld [vmem:[#allocation136_spill] sm:$0xff]  ;;  %v9445_v42 = vld [vmem:[#allocation78_spill] sm:$0xff] }
 0x35e   :  { %v3016_v55 = vsub.f32 %v9420_v32, %v2984_v31  ;;  %v3394_v36 = vadd.f32 %v7742_v43, %v3363_v13  ;;  %vm1441_vm14 = vweird.f32 %v9424_v38  ;;  %v524_v39 = vsub.f32 %v460_v51, %v492_v24  ;;  %v9432_v51 = vld [vmem:[#allocation203_spill] sm:$0xff]  ;;  %v9439_v24 = vld [vmem:[#allocation126_spill] sm:$0xff]  ;;  %v9440_v17 = vld [vmem:[#allocation96_spill] sm:$0xff] }
 0x35f   :  { %v3271_v33 = vadd.f32 %v9421_v61, %v3015_v3  ;;  %4043 = vlog2.f32 %v9426_v21  ;;  %v1418_v14 = vsel %vm7836_vm8, %v9427_v30, %v1413_v4  ;;  %v1729_v12 = vadd.f32 %v9407_v52, %v9429_v27  ;;  %v9457_v31 = vld [vmem:[#allocation83_spill] sm:$0xff] }
 0x360   :  { %v3272_v0 = vadd.f32 %v9425_v29, %v3016_v55  ;;  %v3395_v43 = vadd.f32 %v3394_v36, %v3364_v58  ;;  %v1419_v57 = vmul.f32 %v1418_v14, %v9428_v11  ;;  %vm1440_vm13 = vweird.f32 %v9432_v51  ;;  %v4087_v58 = vld [vmem:[#allocation2 + $0xc0] sm:$0xff] }
 0x361   :  { %v3303_v34 = vmul.f32 2.0, %v3271_v33  ;;  %vm1761_vm15 = vweird.f32 %v9433_v37  ;;  %v1734_v9 = vand.u32 2147483647, %v9411_v19  ;;  %v3638_v10 = vunpack.i.h.bf16 %v3636_v44  ;;  %v9437_v19 = vld [vmem:[#allocation205_spill] sm:$0xff]  ;;  %vm1442_vm12 = vmor %vm1440_vm13, %vm1441_vm14 }
 0x362   :  { %v3304_v40 = vmul.f32 2.0, %v3272_v0  ;;  %v3637_v53 = vunpack.i.l.bf16 %v3636_v44  ;;  %v3396_v7 = vadd.f32 %v3395_v43, %v3365_v16  ;;  %v1733_v8 = vsel %vm7891_vm11, %v9407_v52, %v1729_v12  ;;  %v4088_v44 = vld [vmem:[#allocation2 + $0xc8] sm:$0xff]  ;;  %v3646_v0 = vpop.permute.xlu1 %3645 }
 0x363   :  { %v3335_v6 = vadd.f32 %v3303_v34, %v617_v25  ;;  %v463_v48 = vmax.f32 %v4087_v58, 0.0  ;;  %v9434_v2 = vand.u32 2147483647, %v9432_v51  ;;  %vm1760_vm7 = vweird.f32 %v9437_v19  ;;  %v4042_v49 = vpop.eup %4041  ;;  %v9438_v25 = vld [vmem:[#allocation213_spill] sm:$0xff] }
 0x364   :  { %v3336_v63 = vadd.f32 %v3304_v40, %v618_v60  ;;  %vm1735_vm8 = vcmp.eq.f32.partialorder %v1734_v9, 8.507059e+37  ;;  %v2890_v56 = vsel %vm150_vm5, %v3638_v10, 0.0  ;;  %v2889_v16 = vsel %vm150_vm5, %v3637_v53, 0.0  ;;  %v9447_v40 = vld [vmem:[#allocation72_spill] sm:$0xff]  ;;  %vm7950_vm9 = vmor %vm1760_vm7, %vm1761_vm15 }
 0x365   :  { %vm7906_vm6 = vcmp.eq.f32.partialorder %v9434_v2, 8.507059e+37  ;;  %v3367_v52 = vsub.f32 %v3335_v6, %v1824_v59  ;;  %v3397_v13 = vadd.f32 %v3396_v7, %v3366_v35  ;;  %v1738_v46 = vsel %vm1735_vm8, %v9438_v25, %v1733_v8  ;;  %v4044_v32 = vpop.eup %4043  ;;  %v9441_v35 = vld [vmem:[#allocation245_spill] sm:$0xff]  ;;  %v9448_v10 = vld [vmem:[#allocation260_spill] sm:$0xff]  ;;  %v9449_v6 = vld [vmem:[#allocation219_spill] sm:$0xff] }
 0x366   :  { %v2922_v3 = vadd.f32 %v2890_v56, %v7182_v5  ;;  %v3368_v55 = vsub.f32 %v3336_v63, %v1824_v59  ;;  %v576_v60 = vmul.f32 0.6931472, %v4042_v49  ;;  %v1739_v36 = vmul.f32 %v1738_v46, %v9439_v24  ;;  %v9453_v63 = vld [vmem:[#allocation216_spill] sm:$0xff]  ;;  %v9455_v46 = vld [vmem:[#allocation139_spill] sm:$0xff] }
 0x367   :  { %v2921_v61 = vadd.f32 %v2889_v16, %v7184_v15  ;;  %v3398_v33 = vadd.f32 %v3397_v13, %v3367_v52  ;;  %v578_v18 = vmul.f32 0.6931472, %v4044_v32  ;;  %v464_v29 = vmax.f32 %v4088_v44, 0.0  ;;  %v9443_v15 = vld [vmem:[#allocation85_spill] sm:$0xff]  ;;  %v9454_v52 = vld [vmem:[#allocation103_spill] sm:$0xff] }
 0x368   :  { %v2986_v4 = vmul.f32 %v2922_v3, %v9440_v17  ;;  %v619_v28 = vadd.f32 %v576_v60, %v523_v23  ;;  %v7923_v54 = vadd.f32 %v1739_v36, %v1419_v57  ;;  %v495_v5 = vmul.f32 %v4087_v58, %v9032_v50  ;;  %v9446_v50 = vld [vmem:[#allocation264_spill] sm:$0xff]  ;;  %v9450_v58 = vld [vmem:[#allocation221_spill] sm:$0xff] }
 0x369   :  { %v2985_v21 = vmul.f32 %v2921_v61, %v9441_v35  ;;  %v3399_v59 = vadd.f32 %v3398_v33, %v3368_v55  ;;  %v620_v30 = vadd.f32 %v578_v18, %v524_v39  ;;  %v9442_v14 = vmax.f32 %v9440_v17, 0.0  ;;  %v9456_v55 = vld [vmem:[#allocation148_spill] sm:$0xff]  ;;  %v9458_v61 = vld [vmem:[#allocation69_spill] sm:$0xff]  ;;  %v9459_v18 = vld [vmem:[#allocation255_spill] sm:$0xff] }
 0x36a   :  { %v496_v34 = vmul.f32 %v4088_v44, %v9443_v15  ;;  %v9444_v11 = vmax.f32 %v9441_v35, 0.0  ;;  %v527_v12 = vsub.f32 %v463_v48, %v495_v5  ;;  %4045 = vlog2.f32 %v9445_v42  ;;  %v9461_v35 = vld [vmem:[#allocation104_spill] sm:$0xff] }
 0x36b   :  { %v3018_v43 = vsub.f32 %v9442_v14, %v2986_v4  ;;  %v3648_v23 = vunpack.i.h.bf16 %v3646_v0  ;;  %4047 = vlog2.f32 %v9447_v40  ;;  %v3647_v9 = vunpack.i.l.bf16 %v3646_v0  ;;  %v9460_v4 = vld [vmem:[#allocation95_spill] sm:$0xff]  ;;  %v9462_v5 = vld [vmem:[#allocation84_spill] sm:$0xff] }
 0x36c   :  { %v3017_v27 = vsub.f32 %v9444_v11, %v2985_v21  ;;  %v528_v39 = vsub.f32 %v464_v29, %v496_v34  ;;  %v1443_v8 = vsel %vm1442_vm12, %v9424_v38, %v9449_v6  ;;  %v1759_v48 = vadd.f32 %v9433_v37, %v9450_v58  ;;  %v9463_v14 = vld [vmem:[#allocation220_spill] sm:$0xff]  ;;  %v3651_v58 = vpop.permute.xlu0 %3650 }
 0x36d   :  { %v3274_v57 = vadd.f32 %v9446_v50, %v3018_v43  ;;  %v2894_v7 = vsel %vm150_vm5, %v3648_v23, 0.0  ;;  %v1448_v56 = vsel %vm7906_vm6, %v9453_v63, %v1443_v8  ;;  %v1764_v16 = vand.u32 2147483647, %v9437_v19 }
 0x36e   :  { %v3273_v53 = vadd.f32 %v9448_v10, %v3017_v27  ;;  %v2893_v38 = vsel %vm150_vm5, %v3647_v9, 0.0  ;;  %v1449_v13 = vmul.f32 %v1448_v56, %v9454_v52  ;;  %v1763_v25 = vsel %vm7950_vm9, %v9433_v37, %v1759_v48  ;;  %v9466_v9 = vld [vmem:[#allocation71_spill] sm:$0xff]  ;;  %v9469_v48 = vld [vmem:[#allocation76_spill] sm:$0xff]  ;;  %v9474_v52 = vld [vmem:[#allocation217_spill] sm:$0xff] }
 0x36f   :  { %v3306_v2 = vmul.f32 2.0, %v3274_v57  ;;  %v2925_v3 = vadd.f32 %v2893_v38, %v9455_v46  ;;  %vm1765_vm10 = vcmp.eq.f32.partialorder %v1764_v16, 8.507059e+37  ;;  %v2926_v60 = vadd.f32 %v2894_v7, %v9456_v55  ;;  %v9467_v7 = vld [vmem:[#allocation268_spill] sm:$0xff] }
 0x370   :  { %v3305_v49 = vmul.f32 2.0, %v3273_v53  ;;  %v2415_v24 = vmul.f32 -4.0, %v9457_v31  ;;  %v4046_v36 = vpop.eup %4045  ;;  %v1768_v33 = vsel %vm1765_vm10, %v9458_v61, %v1763_v25  ;;  %v2416_v44 = vmul.f32 -4.0, %v9460_v4  ;;  %v9475_v25 = vld [vmem:[#allocation93_spill] sm:$0xff] }
 0x371   :  { %v3338_v32 = vadd.f32 %v3306_v2, %v620_v30  ;;  %v2989_v17 = vmul.f32 %v2925_v3, %v9459_v18  ;;  %v4048_v29 = vpop.eup %4047  ;;  %v584_v37 = vmul.f32 0.6931472, %v4046_v36  ;;  %v1769_v21 = vmul.f32 %v1768_v33, %v9461_v35 }
 0x372   :  { %v3337_v19 = vadd.f32 %v3305_v49, %v619_v28  ;;  %v2990_v30 = vmul.f32 %v2926_v60, %v9462_v5  ;;  %vm1456_vm4 = vweird.f32 %v9463_v14  ;;  %v586_v34 = vmul.f32 0.6931472, %v4048_v29 }
 0x373   :  { %v3370_v0 = vsub.f32 %v3338_v32, %v7923_v54  ;;  %v9464_v28 = vmax.f32 %v9459_v18, 0.0  ;;  %v2447_v27 = vrot.slane %v9457_v31, 7  ;;  %v623_v42 = vadd.f32 %v584_v37, %v527_v12  ;;  %v9470_v12 = vld [vmem:[#allocation16_spill] sm:$0xff]  ;;  %v3656_v37 = vpop.permute.xlu2 %3655 }
 0x374   :  { %v3369_v43 = vsub.f32 %v3337_v19, %v7923_v54  ;;  %v1827_v23 = vadd.f32 %v1769_v21, %v1449_v13  ;;  %v9465_v50 = vmax.f32 %v9462_v5, 0.0  ;;  %v2448_v40 = vrot.slane %v9460_v4, 7 }
 0x375   :  { %v3021_v11 = vsub.f32 %v9464_v28, %v2989_v17  ;;  %vm1455_vm14 = vweird.f32 %v9466_v9  ;;  %v624_v53 = vadd.f32 %v586_v34, %v528_v39  ;;  %v9468_v54 = vrot.slane %v9443_v15, 7  ;;  %v4089_v17 = vld [vmem:[#allocation2 + $0xd0] sm:$0xff] }
 0x376   :  { %v3022_v57 = vsub.f32 %v9465_v50, %v2990_v30  ;;  %v3400_v10 = vadd.f32 %v3399_v59, %v3369_v43  ;;  %vm1776_vm11 = vweird.f32 %v9469_v48  ;;  %v2457_v2 = vsel %vm1895_vm1, %v2447_v27, %v2448_v40  ;;  %v4090_v30 = vld [vmem:[#allocation2 + $0xd8] sm:$0xff]  ;;  %vm1457_vm7 = vmor %vm1455_vm14, %vm1456_vm4 }
 0x377   :  { %v3277_v6 = vadd.f32 %v9467_v7, %v3021_v11  ;;  %v2458_v8 = vsel %vm1895_vm1, %v9468_v54, %v2447_v27  ;;  %v2576_v39 = vrot.slane %v9460_v4, 1  ;;  %v9471_v15 = vand.u32 2147483647, %v9466_v9  ;;  %v9478_v27 = vld [vmem:[#allocation70_spill] sm:$0xff]  ;;  %v9481_v7 = vld [vmem:[#allocation223_spill] sm:$0xff] }
 0x378   :  { %v3278_v51 = vadd.f32 %v9470_v12, %v3022_v57  ;;  %v2511_v59 = vsel %vm145_vm0, %v2458_v8, 0.0  ;;  %v3401_v56 = vadd.f32 %v3400_v10, %v3370_v0  ;;  %v2544_v49 = vadd.f32 %v2457_v2, %v2416_v44  ;;  %v9480_v10 = vld [vmem:[#allocation86_spill] sm:$0xff] }
 0x379   :  { %vm7998_vm13 = vcmp.eq.f32.partialorder %v9471_v15, 8.507059e+37  ;;  %v3309_v16 = vmul.f32 2.0, %v3277_v6  ;;  %v2543_v38 = vadd.f32 %v2511_v59, %v2415_v24  ;;  %vm1775_vm15 = vweird.f32 %v9474_v52  ;;  %v9482_v6 = vld [vmem:[#allocation227_spill] sm:$0xff] }
 0x37a   :  { %v3310_v13 = vmul.f32 2.0, %v3278_v51  ;;  %v2577_v46 = vrot.slane %v9475_v25, 1  ;;  %v9476_v3 = vrot.slane %v9457_v31, 1  ;;  %v3653_v55 = vunpack.i.h.bf16 %v3651_v58  ;;  %vm1777_vm8 = vmor %vm1775_vm15, %vm1776_vm11  ;;  %v9484_v15 = vld [vmem:[#allocation91_spill] sm:$0xff] }
 0x37b   :  { %v3402_v60 = vadd.f32 %v3401_v56, %v3371_v41  ;;  %v3341_v36 = vadd.f32 %v3309_v16, %v623_v42  ;;  %v3652_v61 = vunpack.i.l.bf16 %v3651_v58  ;;  %v465_v44 = vmax.f32 %v4089_v17, 0.0  ;;  %v9483_v58 = vld [vmem:[#allocation130_spill] sm:$0xff]  ;;  %v9485_v16 = vld [vmem:[#allocation145_spill] sm:$0xff] }
 0x37c   :  { %v2585_v32 = vsel %vm2028_vm3, %v9476_v3, %v2576_v39  ;;  %v3342_v24 = vadd.f32 %v3310_v13, %v624_v53  ;;  %v2584_v33 = vsel %vm2028_vm3, %v2576_v39, %v2577_v46  ;;  %v2768_v18 = vsel %vm149_vm2, %v3653_v55, 0.0 }
 0x37d   :  { %v2671_v19 = vadd.f32 %v2585_v32, %v2543_v38  ;;  %v3373_v29 = vsub.f32 %v3341_v36, %v1827_v23  ;;  %v3403_v1 = vadd.f32 %v3402_v60, %v3372_v47  ;;  %vm9477_vm6 = vcmp.ne.s32.totalorder %v5755_v62, 15  ;;  %v9487_v60 = vld [vmem:[#allocation128_spill] sm:$0xff] }
 0x37e   :  { %v2640_v41 = vsel %vm9477_vm6, %v2584_v33, 0.0  ;;  %v2767_v0 = vsel %vm149_vm2, %v3652_v61, 0.0  ;;  %v3374_v35 = vsub.f32 %v3342_v24, %v1827_v23  ;;  %v466_v43 = vmax.f32 %v4090_v30, 0.0  ;;  %vm9494_vm9 = vmmov %vm9477_vm6 }
 0x37f   :  { %v2672_v21 = vadd.f32 %v2640_v41, %v2544_v49  ;;  %v2799_v5 = vadd.f32 %v2767_v0, %v2671_v19  ;;  %v3404_v34 = vadd.f32 %v3403_v1, %v3373_v29  ;;  %v497_v28 = vmul.f32 %v4089_v17, %v9457_v31  ;;  %v9486_v49 = vld [vmem:[#allocation259_spill] sm:$0xff]  ;;  %v9488_v19 = vld [vmem:[#allocation252_spill] sm:$0xff]  ;;  %v3661_v29 = vpop.permute.xlu1 %3660 }
 0x380   :  { %v498_v11 = vmul.f32 %v4090_v30, %v9460_v4  ;;  %4049 = vlog2.f32 %v9478_v27  ;;  %v3658_v47 = vunpack.i.h.bf16 %v3656_v37  ;;  %v3657_v42 = vunpack.i.l.bf16 %v3656_v37 }
 0x381   :  { %v2800_v45 = vadd.f32 %v2768_v18, %v2672_v21  ;;  %4051 = vlog2.f32 %v9479_v20  ;;  %v8032_v23 = vadd.f32 %v3404_v34, %v3374_v35  ;;  %v529_v50 = vsub.f32 %v465_v44, %v497_v28  ;;  %v9492_v28 = vld [vmem:[#allocation265_spill] sm:$0xff] }
 0x382   :  { %v530_v57 = vsub.f32 %v466_v43, %v498_v11  ;;  %v1458_v31 = vsel %vm1457_vm7, %v9463_v14, %v9480_v10  ;;  %v2896_v53 = vsel %vm150_vm5, %v3658_v47, 0.0  ;;  %v1774_v54 = vadd.f32 %v9469_v48, %v9482_v6  ;;  %v9493_v11 = vld [vmem:[#allocation99_spill] sm:$0xff] }
 0x383   :  { %v1463_v9 = vsel %vm7998_vm13, %v9481_v7, %v1458_v31  ;;  %v1779_v8 = vand.u32 2147483647, %v9474_v52  ;;  %v2895_v14 = vsel %vm150_vm5, %v3657_v42, 0.0  ;;  %v2928_v51 = vadd.f32 %v2896_v53, %v2800_v45  ;;  %v4092_v7 = vld [vmem:[#allocation2 + $0xe8] sm:$0xff] }
 0x384   :  { %v1464_v12 = vmul.f32 %v1463_v9, %v9483_v58  ;;  %v2417_v2 = vmul.f32 -4.0, %v9475_v25  ;;  %v1778_v59 = vsel %vm1777_vm8, %v9469_v48, %v1774_v54  ;;  %v2927_v39 = vadd.f32 %v2895_v14, %v2799_v5  ;;  %v9491_v5 = vld [vmem:[#allocation271_spill] sm:$0xff]  ;;  %v9495_v58 = vld [vmem:[#allocation274_spill] sm:$0xff] }
 0x385   :  { %vm1780_vm12 = vcmp.eq.f32.partialorder %v1779_v8, 8.507059e+37  ;;  %v2418_v63 = vmul.f32 -4.0, %v9484_v15  ;;  %v2992_v52 = vmul.f32 %v2928_v51, %v9486_v49  ;;  %v2449_v13 = vrot.slane %v9475_v25, 7 }
 0x386   :  { %v4050_v56 = vpop.eup %4049  ;;  %v1783_v38 = vsel %vm1780_vm12, %v9485_v16, %v1778_v59  ;;  %v2450_v3 = vrot.slane %v9484_v15, 7  ;;  %v2991_v61 = vmul.f32 %v2927_v39, %v9488_v19  ;;  %v2578_v48 = vrot.slane %v9484_v15, 1 }
 0x387   :  { %v4052_v32 = vpop.eup %4051  ;;  %v588_v55 = vmul.f32 0.6931472, %v4050_v56  ;;  %v1784_v36 = vmul.f32 %v1783_v38, %v9487_v60  ;;  %v9489_v33 = vmax.f32 %v9486_v49, 0.0  ;;  %v2456_v44 = vsel %vm1895_vm1, %v2448_v40, %v2449_v13  ;;  %v9496_v56 = vld [vmem:[#allocation81_spill] sm:$0xff]  ;;  %v9498_v49 = vld [vmem:[#allocation272_spill] sm:$0xff] }
 0x388   :  { %v590_v24 = vmul.f32 0.6931472, %v4052_v32  ;;  %v2455_v17 = vsel %vm1895_vm1, %v2449_v13, %v2450_v3  ;;  %v9490_v0 = vmax.f32 %v9488_v19, 0.0  ;;  %v2513_v35 = vsel %vm145_vm0, %v2456_v44, 0.0  ;;  %v3671_v13 = vpop.permute.xlu2 %3670 }
 0x389   :  { %v3024_v18 = vsub.f32 %v9489_v33, %v2992_v52  ;;  %v625_v1 = vadd.f32 %v588_v55, %v529_v50  ;;  %v8071_v41 = vadd.f32 %v1784_v36, %v1464_v12  ;;  %v2545_v43 = vadd.f32 %v2513_v35, %v2417_v2  ;;  %v4091_v50 = vld [vmem:[#allocation2 + $0xe0] sm:$0xff]  ;;  %v3666_v2 = vpop.permute.xlu0 %3665 }
 0x38a   :  { %v3023_v37 = vsub.f32 %v9490_v0, %v2991_v61  ;;  %v626_v21 = vadd.f32 %v590_v24, %v530_v57  ;;  %v2546_v34 = vadd.f32 %v2455_v17, %v2418_v63  ;;  %v2579_v27 = vrot.slane %v9493_v11, 1  ;;  %v9499_v55 = vld [vmem:[#allocation14_spill] sm:$0xff]  ;;  %v3676_v0 = vpop.permute.xlu1 %3675 }
 0x38b   :  { %v3280_v30 = vadd.f32 %v9491_v5, %v3024_v18  ;;  %v2583_v40 = vsel %vm2028_vm3, %v2577_v46, %v2578_v48  ;;  %v3663_v45 = vunpack.i.h.bf16 %v3661_v29  ;;  %v3662_v42 = vunpack.i.l.bf16 %v3661_v29 }
 0x38c   :  { %v3279_v4 = vadd.f32 %v9492_v28, %v3023_v37  ;;  %v2673_v47 = vadd.f32 %v2583_v40, %v2545_v43  ;;  %v467_v10 = vmax.f32 %v4091_v50, 0.0  ;;  %v2582_v31 = vsel %vm2028_vm3, %v2578_v48, %v2579_v27  ;;  %v9500_v48 = vld [vmem:[#allocation97_spill] sm:$0xff] }
 0x38d   :  { %v3312_v20 = vmul.f32 2.0, %v3280_v30  ;;  %v2770_v53 = vsel %vm149_vm2, %v3663_v45, 0.0  ;;  %v468_v9 = vmax.f32 %v4092_v7, 0.0  ;;  %v2642_v46 = vsel %vm9494_vm9, %v2582_v31, 0.0  ;;  %v9502_v45 = vld [vmem:[#allocation17_spill] sm:$0xff] }
 0x38e   :  { %v3311_v57 = vmul.f32 2.0, %v3279_v4  ;;  %v2769_v54 = vsel %vm149_vm2, %v3662_v42, 0.0  ;;  %v499_v8 = vmul.f32 %v4091_v50, %v9475_v25  ;;  %4053 = vlog2.f32 %v9495_v58  ;;  %v9497_v25 = vld [vmem:[#allocation80_spill] sm:$0xff]  ;;  %v9504_v50 = vld [vmem:[#allocation257_spill] sm:$0xff] }
 0x38f   :  { %v8088_v6 = vadd.f32 %v3312_v20, %v626_v21  ;;  %v2674_v14 = vadd.f32 %v2642_v46, %v2546_v34  ;;  %v500_v51 = vmul.f32 %v4092_v7, %v9484_v15  ;;  %v2801_v39 = vadd.f32 %v2769_v54, %v2673_v47  ;;  %v9505_v15 = vld [vmem:[#allocation263_spill] sm:$0xff] }
 0x390   :  { %v8096_v12 = vadd.f32 %v3311_v57, %v625_v1  ;;  %v531_v63 = vsub.f32 %v467_v10, %v499_v8  ;;  %4055 = vlog2.f32 %v9496_v56  ;;  %v3246_v52 = vmul.f32 0.6931472, %v9498_v49  ;;  %v9507_v46 = vld [vmem:[#allocation135_spill] sm:$0xff]  ;;  %v9512_v56 = vld [vmem:[#allocation229_spill] sm:$0xff] }
 0x391   :  { %v3376_v59 = vsub.f32 %v8088_v6, %v8071_v41  ;;  %v2802_v38 = vadd.f32 %v2770_v53, %v2674_v14  ;;  %4057 = vlog2.f32 %v9497_v25  ;;  %v532_v32 = vsub.f32 %v468_v9, %v500_v51 }
 0x392   :  { %v3375_v16 = vsub.f32 %v8096_v12, %v8071_v41  ;;  %v3248_v60 = vmul.f32 0.6931472, %v9499_v55  ;;  %v3668_v36 = vunpack.i.h.bf16 %v3666_v2  ;;  %v3667_v19 = vunpack.i.l.bf16 %v3666_v2  ;;  %v9510_v2 = vld [vmem:[#allocation231_spill] sm:$0xff] }
 0x393   :  { %v2419_v61 = vmul.f32 -4.0, %v9493_v11  ;;  %v2420_v24 = vmul.f32 -4.0, %v9500_v48  ;;  %v2451_v33 = vrot.slane %v9493_v11, 7  ;;  %v2580_v18 = vrot.slane %v9500_v48, 1 }
 0x394   :  { %v2898_v17 = vsel %vm150_vm5, %v3668_v36, 0.0  ;;  %v2897_v44 = vsel %vm150_vm5, %v3667_v19, 0.0  ;;  %v3673_v29 = vunpack.i.h.bf16 %v3671_v13  ;;  %v3672_v1 = vunpack.i.l.bf16 %v3671_v13  ;;  %v4054_v37 = vpop.eup %4053 }
 0x395   :  { %v2930_v35 = vadd.f32 %v2898_v17, %v2802_v38  ;;  %v2929_v21 = vadd.f32 %v2897_v44, %v2801_v39  ;;  %v9501_v5 = vrot.slane %v9500_v48, 7  ;;  %v2454_v43 = vsel %vm1895_vm1, %v2450_v3, %v2451_v33  ;;  %v9513_v38 = vld [vmem:[#allocation233_spill] sm:$0xff] }
 0x396   :  { %v4056_v34 = vpop.eup %4055  ;;  %v2515_v28 = vsel %vm145_vm0, %v2454_v43, 0.0  ;;  %v2581_v40 = vsel %vm2028_vm3, %v2579_v27, %v2580_v18  ;;  %v9503_v20 = vrot.slane %v9502_v45, 1  ;;  %v3678_v3 = vunpack.i.h.bf16 %v3676_v0  ;;  %vm9506_vm0 = vmmov %vm9477_vm6 }
 0x397   :  { %v2453_v30 = vsel %vm1895_vm1, %v2451_v33, %v9501_v5  ;;  %v4058_v42 = vpop.eup %4057  ;;  %v2994_v10 = vmul.f32 %v2930_v35, %v9504_v50  ;;  %v2993_v57 = vmul.f32 %v2929_v21, %v9505_v15  ;;  %v2547_v31 = vadd.f32 %v2515_v28, %v2419_v61  ;;  %v9516_v5 = vld [vmem:[#allocation273_spill] sm:$0xff] }
 0x398   :  { %v2548_v4 = vadd.f32 %v2453_v30, %v2420_v24  ;;  %v2612_v47 = vsel %vm2028_vm3, %v2580_v18, %v9503_v20  ;;  %v592_v53 = vmul.f32 0.6931472, %v4056_v34  ;;  %v594_v7 = vmul.f32 0.6931472, %v4058_v42  ;;  %v9514_v24 = vld [vmem:[#allocation266_spill] sm:$0xff]  ;;  %v9515_v18 = vld [vmem:[#allocation269_spill] sm:$0xff] }
 0x399   :  { %v2644_v9 = vsel %vm9506_vm0, %v2612_v47, 0.0  ;;  %v2771_v27 = vsel %vm149_vm2, %v3672_v1, 0.0  ;;  %vm1470_vm1 = vweird.f32 %v9507_v46  ;;  %v9508_v22 = vmax.f32 %v9504_v50, 0.0  ;;  %v9517_v34 = vld [vmem:[#allocation90_spill] sm:$0xff] }
 0x39a   :  { %v9509_v8 = vmax.f32 %v9505_v15, 0.0  ;;  %v2675_v14 = vadd.f32 %v2581_v40, %v2547_v31  ;;  %v2772_v51 = vsel %vm149_vm2, %v3673_v29, 0.0  ;;  %v9511_v39 = vsub.f32 1.0, %v9510_v2  ;;  %v4094_v40 = vld [vmem:[#allocation2 + $0xf8] sm:$0xff]  ;;  %v9519_v15 = vld [vmem:[#allocation142_spill] sm:$0xff] }
 0x39b   :  { %v3026_v54 = vsub.f32 %v9508_v22, %v2994_v10  ;;  %v1787_v25 = vsub.f32 1.0, %v9513_v38  ;;  %v2676_v49 = vadd.f32 %v2644_v9, %v2548_v4  ;;  %v3677_v13 = vunpack.i.l.bf16 %v3676_v0  ;;  %v9526_v22 = vld [vmem:[#allocation234_spill] sm:$0xff] }
 0x39c   :  { %v3025_v58 = vsub.f32 %v9509_v8, %v2993_v57  ;;  %v1468_v62 = vmul.f32 %v9512_v56, %v9511_v39  ;;  %v2803_v19 = vadd.f32 %v2771_v27, %v2675_v14  ;;  %v2900_v61 = vsel %vm150_vm5, %v3678_v3, 0.0  ;;  %v9525_v27 = vld [vmem:[#allocation226_spill] sm:$0xff] }
 0x39d   :  { %v3282_v55 = vadd.f32 %v3248_v60, %v3026_v54  ;;  %v2963_v33 = vmax.f32 %v9514_v24, 0.0  ;;  %v2964_v17 = vmax.f32 %v9515_v18, 0.0  ;;  %v2804_v44 = vadd.f32 %v2772_v51, %v2676_v49  ;;  %v9527_v38 = vld [vmem:[#allocation230_spill] sm:$0xff] }
 0x39e   :  { %v3281_v36 = vadd.f32 %v3246_v52, %v3025_v58  ;;  %v2899_v29 = vsel %vm150_vm5, %v3677_v13, 0.0  ;;  %v627_v1 = vadd.f32 %v592_v53, %v531_v63  ;;  %v628_v35 = vadd.f32 %v594_v7, %v532_v32  ;;  %v4093_v52 = vld [vmem:[#allocation2 + $0xf0] sm:$0xff]  ;;  %v9518_v32 = vld [vmem:[#allocation89_spill] sm:$0xff] }
 0x39f   :  { %v2931_v21 = vadd.f32 %v2899_v29, %v2803_v19  ;;  %v3250_v30 = vmul.f32 0.6931472, %v9516_v5  ;;  %v3314_v0 = vmul.f32 2.0, %v3282_v55  ;;  %v2932_v60 = vadd.f32 %v2900_v61, %v2804_v44  ;;  %v9524_v7 = vld [vmem:[#allocation225_spill] sm:$0xff]  ;;  %v9528_v61 = vld [vmem:[#allocation224_spill] sm:$0xff] }
 0x3a0   :  { %v469_v43 = vmax.f32 %v4093_v52, 0.0  ;;  %4059 = vlog2.f32 %v9517_v34  ;;  %v3313_v28 = vmul.f32 2.0, %v3281_v36  ;;  %v470_v45 = vmax.f32 %v4094_v40, 0.0 }
 0x3a1   :  { %v2995_v4 = vmul.f32 %v2931_v21, %v9514_v24  ;;  %v501_v20 = vmul.f32 %v4093_v52, %v9493_v11  ;;  %v2996_v26 = vmul.f32 %v2932_v60, %v9515_v18  ;;  %v502_v63 = vmul.f32 %v4094_v40, %v9500_v48  ;;  %v9522_v48 = vld [vmem:[#allocation228_spill] sm:$0xff] }
 0x3a2   :  { %4061 = vlog2.f32 %v9518_v32  ;;  %v1469_v47 = vadd.f32 %v9512_v56, %v1468_v62  ;;  %vm1471_vm2 = vweird.f32 %v9512_v56  ;;  %v1474_v50 = vand.u32 2147483647, %v9507_v46 }
 0x3a3   :  { %v3027_v42 = vsub.f32 %v2963_v33, %v2995_v4  ;;  %v1476_v10 = vand.u32 2147483648, %v9507_v46  ;;  %v1206_v57 = vmul.f32 2.0, %v9519_v15  ;;  %v3028_v31 = vsub.f32 %v2964_v17, %v2996_v26  ;;  %vm8168_vm3 = vmor %vm1470_vm1, %vm1471_vm2 }
 0x3a4   :  { %v3252_v3 = vmul.f32 0.6931472, %v4054_v37  ;;  %v9523_v53 = vsub.f32 1.0, %v9522_v48  ;;  %v1801_v54 = vmul.f32 %v9526_v22, %v9525_v27  ;;  %v8177_v8 = vadd.f32 %v3314_v0, %v628_v35  ;;  %v9532_v35 = vld [vmem:[#allocation129_spill] sm:$0xff] }
 0x3a5   :  { %v3283_v58 = vadd.f32 %v3250_v30, %v3027_v42  ;;  %v1473_v37 = vsel %vm8168_vm3, %v9512_v56, %v1469_v47  ;;  %v3345_v46 = vadd.f32 %v3313_v28, %v627_v1  ;;  %v533_v2 = vsub.f32 %v469_v43, %v501_v20  ;;  %v9535_v42 = vld [vmem:[#allocation127_spill] sm:$0xff] }
 0x3a6   :  { %v1483_v9 = vmul.f32 %v9524_v7, %v9523_v53  ;;  %v4060_v14 = vpop.eup %4059  ;;  %v3284_v51 = vadd.f32 %v3252_v3, %v3028_v31  ;;  %v1477_v39 = vor.u32 1.1754944e-38, %v1476_v10  ;;  %v534_v62 = vsub.f32 %v470_v45, %v502_v63 }
 0x3a7   :  { %vm1475_vm5 = vcmp.eq.f32.partialorder %v1474_v50, 8.507059e+37  ;;  %vm1486_vm10 = vweird.f32 %v9524_v7  ;;  %v1788_v49 = vmul.f32 %v9527_v38, %v1787_v25  ;;  %v596_v55 = vmul.f32 0.6931472, %v4060_v14  ;;  %v9531_v25 = vld [vmem:[#allocation143_spill] sm:$0xff] }
 0x3a8   :  { %v4062_v13 = vpop.eup %4061  ;;  %v1478_v36 = vsel %vm1475_vm5, %v1477_v39, %v1473_v37  ;;  %v1484_v19 = vadd.f32 %v9524_v7, %v1483_v9  ;;  %vm1485_vm4 = vweird.f32 %v9528_v61  ;;  %v3315_v24 = vmul.f32 2.0, %v3283_v58 }
 0x3a9   :  { %v1489_v56 = vand.u32 2147483647, %v9528_v61  ;;  %v1491_v33 = vand.u32 2147483648, %v9528_v61  ;;  %v1789_v18 = vadd.f32 %v9527_v38, %v1788_v49  ;;  %v3316_v17 = vmul.f32 2.0, %v3284_v51  ;;  %vm8189_vm14 = vmor %vm1485_vm4, %vm1486_vm10 }
 0x3aa   :  { %vm1790_vm11 = vweird.f32 %v9531_v25  ;;  %vm1791_vm13 = vweird.f32 %v9527_v38  ;;  %v1794_v29 = vand.u32 2147483647, %v9531_v25  ;;  %v598_v1 = vmul.f32 0.6931472, %v4062_v13 }
 0x3ab   :  { %v1479_v21 = vmul.f32 %v1478_v36, %v9532_v35  ;;  %vm8197_vm15 = vmor %vm1790_vm11, %vm1791_vm13  ;;  %v1796_v30 = vand.u32 2147483648, %v9531_v25  ;;  %v1802_v0 = vsub.f32 1.0, %v1801_v54  ;;  %v629_v60 = vadd.f32 %v596_v55, %v533_v2 }
 0x3ac   :  { %v1488_v52 = vsel %vm8189_vm14, %v9524_v7, %v1484_v19  ;;  %v1793_v43 = vsel %vm8197_vm15, %v9527_v38, %v1789_v18  ;;  %vm1806_vm6 = vweird.f32 %v9526_v22  ;;  %v1809_v4 = vand.u32 2147483647, %v9525_v27 }
 0x3ad   :  { %v1797_v34 = vor.u32 1.1754944e-38, %v1796_v30  ;;  %v1803_v28 = vmul.f32 %v9526_v22, %v1802_v0  ;;  %v1811_v40 = vand.u32 2147483648, %v9525_v27  ;;  %vm1490_vm7 = vcmp.eq.f32.partialorder %v1489_v56, 8.507059e+37 }
 0x3ae   :  { %v1492_v45 = vor.u32 1.1754944e-38, %v1491_v33  ;;  %vm1795_vm8 = vcmp.eq.f32.partialorder %v1794_v29, 8.507059e+37  ;;  %v3406_v20 = vadd.f32 %v8032_v23, %v3375_v16  ;;  %v630_v26 = vadd.f32 %v598_v1, %v534_v62 }
 0x3af   :  { %v1798_v63 = vsel %vm1795_vm8, %v1797_v34, %v1793_v43  ;;  %v1804_v32 = vadd.f32 %v9526_v22, %v1803_v28  ;;  %vm1805_vm12 = vweird.f32 %v9525_v27  ;;  %v1812_v10 = vor.u32 1.1754944e-38, %v1811_v40 }
 0x3b0   :  { %v1493_v47 = vsel %vm1490_vm7, %v1492_v45, %v1488_v52  ;;  %v1799_v50 = vmul.f32 %v1798_v63, %v9535_v42  ;;  %vm1807_vm9 = vmor %vm1805_vm12, %vm1806_vm6  ;;  %v3407_v31 = vadd.f32 %v3406_v20, %v3376_v59  ;;  %v1222_v12 = vadd.f32 1.0, %v1206_v57 }
 0x3b1   :  { %v1510_v23 = vadd.f32 1.0, %v9519_v15  ;;  %v1808_v16 = vsel %vm1807_vm9, %v9526_v22, %v1804_v32  ;;  %vm1810_vm0 = vcmp.eq.f32.partialorder %v1809_v4, 8.507059e+37  ;;  %v3347_v7 = vadd.f32 %v3315_v24, %v629_v60 }
 0x3b2   :  { %v1813_v3 = vsel %vm1810_vm0, %v1812_v10, %v1808_v16  ;;  %v1829_v11 = vadd.f32 %v1799_v50, %v1479_v21  ;;  %v1494_v48 = vmul.f32 %v1493_v47, %v1222_v12  ;;  %v3348_v9 = vadd.f32 %v3316_v17, %v630_v26 }
 0x3b3   :  { %v1814_v53 = vmul.f32 %v1813_v3, %v1510_v23 }
 0x3b4   :  { %v3377_v27 = vsub.f32 %v3345_v46, %v1829_v11  ;;  %v3378_v54 = vsub.f32 %v8177_v8, %v1829_v11 }
 0x3b5   :  { %v1830_v58 = vadd.f32 %v1814_v53, %v1494_v48 }
 0x3b6   :  { %v3408_v37 = vadd.f32 %v3407_v31, %v3377_v27 }
 0x3b7   :  { %v3379_v14 = vsub.f32 %v3347_v7, %v1830_v58  ;;  %v3380_v41 = vsub.f32 %v3348_v9, %v1830_v58 }
 0x3b8   :  { %v3409_v6 = vadd.f32 %v3408_v37, %v3378_v54 }
 0x3ba   :  { %v3410_v59 = vadd.f32 %v3409_v6, %v3379_v14 }
 0x3bc   :  { %v3411_v15 = vadd.f32 %v3410_v59, %v3380_v41 }
 0x3be   :  { %3412 = vst [vmem:[#allocation7] sm:$0xff] %v3411_v15 }
 0x3bf   :  { %3423 = dma.vmem_to_hbm [thread:$0]  %s3419_s24, 128, %s3421_s27, [#allocation4]  }
 0x3c0   :  { %4171 = dma.done.wait [#allocation4], 128  }
 0x3c1   :  { %4172 = vsyncadd [#allocation4], 4294967168 }
 0x3c2   :  { %3428 = vsyncpa [#allocation3], 1 }
 0x3c3   :  { %3429 = vsyncpa [#allocation6], 1 }
 0x3c4   :  { %3430 = vsyncpa [#allocation4], 1 }

</bundles_post_ra>
